<compile_context>
chip_gen: v6e
topology: v6e:2x2x1
jax: 0.10.0
libtpu: 0.0.40
codegen_flags: <defaults>
</compile_context>

<pallas_src>
import jax
import jax.numpy as jnp
from jax.experimental import pallas as pl
from jax.experimental.pallas import tpu as pltpu

_EPS = 1e-5
_SLOPE = 0.01
_OUT_PAD = 128     # lane-dense padded width of the 2-logit output


# ----------------------------------------------------------------------------
# Kernel
# ----------------------------------------------------------------------------
def _nothanks_kernel(xcat_ref, cw_ref, cb_ref, g0_ref, be0_ref,
                     w1_ref, b1_ref, g1_ref, be1_ref,
                     w2_ref, b2_ref, g2_ref, be2_ref,
                     w3_ref, b3_ref, g3_ref, be3_ref,
                     w4_ref, b4_ref, out_ref):
    L, Cout, D1 = w1_ref.shape            # W1 pre-permuted to (L, Cout, D1)
    N = xcat_ref.shape[0] // L            # xcat rows ordered l*N + n

    def leaky(z):
        return jnp.where(z > 0, z, _SLOPE * z)

    def batchnorm(z, g, b):
        # training-mode BN: batch mean / biased batch variance over axis 0
        m = jnp.mean(z, axis=0, keepdims=True)
        d = z - m
        v = jnp.mean(d * d, axis=0, keepdims=True)
        return g * d * jax.lax.rsqrt(v + _EPS) + b

    # ---- Conv1d(Cin, Cout, k=3, 'same') as one im2col matmul (tiny, f32) ---
    h = jnp.dot(xcat_ref[...], cw_ref[...],
                preferred_element_type=jnp.float32)            # (L*N, Cout)
    h = batchnorm(leaky(h + cb_ref[...]), g0_ref[...], be0_ref[...])

    # ---- Linear D1 -> D1: contract over (l, channel) with NO relayout ------
    # Rows of h are l*N + n; W1[l] holds the columns of the PyTorch weight
    # that multiply flatten index o*L + l, so sum_l h_l @ W1[l] == Linear.
    hb = h.astype(jnp.bfloat16)
    acc = jnp.zeros((N, D1), jnp.float32)
    for l in range(L):                                         # static unroll
        acc = acc + jnp.dot(hb[l * N:(l + 1) * N, :], w1_ref[l],
                            preferred_element_type=jnp.float32)
    z = batchnorm(leaky(acc + b1_ref[...]), g1_ref[...], be1_ref[...])

    def dense_bn(zin, w_ref, b_ref, g_ref, be_ref):
        zz = jnp.dot(zin.astype(w_ref.dtype), w_ref[...],
                     preferred_element_type=jnp.float32) + b_ref[...]
        return batchnorm(leaky(zz), g_ref[...], be_ref[...])

    z = dense_bn(z, w2_ref, b2_ref, g2_ref, be2_ref)           # D1 -> D2
    z = dense_bn(z, w3_ref, b3_ref, g3_ref, be3_ref)           # D2 -> D3

    # ---- Head D3 -> 2 (zero-padded to 128 lanes for an unmasked store) -----
    out_ref[...] = (jnp.dot(z, w4_ref[...],
                            preferred_element_type=jnp.float32)
                    + b4_ref[...])


# ----------------------------------------------------------------------------
# One-time parameter re-layout (cache the result; do NOT redo per call)
# ----------------------------------------------------------------------------
def prepare_params(params, num_players, num_cards):
    L = num_cards + 2
    Cin = num_players + 1
    Cout = num_players * 16
    D1 = Cout * L
    D2 = num_players * 4 * L
    D3 = num_players * L
    f32, bf16 = jnp.float32, jnp.bfloat16

    # Conv weight (Cout, Cin, 3) -> im2col layout (3*Cin, Cout); kept f32 (tiny)
    cw = jnp.transpose(params["conv_w"].astype(f32), (2, 1, 0)).reshape(3 * Cin, Cout)

    # PyTorch flatten of (N, Cout, L) is channel-major (col = o*L + l); the
    # kernel contracts sum_l h_l @ W1_3d[l], so permute W1^T rows to (L, Cout, D1).
    w1t = params["w1"].astype(f32).T                           # (D1, D1), row o*L+l
    w1_3d = w1t.reshape(Cout, L, D1).transpose(1, 0, 2).astype(bf16)

    w4t = params["w4"].astype(f32).T                           # (D3, 2)
    w4p = jnp.pad(w4t, ((0, 0), (0, _OUT_PAD - w4t.shape[1])))
    b4p = jnp.pad(params["b4"].astype(f32).reshape(1, -1),
                  ((0, 0), (0, _OUT_PAD - params["b4"].shape[0])))

    return dict(
        cw=cw,
        cb=params["conv_b"].astype(f32).reshape(1, Cout),
        g0=params["bn0_g"].astype(f32).reshape(1, Cout),
        be0=params["bn0_b"].astype(f32).reshape(1, Cout),
        w1=w1_3d, b1=params["b1"].astype(f32).reshape(1, D1),
        g1=params["bn1_g"].astype(f32).reshape(1, D1),
        be1=params["bn1_b"].astype(f32).reshape(1, D1),
        w2=params["w2"].T.astype(bf16),                        # (D1, D2)
        b2=params["b2"].astype(f32).reshape(1, D2),
        g2=params["bn2_g"].astype(f32).reshape(1, D2),
        be2=params["bn2_b"].astype(f32).reshape(1, D2),
        w3=params["w3"].T.astype(bf16),                        # (D2, D3)
        b3=params["b3"].astype(f32).reshape(1, D3),
        g3=params["bn3_g"].astype(f32).reshape(1, D3),
        be3=params["bn3_b"].astype(f32).reshape(1, D3),
        w4=w4p, b4=b4p,
    )


# ----------------------------------------------------------------------------
# Per-call wrapper (only tiny activation glue runs here)
# ----------------------------------------------------------------------------
@jax.jit
def nothanks_forward(x, kp):
    """x: (N, num_players + 1, num_cards + 2), PyTorch Conv1d NCL layout."""
    N, Cin, L = x.shape

    x = x.astype(jnp.float32)
    x_nlc = jnp.transpose(x, (0, 2, 1))                        # (N, L, Cin)
    x_pad = jnp.pad(x_nlc, ((0, 0), (1, 1), (0, 0)))           # 'same' pad, k=3
    # im2col (k=3) with rows ordered l*N + n so the kernel never relayouts.
    xcat = jnp.concatenate([x_pad[:, k:k + L, :] for k in range(3)], axis=-1)
    xcat = jnp.transpose(xcat, (1, 0, 2)).reshape(L * N, 3 * Cin)

    args = (xcat, kp["cw"], kp["cb"], kp["g0"], kp["be0"],
            kp["w1"], kp["b1"], kp["g1"], kp["be1"],
            kp["w2"], kp["b2"], kp["g2"], kp["be2"],
            kp["w3"], kp["b3"], kp["g3"], kp["be3"],
            kp["w4"], kp["b4"])

    out = pl.pallas_call(
        _nothanks_kernel,
        out_shape=jax.ShapeDtypeStruct((N, _OUT_PAD), jnp.float32),
        in_specs=[pl.BlockSpec(memory_space=pltpu.MemorySpace.VMEM)] * len(args),
        out_specs=pl.BlockSpec(memory_space=pltpu.MemorySpace.VMEM),
        compiler_params=pltpu.CompilerParams(
            vmem_limit_bytes=16 * 1024 * 1024),   # ~3 MiB used; safe on v5e/v6e/v7x
    )(*args)
    return out[:, :2]


# ----------------------------------------------------------------------------
# Deterministic synthetic parameters (PyTorch-shaped)
# ----------------------------------------------------------------------------
def make_params(key, num_players, num_cards):
    L = num_cards + 2
    Cin = num_players + 1
    Cout = num_players * 16
    D1 = Cout * L
    D2 = num_players * 4 * L
    D3 = num_players * L

    ks = jax.random.split(key, 10)

    def w(k, shape, fan_in):
        return (jax.random.normal(k, shape, jnp.float32)
                / jnp.sqrt(jnp.float32(fan_in)))

    def b(k, shape):
        return 0.01 * jax.random.normal(k, shape, jnp.float32)

    return dict(
        conv_w=w(ks[0], (Cout, Cin, 3), Cin * 3),
        conv_b=b(ks[1], (Cout,)),
        bn0_g=jnp.ones((Cout,), jnp.float32),
        bn0_b=jnp.zeros((Cout,), jnp.float32),
        w1=w(ks[2], (D1, D1), D1), b1=b(ks[3], (D1,)),
        bn1_g=jnp.ones((D1,), jnp.float32),
        bn1_b=jnp.zeros((D1,), jnp.float32),
        w2=w(ks[4], (D2, D1), D1), b2=b(ks[5], (D2,)),
        bn2_g=jnp.ones((D2,), jnp.float32),
        bn2_b=jnp.zeros((D2,), jnp.float32),
        w3=w(ks[6], (D3, D2), D2), b3=b(ks[7], (D3,)),
        bn3_g=jnp.ones((D3,), jnp.float32),
        bn3_b=jnp.zeros((D3,), jnp.float32),
        w4=w(ks[8], (2, D3), D3), b4=b(ks[9], (2,)),
    )


if __name__ == "__main__":
    num_players = 4
    num_cards = 14                 # L = num_cards + 2 = 16
    N = 2                          # batch

    key = jax.random.PRNGKey(0)
    params = make_params(key, num_players, num_cards)
    kparams = prepare_params(params, num_players, num_cards)   # one-time cache

    x = jax.random.normal(jax.random.fold_in(key, 999),
                          (N, num_players + 1, num_cards + 2), jnp.float32)

    y = nothanks_forward(x, kparams)
    y = jax.block_until_ready(y)
    assert y.shape == (N, 2) and y.dtype == jnp.float32
    assert bool(jnp.all(jnp.isfinite(y)))
    print("KERNEL_OK")
</pallas_src>

<mosaic_0001>
module attributes {stable_mosaic.version = 11 : i64} {
  func.func @_nothanks_kernel(%arg0: memref<32x15xf32, #tpu.memory_space<vmem>>, %arg1: memref<15x64xf32, #tpu.memory_space<vmem>>, %arg2: memref<1x64xf32, #tpu.memory_space<vmem>>, %arg3: memref<1x64xf32, #tpu.memory_space<vmem>>, %arg4: memref<1x64xf32, #tpu.memory_space<vmem>>, %arg5: memref<16x64x1024xbf16, #tpu.memory_space<vmem>>, %arg6: memref<1x1024xf32, #tpu.memory_space<vmem>>, %arg7: memref<1x1024xf32, #tpu.memory_space<vmem>>, %arg8: memref<1x1024xf32, #tpu.memory_space<vmem>>, %arg9: memref<1024x256xbf16, #tpu.memory_space<vmem>>, %arg10: memref<1x256xf32, #tpu.memory_space<vmem>>, %arg11: memref<1x256xf32, #tpu.memory_space<vmem>>, %arg12: memref<1x256xf32, #tpu.memory_space<vmem>>, %arg13: memref<256x64xbf16, #tpu.memory_space<vmem>>, %arg14: memref<1x64xf32, #tpu.memory_space<vmem>>, %arg15: memref<1x64xf32, #tpu.memory_space<vmem>>, %arg16: memref<1x64xf32, #tpu.memory_space<vmem>>, %arg17: memref<64x128xf32, #tpu.memory_space<vmem>>, %arg18: memref<1x128xf32, #tpu.memory_space<vmem>>, %arg19: memref<2x128xf32, #tpu.memory_space<vmem>>) attributes {dimension_semantics = [], scalar_prefetch = 0 : i64, scratch_operands = 0 : i64, tpu.core_type = #tpu.core_type<tc>} {
    %c0 = arith.constant 0 : index
    %c0_0 = arith.constant 0 : index
    %0 = vector.load %arg0[%c0, %c0_0] : memref<32x15xf32, #tpu.memory_space<vmem>>, vector<32x15xf32>
    %c0_1 = arith.constant 0 : index
    %c0_2 = arith.constant 0 : index
    %1 = vector.load %arg1[%c0_1, %c0_2] : memref<15x64xf32, #tpu.memory_space<vmem>>, vector<15x64xf32>
    %cst = arith.constant dense<0.000000e+00> : vector<32x64xf32>
    %2 = tpu.matmul %0, %1, %cst {dimension_numbers = #tpu.dot_dimension_numbers<[1], [0], [0], [1], [0, 0, 1, 1], [], []>} : vector<32x15xf32>, vector<15x64xf32>, vector<32x64xf32> -> vector<32x64xf32>
    %c0_3 = arith.constant 0 : index
    %c0_4 = arith.constant 0 : index
    %3 = vector.load %arg2[%c0_3, %c0_4] : memref<1x64xf32, #tpu.memory_space<vmem>>, vector<1x64xf32>
    %4 = vector.broadcast %3 : vector<1x64xf32> to vector<32x64xf32>
    %5 = arith.addf %2, %4 : vector<32x64xf32>
    %cst_5 = arith.constant 0.000000e+00 : f32
    %6 = vector.broadcast %cst_5 : f32 to vector<32x64xf32>
    %7 = arith.cmpf ogt, %5, %6 : vector<32x64xf32>
    %cst_6 = arith.constant 0.00999999977 : f32
    %8 = vector.broadcast %cst_6 : f32 to vector<32x64xf32>
    %9 = arith.mulf %8, %5 : vector<32x64xf32>
    %10 = arith.select %7, %5, %9 : vector<32x64xi1>, vector<32x64xf32>
    %c0_7 = arith.constant 0 : index
    %c0_8 = arith.constant 0 : index
    %11 = vector.load %arg3[%c0_7, %c0_8] : memref<1x64xf32, #tpu.memory_space<vmem>>, vector<1x64xf32>
    %c0_9 = arith.constant 0 : index
    %c0_10 = arith.constant 0 : index
    %12 = vector.load %arg4[%c0_9, %c0_10] : memref<1x64xf32, #tpu.memory_space<vmem>>, vector<1x64xf32>
    %cst_11 = arith.constant dense<0.000000e+00> : vector<64xf32>
    %13 = vector.multi_reduction <add>, %10, %cst_11 [0] : vector<32x64xf32> to vector<64xf32>
    %14 = vector.shape_cast %13 : vector<64xf32> to vector<1x64xf32>
    %cst_12 = arith.constant 3.200000e+01 : f32
    %15 = vector.broadcast %cst_12 : f32 to vector<1x64xf32>
    %16 = arith.divf %14, %15 : vector<1x64xf32>
    %17 = vector.broadcast %16 : vector<1x64xf32> to vector<32x64xf32>
    %18 = arith.subf %10, %17 : vector<32x64xf32>
    %19 = arith.mulf %18, %18 : vector<32x64xf32>
    %cst_13 = arith.constant dense<0.000000e+00> : vector<64xf32>
    %20 = vector.multi_reduction <add>, %19, %cst_13 [0] : vector<32x64xf32> to vector<64xf32>
    %21 = vector.shape_cast %20 : vector<64xf32> to vector<1x64xf32>
    %cst_14 = arith.constant 3.200000e+01 : f32
    %22 = vector.broadcast %cst_14 : f32 to vector<1x64xf32>
    %23 = arith.divf %21, %22 : vector<1x64xf32>
    %24 = vector.broadcast %11 : vector<1x64xf32> to vector<32x64xf32>
    %25 = arith.mulf %24, %18 : vector<32x64xf32>
    %cst_15 = arith.constant 9.99999974E-6 : f32
    %26 = vector.broadcast %cst_15 : f32 to vector<1x64xf32>
    %27 = arith.addf %23, %26 : vector<1x64xf32>
    %28 = math.rsqrt %27 : vector<1x64xf32>
    %29 = vector.broadcast %28 : vector<1x64xf32> to vector<32x64xf32>
    %30 = arith.mulf %25, %29 : vector<32x64xf32>
    %31 = vector.broadcast %12 : vector<1x64xf32> to vector<32x64xf32>
    %32 = arith.addf %30, %31 : vector<32x64xf32>
    %33 = arith.truncf %32 : vector<32x64xf32> to vector<32x64xbf16>
    %cst_16 = arith.constant 0.000000e+00 : f32
    %34 = vector.broadcast %cst_16 : f32 to vector<2x1024xf32>
    %35 = vector.extract_strided_slice %33 {offsets = [0, 0], sizes = [2, 64], strides = [1, 1]} : vector<32x64xbf16> to vector<2x64xbf16>
    %c0_17 = arith.constant 0 : index
    %c0_18 = arith.constant 0 : index
    %c0_19 = arith.constant 0 : index
    %36 = vector.load %arg5[%c0_17, %c0_18, %c0_19] : memref<16x64x1024xbf16, #tpu.memory_space<vmem>>, vector<1x64x1024xbf16>
    %37 = vector.shape_cast %36 : vector<1x64x1024xbf16> to vector<64x1024xbf16>
    %cst_20 = arith.constant dense<0.000000e+00> : vector<2x1024xf32>
    %38 = tpu.matmul %35, %37, %cst_20 {dimension_numbers = #tpu.dot_dimension_numbers<[1], [0], [0], [1], [0, 0, 1, 1], [], []>} : vector<2x64xbf16>, vector<64x1024xbf16>, vector<2x1024xf32> -> vector<2x1024xf32>
    %39 = arith.addf %34, %38 : vector<2x1024xf32>
    %40 = vector.extract_strided_slice %33 {offsets = [2, 0], sizes = [2, 64], strides = [1, 1]} : vector<32x64xbf16> to vector<2x64xbf16>
    %c1 = arith.constant 1 : index
    %c0_21 = arith.constant 0 : index
    %c0_22 = arith.constant 0 : index
    %41 = vector.load %arg5[%c1, %c0_21, %c0_22] : memref<16x64x1024xbf16, #tpu.memory_space<vmem>>, vector<1x64x1024xbf16>
    %42 = vector.shape_cast %41 : vector<1x64x1024xbf16> to vector<64x1024xbf16>
    %cst_23 = arith.constant dense<0.000000e+00> : vector<2x1024xf32>
    %43 = tpu.matmul %40, %42, %cst_23 {dimension_numbers = #tpu.dot_dimension_numbers<[1], [0], [0], [1], [0, 0, 1, 1], [], []>} : vector<2x64xbf16>, vector<64x1024xbf16>, vector<2x1024xf32> -> vector<2x1024xf32>
    %44 = arith.addf %39, %43 : vector<2x1024xf32>
    %45 = vector.extract_strided_slice %33 {offsets = [4, 0], sizes = [2, 64], strides = [1, 1]} : vector<32x64xbf16> to vector<2x64xbf16>
    %c2 = arith.constant 2 : index
    %c0_24 = arith.constant 0 : index
    %c0_25 = arith.constant 0 : index
    %46 = vector.load %arg5[%c2, %c0_24, %c0_25] : memref<16x64x1024xbf16, #tpu.memory_space<vmem>>, vector<1x64x1024xbf16>
    %47 = vector.shape_cast %46 : vector<1x64x1024xbf16> to vector<64x1024xbf16>
    %cst_26 = arith.constant dense<0.000000e+00> : vector<2x1024xf32>
    %48 = tpu.matmul %45, %47, %cst_26 {dimension_numbers = #tpu.dot_dimension_numbers<[1], [0], [0], [1], [0, 0, 1, 1], [], []>} : vector<2x64xbf16>, vector<64x1024xbf16>, vector<2x1024xf32> -> vector<2x1024xf32>
    %49 = arith.addf %44, %48 : vector<2x1024xf32>
    %50 = vector.extract_strided_slice %33 {offsets = [6, 0], sizes = [2, 64], strides = [1, 1]} : vector<32x64xbf16> to vector<2x64xbf16>
    %c3 = arith.constant 3 : index
    %c0_27 = arith.constant 0 : index
    %c0_28 = arith.constant 0 : index
    %51 = vector.load %arg5[%c3, %c0_27, %c0_28] : memref<16x64x1024xbf16, #tpu.memory_space<vmem>>, vector<1x64x1024xbf16>
    %52 = vector.shape_cast %51 : vector<1x64x1024xbf16> to vector<64x1024xbf16>
    %cst_29 = arith.constant dense<0.000000e+00> : vector<2x1024xf32>
    %53 = tpu.matmul %50, %52, %cst_29 {dimension_numbers = #tpu.dot_dimension_numbers<[1], [0], [0], [1], [0, 0, 1, 1], [], []>} : vector<2x64xbf16>, vector<64x1024xbf16>, vector<2x1024xf32> -> vector<2x1024xf32>
    %54 = arith.addf %49, %53 : vector<2x1024xf32>
    %55 = vector.extract_strided_slice %33 {offsets = [8, 0], sizes = [2, 64], strides = [1, 1]} : vector<32x64xbf16> to vector<2x64xbf16>
    %c4 = arith.constant 4 : index
    %c0_30 = arith.constant 0 : index
    %c0_31 = arith.constant 0 : index
    %56 = vector.load %arg5[%c4, %c0_30, %c0_31] : memref<16x64x1024xbf16, #tpu.memory_space<vmem>>, vector<1x64x1024xbf16>
    %57 = vector.shape_cast %56 : vector<1x64x1024xbf16> to vector<64x1024xbf16>
    %cst_32 = arith.constant dense<0.000000e+00> : vector<2x1024xf32>
    %58 = tpu.matmul %55, %57, %cst_32 {dimension_numbers = #tpu.dot_dimension_numbers<[1], [0], [0], [1], [0, 0, 1, 1], [], []>} : vector<2x64xbf16>, vector<64x1024xbf16>, vector<2x1024xf32> -> vector<2x1024xf32>
    %59 = arith.addf %54, %58 : vector<2x1024xf32>
    %60 = vector.extract_strided_slice %33 {offsets = [10, 0], sizes = [2, 64], strides = [1, 1]} : vector<32x64xbf16> to vector<2x64xbf16>
    %c5 = arith.constant 5 : index
    %c0_33 = arith.constant 0 : index
    %c0_34 = arith.constant 0 : index
    %61 = vector.load %arg5[%c5, %c0_33, %c0_34] : memref<16x64x1024xbf16, #tpu.memory_space<vmem>>, vector<1x64x1024xbf16>
    %62 = vector.shape_cast %61 : vector<1x64x1024xbf16> to vector<64x1024xbf16>
    %cst_35 = arith.constant dense<0.000000e+00> : vector<2x1024xf32>
    %63 = tpu.matmul %60, %62, %cst_35 {dimension_numbers = #tpu.dot_dimension_numbers<[1], [0], [0], [1], [0, 0, 1, 1], [], []>} : vector<2x64xbf16>, vector<64x1024xbf16>, vector<2x1024xf32> -> vector<2x1024xf32>
    %64 = arith.addf %59, %63 : vector<2x1024xf32>
    %65 = vector.extract_strided_slice %33 {offsets = [12, 0], sizes = [2, 64], strides = [1, 1]} : vector<32x64xbf16> to vector<2x64xbf16>
    %c6 = arith.constant 6 : index
    %c0_36 = arith.constant 0 : index
    %c0_37 = arith.constant 0 : index
    %66 = vector.load %arg5[%c6, %c0_36, %c0_37] : memref<16x64x1024xbf16, #tpu.memory_space<vmem>>, vector<1x64x1024xbf16>
    %67 = vector.shape_cast %66 : vector<1x64x1024xbf16> to vector<64x1024xbf16>
    %cst_38 = arith.constant dense<0.000000e+00> : vector<2x1024xf32>
    %68 = tpu.matmul %65, %67, %cst_38 {dimension_numbers = #tpu.dot_dimension_numbers<[1], [0], [0], [1], [0, 0, 1, 1], [], []>} : vector<2x64xbf16>, vector<64x1024xbf16>, vector<2x1024xf32> -> vector<2x1024xf32>
    %69 = arith.addf %64, %68 : vector<2x1024xf32>
    %70 = vector.extract_strided_slice %33 {offsets = [14, 0], sizes = [2, 64], strides = [1, 1]} : vector<32x64xbf16> to vector<2x64xbf16>
    %c7 = arith.constant 7 : index
    %c0_39 = arith.constant 0 : index
    %c0_40 = arith.constant 0 : index
    %71 = vector.load %arg5[%c7, %c0_39, %c0_40] : memref<16x64x1024xbf16, #tpu.memory_space<vmem>>, vector<1x64x1024xbf16>
    %72 = vector.shape_cast %71 : vector<1x64x1024xbf16> to vector<64x1024xbf16>
    %cst_41 = arith.constant dense<0.000000e+00> : vector<2x1024xf32>
    %73 = tpu.matmul %70, %72, %cst_41 {dimension_numbers = #tpu.dot_dimension_numbers<[1], [0], [0], [1], [0, 0, 1, 1], [], []>} : vector<2x64xbf16>, vector<64x1024xbf16>, vector<2x1024xf32> -> vector<2x1024xf32>
    %74 = arith.addf %69, %73 : vector<2x1024xf32>
    %75 = vector.extract_strided_slice %33 {offsets = [16, 0], sizes = [2, 64], strides = [1, 1]} : vector<32x64xbf16> to vector<2x64xbf16>
    %c8 = arith.constant 8 : index
    %c0_42 = arith.constant 0 : index
    %c0_43 = arith.constant 0 : index
    %76 = vector.load %arg5[%c8, %c0_42, %c0_43] : memref<16x64x1024xbf16, #tpu.memory_space<vmem>>, vector<1x64x1024xbf16>
    %77 = vector.shape_cast %76 : vector<1x64x1024xbf16> to vector<64x1024xbf16>
    %cst_44 = arith.constant dense<0.000000e+00> : vector<2x1024xf32>
    %78 = tpu.matmul %75, %77, %cst_44 {dimension_numbers = #tpu.dot_dimension_numbers<[1], [0], [0], [1], [0, 0, 1, 1], [], []>} : vector<2x64xbf16>, vector<64x1024xbf16>, vector<2x1024xf32> -> vector<2x1024xf32>
    %79 = arith.addf %74, %78 : vector<2x1024xf32>
    %80 = vector.extract_strided_slice %33 {offsets = [18, 0], sizes = [2, 64], strides = [1, 1]} : vector<32x64xbf16> to vector<2x64xbf16>
    %c9 = arith.constant 9 : index
    %c0_45 = arith.constant 0 : index
    %c0_46 = arith.constant 0 : index
    %81 = vector.load %arg5[%c9, %c0_45, %c0_46] : memref<16x64x1024xbf16, #tpu.memory_space<vmem>>, vector<1x64x1024xbf16>
    %82 = vector.shape_cast %81 : vector<1x64x1024xbf16> to vector<64x1024xbf16>
    %cst_47 = arith.constant dense<0.000000e+00> : vector<2x1024xf32>
    %83 = tpu.matmul %80, %82, %cst_47 {dimension_numbers = #tpu.dot_dimension_numbers<[1], [0], [0], [1], [0, 0, 1, 1], [], []>} : vector<2x64xbf16>, vector<64x1024xbf16>, vector<2x1024xf32> -> vector<2x1024xf32>
    %84 = arith.addf %79, %83 : vector<2x1024xf32>
    %85 = vector.extract_strided_slice %33 {offsets = [20, 0], sizes = [2, 64], strides = [1, 1]} : vector<32x64xbf16> to vector<2x64xbf16>
    %c10 = arith.constant 10 : index
    %c0_48 = arith.constant 0 : index
    %c0_49 = arith.constant 0 : index
    %86 = vector.load %arg5[%c10, %c0_48, %c0_49] : memref<16x64x1024xbf16, #tpu.memory_space<vmem>>, vector<1x64x1024xbf16>
    %87 = vector.shape_cast %86 : vector<1x64x1024xbf16> to vector<64x1024xbf16>
    %cst_50 = arith.constant dense<0.000000e+00> : vector<2x1024xf32>
    %88 = tpu.matmul %85, %87, %cst_50 {dimension_numbers = #tpu.dot_dimension_numbers<[1], [0], [0], [1], [0, 0, 1, 1], [], []>} : vector<2x64xbf16>, vector<64x1024xbf16>, vector<2x1024xf32> -> vector<2x1024xf32>
    %89 = arith.addf %84, %88 : vector<2x1024xf32>
    %90 = vector.extract_strided_slice %33 {offsets = [22, 0], sizes = [2, 64], strides = [1, 1]} : vector<32x64xbf16> to vector<2x64xbf16>
    %c11 = arith.constant 11 : index
    %c0_51 = arith.constant 0 : index
    %c0_52 = arith.constant 0 : index
    %91 = vector.load %arg5[%c11, %c0_51, %c0_52] : memref<16x64x1024xbf16, #tpu.memory_space<vmem>>, vector<1x64x1024xbf16>
    %92 = vector.shape_cast %91 : vector<1x64x1024xbf16> to vector<64x1024xbf16>
    %cst_53 = arith.constant dense<0.000000e+00> : vector<2x1024xf32>
    %93 = tpu.matmul %90, %92, %cst_53 {dimension_numbers = #tpu.dot_dimension_numbers<[1], [0], [0], [1], [0, 0, 1, 1], [], []>} : vector<2x64xbf16>, vector<64x1024xbf16>, vector<2x1024xf32> -> vector<2x1024xf32>
    %94 = arith.addf %89, %93 : vector<2x1024xf32>
    %95 = vector.extract_strided_slice %33 {offsets = [24, 0], sizes = [2, 64], strides = [1, 1]} : vector<32x64xbf16> to vector<2x64xbf16>
    %c12 = arith.constant 12 : index
    %c0_54 = arith.constant 0 : index
    %c0_55 = arith.constant 0 : index
    %96 = vector.load %arg5[%c12, %c0_54, %c0_55] : memref<16x64x1024xbf16, #tpu.memory_space<vmem>>, vector<1x64x1024xbf16>
    %97 = vector.shape_cast %96 : vector<1x64x1024xbf16> to vector<64x1024xbf16>
    %cst_56 = arith.constant dense<0.000000e+00> : vector<2x1024xf32>
    %98 = tpu.matmul %95, %97, %cst_56 {dimension_numbers = #tpu.dot_dimension_numbers<[1], [0], [0], [1], [0, 0, 1, 1], [], []>} : vector<2x64xbf16>, vector<64x1024xbf16>, vector<2x1024xf32> -> vector<2x1024xf32>
    %99 = arith.addf %94, %98 : vector<2x1024xf32>
    %100 = vector.extract_strided_slice %33 {offsets = [26, 0], sizes = [2, 64], strides = [1, 1]} : vector<32x64xbf16> to vector<2x64xbf16>
    %c13 = arith.constant 13 : index
    %c0_57 = arith.constant 0 : index
    %c0_58 = arith.constant 0 : index
    %101 = vector.load %arg5[%c13, %c0_57, %c0_58] : memref<16x64x1024xbf16, #tpu.memory_space<vmem>>, vector<1x64x1024xbf16>
    %102 = vector.shape_cast %101 : vector<1x64x1024xbf16> to vector<64x1024xbf16>
    %cst_59 = arith.constant dense<0.000000e+00> : vector<2x1024xf32>
    %103 = tpu.matmul %100, %102, %cst_59 {dimension_numbers = #tpu.dot_dimension_numbers<[1], [0], [0], [1], [0, 0, 1, 1], [], []>} : vector<2x64xbf16>, vector<64x1024xbf16>, vector<2x1024xf32> -> vector<2x1024xf32>
    %104 = arith.addf %99, %103 : vector<2x1024xf32>
    %105 = vector.extract_strided_slice %33 {offsets = [28, 0], sizes = [2, 64], strides = [1, 1]} : vector<32x64xbf16> to vector<2x64xbf16>
    %c14 = arith.constant 14 : index
    %c0_60 = arith.constant 0 : index
    %c0_61 = arith.constant 0 : index
    %106 = vector.load %arg5[%c14, %c0_60, %c0_61] : memref<16x64x1024xbf16, #tpu.memory_space<vmem>>, vector<1x64x1024xbf16>
    %107 = vector.shape_cast %106 : vector<1x64x1024xbf16> to vector<64x1024xbf16>
    %cst_62 = arith.constant dense<0.000000e+00> : vector<2x1024xf32>
    %108 = tpu.matmul %105, %107, %cst_62 {dimension_numbers = #tpu.dot_dimension_numbers<[1], [0], [0], [1], [0, 0, 1, 1], [], []>} : vector<2x64xbf16>, vector<64x1024xbf16>, vector<2x1024xf32> -> vector<2x1024xf32>
    %109 = arith.addf %104, %108 : vector<2x1024xf32>
    %110 = vector.extract_strided_slice %33 {offsets = [30, 0], sizes = [2, 64], strides = [1, 1]} : vector<32x64xbf16> to vector<2x64xbf16>
    %c15 = arith.constant 15 : index
    %c0_63 = arith.constant 0 : index
    %c0_64 = arith.constant 0 : index
    %111 = vector.load %arg5[%c15, %c0_63, %c0_64] : memref<16x64x1024xbf16, #tpu.memory_space<vmem>>, vector<1x64x1024xbf16>
    %112 = vector.shape_cast %111 : vector<1x64x1024xbf16> to vector<64x1024xbf16>
    %cst_65 = arith.constant dense<0.000000e+00> : vector<2x1024xf32>
    %113 = tpu.matmul %110, %112, %cst_65 {dimension_numbers = #tpu.dot_dimension_numbers<[1], [0], [0], [1], [0, 0, 1, 1], [], []>} : vector<2x64xbf16>, vector<64x1024xbf16>, vector<2x1024xf32> -> vector<2x1024xf32>
    %114 = arith.addf %109, %113 : vector<2x1024xf32>
    %c0_66 = arith.constant 0 : index
    %c0_67 = arith.constant 0 : index
    %115 = vector.load %arg6[%c0_66, %c0_67] : memref<1x1024xf32, #tpu.memory_space<vmem>>, vector<1x1024xf32>
    %116 = vector.broadcast %115 : vector<1x1024xf32> to vector<2x1024xf32>
    %117 = arith.addf %114, %116 : vector<2x1024xf32>
    %cst_68 = arith.constant 0.000000e+00 : f32
    %118 = vector.broadcast %cst_68 : f32 to vector<2x1024xf32>
    %119 = arith.cmpf ogt, %117, %118 : vector<2x1024xf32>
    %cst_69 = arith.constant 0.00999999977 : f32
    %120 = vector.broadcast %cst_69 : f32 to vector<2x1024xf32>
    %121 = arith.mulf %120, %117 : vector<2x1024xf32>
    %122 = arith.select %119, %117, %121 : vector<2x1024xi1>, vector<2x1024xf32>
    %c0_70 = arith.constant 0 : index
    %c0_71 = arith.constant 0 : index
    %123 = vector.load %arg7[%c0_70, %c0_71] : memref<1x1024xf32, #tpu.memory_space<vmem>>, vector<1x1024xf32>
    %c0_72 = arith.constant 0 : index
    %c0_73 = arith.constant 0 : index
    %124 = vector.load %arg8[%c0_72, %c0_73] : memref<1x1024xf32, #tpu.memory_space<vmem>>, vector<1x1024xf32>
    %cst_74 = arith.constant dense<0.000000e+00> : vector<1024xf32>
    %125 = vector.multi_reduction <add>, %122, %cst_74 [0] : vector<2x1024xf32> to vector<1024xf32>
    %126 = vector.shape_cast %125 : vector<1024xf32> to vector<1x1024xf32>
    %cst_75 = arith.constant 2.000000e+00 : f32
    %127 = vector.broadcast %cst_75 : f32 to vector<1x1024xf32>
    %128 = arith.divf %126, %127 : vector<1x1024xf32>
    %129 = vector.broadcast %128 : vector<1x1024xf32> to vector<2x1024xf32>
    %130 = arith.subf %122, %129 : vector<2x1024xf32>
    %131 = arith.mulf %130, %130 : vector<2x1024xf32>
    %cst_76 = arith.constant dense<0.000000e+00> : vector<1024xf32>
    %132 = vector.multi_reduction <add>, %131, %cst_76 [0] : vector<2x1024xf32> to vector<1024xf32>
    %133 = vector.shape_cast %132 : vector<1024xf32> to vector<1x1024xf32>
    %cst_77 = arith.constant 2.000000e+00 : f32
    %134 = vector.broadcast %cst_77 : f32 to vector<1x1024xf32>
    %135 = arith.divf %133, %134 : vector<1x1024xf32>
    %136 = vector.broadcast %123 : vector<1x1024xf32> to vector<2x1024xf32>
    %137 = arith.mulf %136, %130 : vector<2x1024xf32>
    %cst_78 = arith.constant 9.99999974E-6 : f32
    %138 = vector.broadcast %cst_78 : f32 to vector<1x1024xf32>
    %139 = arith.addf %135, %138 : vector<1x1024xf32>
    %140 = math.rsqrt %139 : vector<1x1024xf32>
    %141 = vector.broadcast %140 : vector<1x1024xf32> to vector<2x1024xf32>
    %142 = arith.mulf %137, %141 : vector<2x1024xf32>
    %143 = vector.broadcast %124 : vector<1x1024xf32> to vector<2x1024xf32>
    %144 = arith.addf %142, %143 : vector<2x1024xf32>
    %145 = arith.truncf %144 : vector<2x1024xf32> to vector<2x1024xbf16>
    %c0_79 = arith.constant 0 : index
    %c0_80 = arith.constant 0 : index
    %146 = vector.load %arg9[%c0_79, %c0_80] : memref<1024x256xbf16, #tpu.memory_space<vmem>>, vector<1024x256xbf16>
    %cst_81 = arith.constant dense<0.000000e+00> : vector<2x256xf32>
    %147 = tpu.matmul %145, %146, %cst_81 {dimension_numbers = #tpu.dot_dimension_numbers<[1], [0], [0], [1], [0, 0, 1, 1], [], []>} : vector<2x1024xbf16>, vector<1024x256xbf16>, vector<2x256xf32> -> vector<2x256xf32>
    %c0_82 = arith.constant 0 : index
    %c0_83 = arith.constant 0 : index
    %148 = vector.load %arg10[%c0_82, %c0_83] : memref<1x256xf32, #tpu.memory_space<vmem>>, vector<1x256xf32>
    %149 = vector.broadcast %148 : vector<1x256xf32> to vector<2x256xf32>
    %150 = arith.addf %147, %149 : vector<2x256xf32>
    %cst_84 = arith.constant 0.000000e+00 : f32
    %151 = vector.broadcast %cst_84 : f32 to vector<2x256xf32>
    %152 = arith.cmpf ogt, %150, %151 : vector<2x256xf32>
    %cst_85 = arith.constant 0.00999999977 : f32
    %153 = vector.broadcast %cst_85 : f32 to vector<2x256xf32>
    %154 = arith.mulf %153, %150 : vector<2x256xf32>
    %155 = arith.select %152, %150, %154 : vector<2x256xi1>, vector<2x256xf32>
    %c0_86 = arith.constant 0 : index
    %c0_87 = arith.constant 0 : index
    %156 = vector.load %arg11[%c0_86, %c0_87] : memref<1x256xf32, #tpu.memory_space<vmem>>, vector<1x256xf32>
    %c0_88 = arith.constant 0 : index
    %c0_89 = arith.constant 0 : index
    %157 = vector.load %arg12[%c0_88, %c0_89] : memref<1x256xf32, #tpu.memory_space<vmem>>, vector<1x256xf32>
    %cst_90 = arith.constant dense<0.000000e+00> : vector<256xf32>
    %158 = vector.multi_reduction <add>, %155, %cst_90 [0] : vector<2x256xf32> to vector<256xf32>
    %159 = vector.shape_cast %158 : vector<256xf32> to vector<1x256xf32>
    %cst_91 = arith.constant 2.000000e+00 : f32
    %160 = vector.broadcast %cst_91 : f32 to vector<1x256xf32>
    %161 = arith.divf %159, %160 : vector<1x256xf32>
    %162 = vector.broadcast %161 : vector<1x256xf32> to vector<2x256xf32>
    %163 = arith.subf %155, %162 : vector<2x256xf32>
    %164 = arith.mulf %163, %163 : vector<2x256xf32>
    %cst_92 = arith.constant dense<0.000000e+00> : vector<256xf32>
    %165 = vector.multi_reduction <add>, %164, %cst_92 [0] : vector<2x256xf32> to vector<256xf32>
    %166 = vector.shape_cast %165 : vector<256xf32> to vector<1x256xf32>
    %cst_93 = arith.constant 2.000000e+00 : f32
    %167 = vector.broadcast %cst_93 : f32 to vector<1x256xf32>
    %168 = arith.divf %166, %167 : vector<1x256xf32>
    %169 = vector.broadcast %156 : vector<1x256xf32> to vector<2x256xf32>
    %170 = arith.mulf %169, %163 : vector<2x256xf32>
    %cst_94 = arith.constant 9.99999974E-6 : f32
    %171 = vector.broadcast %cst_94 : f32 to vector<1x256xf32>
    %172 = arith.addf %168, %171 : vector<1x256xf32>
    %173 = math.rsqrt %172 : vector<1x256xf32>
    %174 = vector.broadcast %173 : vector<1x256xf32> to vector<2x256xf32>
    %175 = arith.mulf %170, %174 : vector<2x256xf32>
    %176 = vector.broadcast %157 : vector<1x256xf32> to vector<2x256xf32>
    %177 = arith.addf %175, %176 : vector<2x256xf32>
    %178 = arith.truncf %177 : vector<2x256xf32> to vector<2x256xbf16>
    %c0_95 = arith.constant 0 : index
    %c0_96 = arith.constant 0 : index
    %179 = vector.load %arg13[%c0_95, %c0_96] : memref<256x64xbf16, #tpu.memory_space<vmem>>, vector<256x64xbf16>
    %cst_97 = arith.constant dense<0.000000e+00> : vector<2x64xf32>
    %180 = tpu.matmul %178, %179, %cst_97 {dimension_numbers = #tpu.dot_dimension_numbers<[1], [0], [0], [1], [0, 0, 1, 1], [], []>} : vector<2x256xbf16>, vector<256x64xbf16>, vector<2x64xf32> -> vector<2x64xf32>
    %c0_98 = arith.constant 0 : index
    %c0_99 = arith.constant 0 : index
    %181 = vector.load %arg14[%c0_98, %c0_99] : memref<1x64xf32, #tpu.memory_space<vmem>>, vector<1x64xf32>
    %182 = vector.broadcast %181 : vector<1x64xf32> to vector<2x64xf32>
    %183 = arith.addf %180, %182 : vector<2x64xf32>
    %cst_100 = arith.constant 0.000000e+00 : f32
    %184 = vector.broadcast %cst_100 : f32 to vector<2x64xf32>
    %185 = arith.cmpf ogt, %183, %184 : vector<2x64xf32>
    %cst_101 = arith.constant 0.00999999977 : f32
    %186 = vector.broadcast %cst_101 : f32 to vector<2x64xf32>
    %187 = arith.mulf %186, %183 : vector<2x64xf32>
    %188 = arith.select %185, %183, %187 : vector<2x64xi1>, vector<2x64xf32>
    %c0_102 = arith.constant 0 : index
    %c0_103 = arith.constant 0 : index
    %189 = vector.load %arg15[%c0_102, %c0_103] : memref<1x64xf32, #tpu.memory_space<vmem>>, vector<1x64xf32>
    %c0_104 = arith.constant 0 : index
    %c0_105 = arith.constant 0 : index
    %190 = vector.load %arg16[%c0_104, %c0_105] : memref<1x64xf32, #tpu.memory_space<vmem>>, vector<1x64xf32>
    %cst_106 = arith.constant dense<0.000000e+00> : vector<64xf32>
    %191 = vector.multi_reduction <add>, %188, %cst_106 [0] : vector<2x64xf32> to vector<64xf32>
    %192 = vector.shape_cast %191 : vector<64xf32> to vector<1x64xf32>
    %cst_107 = arith.constant 2.000000e+00 : f32
    %193 = vector.broadcast %cst_107 : f32 to vector<1x64xf32>
    %194 = arith.divf %192, %193 : vector<1x64xf32>
    %195 = vector.broadcast %194 : vector<1x64xf32> to vector<2x64xf32>
    %196 = arith.subf %188, %195 : vector<2x64xf32>
    %197 = arith.mulf %196, %196 : vector<2x64xf32>
    %cst_108 = arith.constant dense<0.000000e+00> : vector<64xf32>
    %198 = vector.multi_reduction <add>, %197, %cst_108 [0] : vector<2x64xf32> to vector<64xf32>
    %199 = vector.shape_cast %198 : vector<64xf32> to vector<1x64xf32>
    %cst_109 = arith.constant 2.000000e+00 : f32
    %200 = vector.broadcast %cst_109 : f32 to vector<1x64xf32>
    %201 = arith.divf %199, %200 : vector<1x64xf32>
    %202 = vector.broadcast %189 : vector<1x64xf32> to vector<2x64xf32>
    %203 = arith.mulf %202, %196 : vector<2x64xf32>
    %cst_110 = arith.constant 9.99999974E-6 : f32
    %204 = vector.broadcast %cst_110 : f32 to vector<1x64xf32>
    %205 = arith.addf %201, %204 : vector<1x64xf32>
    %206 = math.rsqrt %205 : vector<1x64xf32>
    %207 = vector.broadcast %206 : vector<1x64xf32> to vector<2x64xf32>
    %208 = arith.mulf %203, %207 : vector<2x64xf32>
    %209 = vector.broadcast %190 : vector<1x64xf32> to vector<2x64xf32>
    %210 = arith.addf %208, %209 : vector<2x64xf32>
    %c0_111 = arith.constant 0 : index
    %c0_112 = arith.constant 0 : index
    %211 = vector.load %arg17[%c0_111, %c0_112] : memref<64x128xf32, #tpu.memory_space<vmem>>, vector<64x128xf32>
    %cst_113 = arith.constant dense<0.000000e+00> : vector<2x128xf32>
    %212 = tpu.matmul %210, %211, %cst_113 {dimension_numbers = #tpu.dot_dimension_numbers<[1], [0], [0], [1], [0, 0, 1, 1], [], []>} : vector<2x64xf32>, vector<64x128xf32>, vector<2x128xf32> -> vector<2x128xf32>
    %c0_114 = arith.constant 0 : index
    %c0_115 = arith.constant 0 : index
    %213 = vector.load %arg18[%c0_114, %c0_115] : memref<1x128xf32, #tpu.memory_space<vmem>>, vector<1x128xf32>
    %214 = vector.broadcast %213 : vector<1x128xf32> to vector<2x128xf32>
    %215 = arith.addf %212, %214 : vector<2x128xf32>
    %c0_116 = arith.constant 0 : index
    %c0_117 = arith.constant 0 : index
    %216 = vector.load %arg19[%c0_116, %c0_117] : memref<2x128xf32, #tpu.memory_space<vmem>>, vector<2x128xf32>
    tpu.vector_store %arg19[%c0_116, %c0_117], %215 {strides = array<i32>} : memref<2x128xf32, #tpu.memory_space<vmem>>, vector<2x128xf32>,
    return
  }
}

</mosaic_0001>

<bundles_post_ra>
// kernel: nothanks_forward.1
= control target key start
LH: loop header
LB: loop body
LE: loop exit
PB: predicated region body
PF: predicated region fallthrough
CT: control target
= control target key end

     0   :  { %s10452_s0 = inlined_call_operand.vmem [shape: f32[32,15], index: 0, kind: input, shape index: {}]   ;;  %s10453_s1 = inlined_call_operand.hbm [shape: f32[15,64], index: 1, kind: input, shape index: {}]   ;;  %s10454_s2 = inlined_call_operand.hbm [shape: f32[1,64], index: 2, kind: input, shape index: {}]   ;;  %s10455_s3 = inlined_call_operand.hbm [shape: f32[1,64], index: 3, kind: input, shape index: {}]   ;;  %s10456_s4 = inlined_call_operand.hbm [shape: f32[1,64], index: 4, kind: input, shape index: {}]   ;;  %s10457_s5 = inlined_call_operand.hbm [shape: bf16[16,64,1024], index: 5, kind: input, shape index: {}]   ;;  %s10458_s6 = inlined_call_operand.hbm [shape: f32[1,1024], index: 6, kind: input, shape index: {}]   ;;  %s10459_s7 = inlined_call_operand.hbm [shape: f32[1,1024], index: 7, kind: input, shape index: {}]   ;;  %s10460_s8 = inlined_call_operand.hbm [shape: f32[1,1024], index: 8, kind: input, shape index: {}]   ;;  %s10461_s9 = inlined_call_operand.hbm [shape: bf16[1024,256], index: 9, kind: input, shape index: {}]   ;;  %s10462_s10 = inlined_call_operand.hbm [shape: f32[1,256], index: 10, kind: input, shape index: {}]   ;;  %s10463_s11 = inlined_call_operand.hbm [shape: f32[1,256], index: 11, kind: input, shape index: {}]   ;;  %s10464_s12 = inlined_call_operand.hbm [shape: f32[1,256], index: 12, kind: input, shape index: {}]   ;;  %s10465_s13 = inlined_call_operand.vmem [shape: bf16[256,64], index: 13, kind: input, shape index: {}]   ;;  %s10466_s14 = inlined_call_operand.hbm [shape: f32[1,64], index: 14, kind: input, shape index: {}]   ;;  %s10467_s15 = inlined_call_operand.hbm [shape: f32[1,64], index: 15, kind: input, shape index: {}]   ;;  %s10468_s16 = inlined_call_operand.hbm [shape: f32[1,64], index: 16, kind: input, shape index: {}]   ;;  %s10469_s17 = inlined_call_operand.hbm [shape: f32[64,128], index: 17, kind: input, shape index: {}]   ;;  %s10470_s18 = inlined_call_operand.hbm [shape: f32[1,128], index: 18, kind: input, shape index: {}]   ;;  %s10471_s19 = inlined_call_operand.hbm [shape: f32[2,128], index: 19, kind: output, shape index: {}]  }
   0x1   :  { %10473 = sst [smem:[#allocation40_spill]] %s10452_s0 }
   0x2   :  { %10474 = sst [smem:[#allocation41_spill]] %s10453_s1 }
   0x3   :  { %10475 = sst [smem:[#allocation42_spill]] %s10454_s2 }
   0x4   :  { %10476 = sst [smem:[#allocation43_spill]] %s10455_s3 }
   0x5   :  { %24 = vsyncpa [#allocation3], 0 }
   0x6   :  { %25 = vsyncpa [#allocation6], 0 }
   0x7   :  { %26 = vsyncpa [#allocation9], 0 }
   0x8   :  { %27 = vsyncpa [#allocation12], 0 }
   0x9   :  { %28 = vsyncpa [#allocation15], 0 }
   0xa   :  { %29 = vsyncpa [#allocation18], 0 }
   0xb   :  { %30 = vsyncpa [#allocation21], 0 }
   0xc   :  { %31 = vsyncpa [#allocation24], 0 }
   0xd   :  { %32 = vsyncpa [#allocation27], 0 }
   0xe   :  { %33 = vsyncpa [#allocation4], 0  ;;  %s9488_s0 = smov [#allocation5]   ;;  %s9489_s20 = smov [#allocation8]  }
   0xf   :  { %s54_s30 = sshll.u32 %s9488_s0, 4  ;;  %s74_s21 = sshll.u32 %s9489_s20, 4  ;;  %s55_s30 = int_to_ptr.vmem [resolvable:$true] %s54_s30  ;;  %s75_s21 = int_to_ptr.vmem [resolvable:$true] %s74_s21 }
  0x10   :  { %s9116_s1 = scalar_lea.vmem %s55_s30, 16  ;;  %s9120_s22 = scalar_lea.vmem %s55_s30, 32 }
  0x11   :  { %p9117_p0 = scmp.ne.s32.totalorder %s55_s30, %s9116_s1  ;;  %p9121_p1 = scmp.lt.s32.totalorder %s55_s30, %s55_s30 }
  0x12   :  { %p9122_p2 = scmp.lt.s32.totalorder %s9120_s22, %s9116_s1 }
  0x14   :  { %p9123_p3 = por %p9122_p2, %p9121_p1 }
  0x16   :  { %p9124_p4 = pnand %p9123_p3, %p9117_p0 }
  0x18   :  { %9127 = shalt.err (!%p9124_p4)
}
  0x19   :  { %s10477_s24 = sld [smem:[#allocation42_spill]]  ;;  %s9136_s25 = scalar_lea.vmem %s75_s21, 16 }
  0x1a   :  { %p9137_p5 = scmp.ne.s32.totalorder %s75_s21, %s9136_s25  ;;  %s9140_s3 = scalar_lea.vmem %s75_s21, 32 }
  0x1b   :  { %p9141_p6 = scmp.lt.s32.totalorder %s75_s21, %s75_s21  ;;  %p9142_p7 = scmp.lt.s32.totalorder %s9140_s3, %s9136_s25 }
  0x1d   :  { %p9143_p8 = por %p9142_p7, %p9141_p6 }
  0x1f   :  { %57 = dma.hbm_to_vmem [thread:$0]  %s10477_s24, 16, %s55_s30, [#allocation6]  }
  0x20   :  { %p9144_p9 = pnand %p9143_p8, %p9137_p5 }
  0x22   :  { %9147 = shalt.err (!%p9144_p9)
}
  0x23   :  { %77 = dma.hbm_to_vmem [thread:$0]  %s10456_s4, 16, %s75_s21, [#allocation9]  }
  0x24   :  { %s9490_s28 = smov [#allocation11]   ;;  %s9491_s0 = smov [#allocation14]  }
  0x25   :  { %s96_s29 = sshll.u32 %s9490_s28, 4  ;;  %s116_s20 = sshll.u32 %s9491_s0, 4  ;;  %s97_s29 = int_to_ptr.vmem [resolvable:$true] %s96_s29  ;;  %s117_s20 = int_to_ptr.vmem [resolvable:$true] %s116_s20 }
  0x26   :  { %s9156_s1 = scalar_lea.vmem %s97_s29, 128  ;;  %p9161_p11 = scmp.lt.s32.totalorder %s97_s29, %s97_s29 }
  0x27   :  { %p9157_p10 = scmp.ne.s32.totalorder %s97_s29, %s9156_s1  ;;  %p9162_p12 = scmp.lt.s32.totalorder %s9156_s1, %s9156_s1 }
  0x29   :  { %p9163_p13 = por %p9162_p12, %p9161_p11 }
  0x2b   :  { %p9164_p0 = pnand %p9163_p13, %p9157_p10 }
  0x2d   :  { %9167 = shalt.err (!%p9164_p0)
}
  0x2e   :  { %99 = dma.hbm_to_vmem [thread:$0]  %s10458_s6, 128, %s97_s29, [#allocation12]  }
  0x2f   :  { %s9176_s2 = scalar_lea.vmem %s117_s20, 128  ;;  %p9181_p2 = scmp.lt.s32.totalorder %s117_s20, %s117_s20 }
  0x30   :  { %p9177_p1 = scmp.ne.s32.totalorder %s117_s20, %s9176_s2  ;;  %p9182_p3 = scmp.lt.s32.totalorder %s9176_s2, %s9176_s2 }
  0x32   :  { %p9183_p4 = por %p9182_p3, %p9181_p2 }
  0x34   :  { %p9184_p5 = pnand %p9183_p4, %p9177_p1 }
  0x36   :  { %9187 = shalt.err (!%p9184_p5)
}
  0x37   :  { %119 = dma.hbm_to_vmem [thread:$0]  %s10460_s8, 128, %s117_s20, [#allocation15]  }
  0x38   :  { %s9492_s23 = smov [#allocation17]   ;;  %s9493_s25 = smov [#allocation20]  }
  0x39   :  { %s138_s24 = sshll.u32 %s9492_s23, 4  ;;  %s158_s3 = sshll.u32 %s9493_s25, 4  ;;  %s139_s24 = int_to_ptr.vmem [resolvable:$true] %s138_s24  ;;  %s159_s3 = int_to_ptr.vmem [resolvable:$true] %s158_s3 }
  0x3a   :  { %s9196_s26 = scalar_lea.vmem %s139_s24, 32  ;;  %p9201_p7 = scmp.lt.s32.totalorder %s139_s24, %s139_s24 }
  0x3b   :  { %p9197_p6 = scmp.ne.s32.totalorder %s139_s24, %s9196_s26  ;;  %p9202_p8 = scmp.lt.s32.totalorder %s9196_s26, %s9196_s26 }
  0x3d   :  { %p9203_p9 = por %p9202_p8, %p9201_p7 }
  0x3f   :  { %p9204_p10 = pnand %p9203_p9, %p9197_p6 }
  0x41   :  { %9207 = shalt.err (!%p9204_p10)
}
  0x42   :  { %141 = dma.hbm_to_vmem [thread:$0]  %s10462_s10, 32, %s139_s24, [#allocation18]  }
  0x43   :  { %s9216_s28 = scalar_lea.vmem %s159_s3, 32  ;;  %p9221_p12 = scmp.lt.s32.totalorder %s159_s3, %s159_s3 }
  0x44   :  { %p9217_p11 = scmp.ne.s32.totalorder %s159_s3, %s9216_s28  ;;  %p9222_p13 = scmp.lt.s32.totalorder %s9216_s28, %s9216_s28 }
  0x46   :  { %p9223_p0 = por %p9222_p13, %p9221_p12 }
  0x48   :  { %p9224_p1 = pnand %p9223_p0, %p9217_p11 }
  0x4a   :  { %9227 = shalt.err (!%p9224_p1)
}
  0x4b   :  { %161 = dma.hbm_to_vmem [thread:$0]  %s10464_s12, 32, %s159_s3, [#allocation21]  }
  0x4c   :  { %s9494_s0 = smov [#allocation23]  }
  0x4d   :  { %s180_s20 = sshll.u32 %s9494_s0, 4  ;;  %s181_s20 = int_to_ptr.vmem [resolvable:$true] %s180_s20 }
  0x4e   :  { %s9236_s1 = scalar_lea.vmem %s181_s20, 16  ;;  %s9240_s30 = scalar_lea.vmem %s181_s20, 32 }
  0x4f   :  { %p9237_p2 = scmp.ne.s32.totalorder %s181_s20, %s9236_s1  ;;  %p9241_p3 = scmp.lt.s32.totalorder %s181_s20, %s181_s20 }
  0x50   :  { %p9242_p4 = scmp.lt.s32.totalorder %s9240_s30, %s9236_s1 }
  0x52   :  { %p9243_p5 = por %p9242_p4, %p9241_p3 }
  0x54   :  { %p9244_p6 = pnand %p9243_p5, %p9237_p2 }
  0x56   :  { %9247 = shalt.err (!%p9244_p6)
}
  0x57   :  { %183 = dma.hbm_to_vmem [thread:$0]  %s10467_s15, 16, %s181_s20, [#allocation24]  }
  0x58   :  { %s9495_s2 = smov [#allocation26]   ;;  %s9496_s21 = smov [#allocation2]  }
  0x59   :  { %s199_s4 = sshll.u32 %s9495_s2, 4  ;;  %s41_s12 = sshll.u32 %s9496_s21, 4  ;;  %s200_s4 = int_to_ptr.vmem [resolvable:$true] %s199_s4  ;;  %s42_s12 = int_to_ptr.vmem [resolvable:$true] %s41_s12 }
  0x5a   :  { %s9256_s23 = scalar_lea.vmem %s200_s4, 1024  ;;  %p9261_p8 = scmp.lt.s32.totalorder %s200_s4, %s200_s4 }
  0x5b   :  { %p9257_p7 = scmp.ne.s32.totalorder %s200_s4, %s9256_s23  ;;  %p9262_p9 = scmp.lt.s32.totalorder %s9256_s23, %s9256_s23 }
  0x5d   :  { %p9263_p10 = por %p9262_p9, %p9261_p8 }
  0x5f   :  { %p9264_p11 = pnand %p9263_p10, %p9257_p7 }
  0x61   :  { %9267 = shalt.err (!%p9264_p11)
}
  0x62   :  { %s9497_s24 = smov 128   ;;  %s9498_s25 = smov 8  }
  0x63   :  { %205 = dma.hbm_to_vmem [thread:$0]  %s10469_s17, 1024, %s200_s4, [#allocation27], %s9497_s24, %s9497_s24, %s9498_s25  }
  0x64   :  { %s9276_s15 = scalar_lea.vmem %s42_s12, 256  ;;  %p9281_p13 = scmp.lt.s32.totalorder %s42_s12, %s42_s12 }
  0x65   :  { %p9277_p12 = scmp.ne.s32.totalorder %s42_s12, %s9276_s15  ;;  %p9282_p0 = scmp.lt.s32.totalorder %s9276_s15, %s9276_s15 }
  0x67   :  { %p9283_p1 = por %p9282_p0, %p9281_p13 }
  0x69   :  { %p9284_p2 = pnand %p9283_p1, %p9277_p12 }
  0x6b   :  { %9287 = shalt.err (!%p9284_p2)
}
  0x6c   :  { %s10478_s28 = sld [smem:[#allocation41_spill]]  ;;  %s9499_s8 = smov [#allocation7]  }
  0x6d   :  { %s64_s29 = sshll.u32 %s9499_s8, 4  ;;  %s9500_s0 = smov [#allocation10]   ;;  %s65_s29 = int_to_ptr.vmem [resolvable:$true] %s64_s29 }
  0x6e   :  { %s83_s17 = sshll.u32 %s9500_s0, 4  ;;  %s9296_s20 = scalar_lea.vmem %s65_s29, 16  ;;  %s84_s17 = int_to_ptr.vmem [resolvable:$true] %s83_s17 }
  0x6f   :  { %p9297_p3 = scmp.ne.s32.totalorder %s65_s29, %s9296_s20  ;;  %s9300_s1 = scalar_lea.vmem %s65_s29, 32 }
  0x70   :  { %p9301_p4 = scmp.lt.s32.totalorder %s65_s29, %s65_s29  ;;  %p9302_p5 = scmp.lt.s32.totalorder %s9300_s1, %s9296_s20 }
  0x72   :  { %47 = dma.hbm_to_vmem [thread:$0]  %s10478_s28, 256, %s42_s12, [#allocation3], %s9497_s24, %s9497_s24, %s9498_s25  }
  0x73   :  { %p9303_p6 = por %p9302_p5, %p9301_p4 }
  0x75   :  { %p9304_p7 = pnand %p9303_p6, %p9297_p3 }
  0x77   :  { %9307 = shalt.err (!%p9304_p7)
}
  0x78   :  { %s10479_s22 = sld [smem:[#allocation43_spill]]  ;;  %s9316_s2 = scalar_lea.vmem %s84_s17, 65536 }
  0x79   :  { %p9317_p8 = scmp.ne.s32.totalorder %s84_s17, %s9316_s2  ;;  %p9321_p9 = scmp.lt.s32.totalorder %s84_s17, %s84_s17 }
  0x7a   :  { %p9322_p10 = scmp.lt.s32.totalorder %s9316_s2, %s9316_s2 }
  0x7c   :  { %p9323_p11 = por %p9322_p10, %p9321_p9 }
  0x7e   :  { %67 = dma.hbm_to_vmem [thread:$0]  %s10479_s22, 16, %s65_s29, [#allocation6]  }
  0x7f   :  { %p9324_p12 = pnand %p9323_p11, %p9317_p8 }
  0x81   :  { %9327 = shalt.err (!%p9324_p12)
}
  0x82   :  { %s9501_s4 = smov 512   ;;  %s9502_s21 = smov 32  }
  0x83   :  { %89 = dma.hbm_to_vmem [thread:$0]  %s10457_s5, 65536, %s84_s17, [#allocation9], %s9501_s4, %s9501_s4, %s9502_s21  }
  0x84   :  { %s9503_s3 = smov [#allocation13]   ;;  %s9504_s15 = smov [#allocation16]  }
  0x85   :  { %s106_s26 = sshll.u32 %s9503_s3, 4  ;;  %s125_s6 = sshll.u32 %s9504_s15, 4  ;;  %s107_s26 = int_to_ptr.vmem [resolvable:$true] %s106_s26  ;;  %s126_s6 = int_to_ptr.vmem [resolvable:$true] %s125_s6 }
  0x86   :  { %s9336_s27 = scalar_lea.vmem %s107_s26, 128  ;;  %p9341_p0 = scmp.lt.s32.totalorder %s107_s26, %s107_s26 }
  0x87   :  { %p9337_p13 = scmp.ne.s32.totalorder %s107_s26, %s9336_s27  ;;  %p9342_p1 = scmp.lt.s32.totalorder %s9336_s27, %s9336_s27 }
  0x89   :  { %p9343_p2 = por %p9342_p1, %p9341_p0 }
  0x8b   :  { %p9344_p3 = pnand %p9343_p2, %p9337_p13 }
  0x8d   :  { %9347 = shalt.err (!%p9344_p3)
}
  0x8e   :  { %109 = dma.hbm_to_vmem [thread:$0]  %s10459_s7, 128, %s107_s26, [#allocation12]  }
  0x8f   :  { %s9356_s29 = scalar_lea.vmem %s126_s6, 16384  ;;  %p9361_p5 = scmp.lt.s32.totalorder %s126_s6, %s126_s6 }
  0x90   :  { %p9357_p4 = scmp.ne.s32.totalorder %s126_s6, %s9356_s29  ;;  %p9362_p6 = scmp.lt.s32.totalorder %s9356_s29, %s9356_s29 }
  0x92   :  { %p9363_p7 = por %p9362_p6, %p9361_p5 }
  0x94   :  { %p9364_p8 = pnand %p9363_p7, %p9357_p4 }
  0x96   :  { %9367 = shalt.err (!%p9364_p8)
}
  0x97   :  { %131 = dma.hbm_to_vmem [thread:$0]  %s10461_s9, 16384, %s126_s6, [#allocation15], %s9497_s24, %s9497_s24, %s9498_s25  }
  0x98   :  { %s9505_s17 = smov [#allocation19]   ;;  %s9506_s1 = smov [#allocation22]  }
  0x99   :  { %s148_s20 = sshll.u32 %s9505_s17, 4  ;;  %s170_s7 = sshll.u32 %s9506_s1, 4  ;;  %s149_s20 = int_to_ptr.vmem [resolvable:$true] %s148_s20  ;;  %s171_s7 = int_to_ptr.vmem [resolvable:$true] %s170_s7 }
  0x9a   :  { %s9376_s30 = scalar_lea.vmem %s149_s20, 32  ;;  %p9381_p10 = scmp.lt.s32.totalorder %s149_s20, %s149_s20 }
  0x9b   :  { %p9377_p9 = scmp.ne.s32.totalorder %s149_s20, %s9376_s30  ;;  %p9382_p11 = scmp.lt.s32.totalorder %s9376_s30, %s9376_s30 }
  0x9d   :  { %p9383_p12 = por %p9382_p11, %p9381_p10 }
  0x9f   :  { %p9384_p13 = pnand %p9383_p12, %p9377_p9 }
  0xa1   :  { %9387 = shalt.err (!%p9384_p13)
}
  0xa2   :  { %151 = dma.hbm_to_vmem [thread:$0]  %s10463_s11, 32, %s149_s20, [#allocation18]  }
  0xa3   :  { %s9396_s2 = scalar_lea.vmem %s171_s7, 16  ;;  %s9400_s9 = scalar_lea.vmem %s171_s7, 32 }
  0xa4   :  { %p9397_p0 = scmp.ne.s32.totalorder %s171_s7, %s9396_s2  ;;  %p9401_p1 = scmp.lt.s32.totalorder %s171_s7, %s171_s7 }
  0xa5   :  { %p9402_p2 = scmp.lt.s32.totalorder %s9400_s9, %s9396_s2 }
  0xa7   :  { %p9403_p3 = por %p9402_p2, %p9401_p1 }
  0xa9   :  { %p9404_p4 = pnand %p9403_p3, %p9397_p0 }
  0xab   :  { %9407 = shalt.err (!%p9404_p4)
}
  0xac   :  { %173 = dma.hbm_to_vmem [thread:$0]  %s10466_s14, 16, %s171_s7, [#allocation21]  }
  0xad   :  { %s9507_s4 = smov [#allocation25]   ;;  %s9508_s12 = smov [#allocation28]  }
  0xae   :  { %s190_s21 = sshll.u32 %s9507_s4, 4  ;;  %s212_s23 = sshll.u32 %s9508_s12, 4  ;;  %s191_s21 = int_to_ptr.vmem [resolvable:$true] %s190_s21  ;;  %s213_s23 = int_to_ptr.vmem [resolvable:$true] %s212_s23 }
  0xaf   :  { %s9416_s3 = scalar_lea.vmem %s191_s21, 16  ;;  %s9420_s11 = scalar_lea.vmem %s191_s21, 32 }
  0xb0   :  { %p9417_p5 = scmp.ne.s32.totalorder %s191_s21, %s9416_s3  ;;  %p9421_p6 = scmp.lt.s32.totalorder %s191_s21, %s191_s21 }
  0xb1   :  { %p9422_p7 = scmp.lt.s32.totalorder %s9420_s11, %s9416_s3 }
  0xb3   :  { %p9423_p8 = por %p9422_p7, %p9421_p6 }
  0xb5   :  { %p9424_p9 = pnand %p9423_p8, %p9417_p5 }
  0xb7   :  { %9427 = shalt.err (!%p9424_p9)
}
  0xb8   :  { %193 = dma.hbm_to_vmem [thread:$0]  %s10468_s16, 16, %s191_s21, [#allocation24]  }
  0xb9   :  { %s9436_s6 = scalar_lea.vmem %s213_s23, 16  ;;  %s9440_s14 = scalar_lea.vmem %s213_s23, 32 }
  0xba   :  { %p9437_p10 = scmp.ne.s32.totalorder %s213_s23, %s9436_s6  ;;  %p9441_p11 = scmp.lt.s32.totalorder %s213_s23, %s213_s23 }
  0xbb   :  { %p9442_p12 = scmp.lt.s32.totalorder %s9440_s14, %s9436_s6 }
  0xbd   :  { %p9443_p13 = por %p9442_p12, %p9441_p11 }
  0xbf   :  { %p9444_p0 = pnand %p9443_p13, %p9437_p10 }
  0xc1   :  { %9447 = shalt.err (!%p9444_p0)
}
  0xc2   :  { %215 = dma.hbm_to_vmem [thread:$0]  %s10470_s18, 16, %s213_s23, [#allocation27]  }
  0xc3   :  { %9468 = dma.done.wait [#allocation3], 256  }
  0xc4   :  { %9469 = vsyncadd [#allocation3], 4294967040 }
  0xc5   :  { %9470 = dma.done.wait [#allocation6], 32  }
  0xc6   :  { %9471 = vsyncadd [#allocation6], 4294967264 }
  0xc7   :  { %9472 = dma.done.wait [#allocation9], 65552  }
  0xc8   :  { %9473 = vsyncadd [#allocation9], 4294901744 }
  0xc9   :  { %9474 = dma.done.wait [#allocation12], 256  }
  0xca   :  { %9475 = vsyncadd [#allocation12], 4294967040 }
  0xcb   :  { %9476 = dma.done.wait [#allocation15], 16512  }
  0xcc   :  { %9477 = vsyncadd [#allocation15], 4294950784 }
  0xcd   :  { %9478 = dma.done.wait [#allocation18], 64  }
  0xce   :  { %9479 = vsyncadd [#allocation18], 4294967232 }
  0xcf   :  { %9480 = dma.done.wait [#allocation21], 48  }
  0xd0   :  { %9481 = vsyncadd [#allocation21], 4294967248 }
  0xd1   :  { %9482 = dma.done.wait [#allocation24], 32  }
  0xd2   :  { %9483 = vsyncadd [#allocation24], 4294967264 }
  0xd3   :  { %9484 = dma.done.wait [#allocation27], 1040  }
  0xd4   :  { %9485 = vsyncadd [#allocation27], 4294966256  ;;  %vm294_vm0 = vcmask 1046528   ;;  %vm281_vm1 = vcmask 121856   ;;  %v273_v0 = vld [vmem:[#allocation2 + $0x8] sm:$0x7f] }
  0xd5   :  { %v272_v1 = vld [vmem:[#allocation2] sm:$0xff]  ;;  %s10480_s8 = sld [smem:[#allocation40_spill]]  ;;  %8822 = vmatprep.subr.msk.mxu0 %vm294_vm0, %v273_v0  ;;  %v520_v6 = vld [vmem:[#allocation10 + $0x1c0] sm:$0xff]  ;;  %v9689_v40 = vld [vmem:[#allocation10 + $0x1d8] sm:$0xff]  ;;  %v9509_v44 = vmov 0   ;;  %vm397_vm4 = vcmask 523264  }
  0xd6   :  { %8823 = vmatpush3.msk.msra.mxu0 %vm294_vm0, %v273_v0  ;;  %v524_v7 = vld [vmem:[#allocation10 + $0x1e0] sm:$0xff]  ;;  %v521_v8 = vld [vmem:[#allocation10 + $0x1c8] sm:$0xff]  ;;  %v9685_v38 = vld [vmem:[#allocation10 + $0x1d0] sm:$0xff]  ;;  %725 = vmatprep.mubr.bf16.mxu1 %v9509_v44  ;;  %vm6426_vm7 = vcmask 1041408  }
  0xd7   :  { %8824 = vmatprep.subr.mxu0 %v272_v1  ;;  %v8085_v9 = vcombine.high %v520_v6, %v524_v7  ;;  %v525_v10 = vld [vmem:[#allocation10 + $0x1e8] sm:$0xff]  ;;  %v8084_v13 = vcombine.low %v520_v6, %v524_v7  ;;  %v512_v14 = vld [vmem:[#allocation10 + $0x180] sm:$0xff]  ;;  %v9687_v39 = vld [vmem:[#allocation10 + $0x1f0] sm:$0xff] }
  0xd8   :  { %8825 = vmatpush3.msra.mxu0 %v272_v1  ;;  %v8086_v11 = vcombine.low %v521_v8, %v525_v10  ;;  %v8087_v12 = vcombine.high %v521_v8, %v525_v10  ;;  %v516_v15 = vld [vmem:[#allocation10 + $0x1a0] sm:$0xff]  ;;  %v513_v16 = vld [vmem:[#allocation10 + $0x188] sm:$0xff]  ;;  %v8088_v41 = vcombine.low %v9685_v38, %v9687_v39  ;;  %v8089_v42 = vcombine.high %v9685_v38, %v9687_v39  ;;  %v9695_v43 = vld [vmem:[#allocation10 + $0x1f8] sm:$0xff] }
  0xd9   :  { %701 = vmatprep.subr.bf16.mxu1 %v8085_v9  ;;  %v8077_v17 = vcombine.high %v512_v14, %v516_v15  ;;  %v517_v18 = vld [vmem:[#allocation10 + $0x1a8] sm:$0xff]  ;;  %v8076_v21 = vcombine.low %v512_v14, %v516_v15  ;;  %v504_v22 = vld [vmem:[#allocation10 + $0x140] sm:$0xff]  ;;  %v8090_v45 = vcombine.low %v9689_v40, %v9695_v43  ;;  %v8091_v46 = vcombine.high %v9689_v40, %v9695_v43  ;;  %v8052_v47 = vld [vmem:[#allocation5] ss:$0 sm:$0xff] }
  0xda   :  { %742 = vmatprep.subr.bf16.mxu0 %v8087_v12  ;;  %702 = vmatpush1.bf16.msra.mxu1 %v8084_v13  ;;  %v8078_v19 = vcombine.low %v513_v16, %v517_v18  ;;  %v8079_v20 = vcombine.high %v513_v16, %v517_v18  ;;  %v508_v23 = vld [vmem:[#allocation10 + $0x160] sm:$0xff]  ;;  %v505_v24 = vld [vmem:[#allocation10 + $0x148] sm:$0xff]  ;;  %v8058_v14 = vld [vmem:[#allocation7] ss:$0 sm:$0xff] }
  0xdb   :  { %v268_v2 = vld [vmem:[%s10480_s8] sm:$0xff]  ;;  %v269_v3 = vld [vmem:[%s10480_s8 + $0x8] sm:$0xff]  ;;  %v270_v4 = vld [vmem:[%s10480_s8 + $0x10] sm:$0xff]  ;;  %703 = vmatprep.subr.bf16.mxu1 %v8077_v17  ;;  %v8069_v25 = vcombine.high %v504_v22, %v508_v23  ;;  %v8068_v29 = vcombine.low %v504_v22, %v508_v23 }
  0xdc   :  { %8826 = vmatprep.mubr.msk.f32.mxu0 %vm281_vm1, %v268_v2  ;;  %v271_v5 = vld [vmem:[%s10480_s8 + $0x18] sm:$0xff] }
  0xdd   :  { %8827 = vmatmul.mubr.msk.f32.vlgmr.msra.gmra.mxu0 %vm281_vm1, %v269_v3  ;;  %v509_v26 = vld [vmem:[#allocation10 + $0x168] sm:$0xff]  ;;  %v496_v30 = vld [vmem:[#allocation10 + $0x100] sm:$0xff] }
  0xde   :  { %8829 = vmatprep.mubr.msk.f32.mxu0 %vm281_vm1, %v270_v4  ;;  %743 = vmatpush1.bf16.msra.mxu0 %v8086_v11  ;;  %v8070_v27 = vcombine.low %v505_v24, %v509_v26  ;;  %v8071_v28 = vcombine.high %v505_v24, %v509_v26  ;;  %v500_v31 = vld [vmem:[#allocation10 + $0x120] sm:$0xff]  ;;  %v497_v32 = vld [vmem:[#allocation10 + $0x108] sm:$0xff] }
  0xdf   :  { %744 = vmatprep.subr.bf16.mxu0 %v8079_v20  ;;  %704 = vmatpush1.bf16.msra.mxu1 %v8076_v21  ;;  %v8061_v33 = vcombine.high %v496_v30, %v500_v31  ;;  %v501_v34 = vld [vmem:[#allocation10 + $0x128] sm:$0xff]  ;;  %v8060_v37 = vcombine.low %v496_v30, %v500_v31  ;;  %v487_v43 = vld [vmem:[#allocation10 + $0xc0] sm:$0xff] }
  0xe0   :  { %705 = vmatprep.subr.bf16.mxu1 %v8069_v25  ;;  %v8062_v35 = vcombine.low %v497_v32, %v501_v34  ;;  %v8063_v36 = vcombine.high %v497_v32, %v501_v34 }
  0xe1   :  { %8830 = vmatmul.mubr.msk.f32.gmra.mxu0 %vm281_vm1, %v271_v5 }
  0xe2   :  { %745 = vmatpush1.bf16.msra.mxu0 %v8078_v19  ;;  %766 = vmatprep.mubr.bf16.mxu0 %v9509_v44 }
  0xe3   :  { %746 = vmatprep.subr.bf16.mxu0 %v8071_v28  ;;  %706 = vmatpush1.bf16.msra.mxu1 %v8068_v29 }
  0xe4   :  { %707 = vmatprep.subr.bf16.mxu1 %v8061_v33 }
  0xe6   :  { %747 = vmatpush1.bf16.msra.mxu0 %v8070_v27 }
  0xe7   :  { %748 = vmatprep.subr.bf16.mxu0 %v8063_v36  ;;  %708 = vmatpush1.bf16.msra.mxu1 %v8060_v37 }
  0xe8   :  { %783 = vmatprep.subr.bf16.mxu1 %v8089_v42 }
  0xea   :  { %749 = vmatpush1.bf16.msra.mxu0 %v8062_v35 }
  0xeb   :  { %824 = vmatprep.subr.bf16.mxu0 %v8091_v46 }
 0x19d   :  { %v8828_v48 = vpop.f32.mrf.mxu0 }
 0x19e   :  { %v370_v49 = vadd.f32 %v8828_v48, %v8052_v47 }
 0x19f   :  { %v364_v50 = vpop.f32.mrf.mxu0 }
 0x1a0   :  { %v388_v51 = vmul.f32 0.01, %v370_v49  ;;  %v365_v52 = vadd.f32 %v8052_v47, %v364_v50  ;;  %vm384_vm2 = vcmp.gt.f32.partialorder %v370_v49, 0.0  ;;  %v8059_v50 = vld [vmem:[#allocation8] ss:$0 sm:$0xff] }
 0x1a1   :  { %v8831_v53 = vpop.f32.mrf.mxu0 }
 0x1a2   :  { %vm383_vm3 = vcmp.gt.f32.partialorder %v365_v52, 0.0  ;;  %v387_v54 = vmul.f32 0.01, %v365_v52  ;;  %v380_v55 = vadd.f32 %v8831_v53, %v8052_v47  ;;  %v392_v57 = vsel %vm384_vm2, %v370_v49, %v388_v51 }
 0x1a3   :  { %v374_v56 = vpop.f32.mrf.mxu0  ;;  %v399_v63 = vsel %vm397_vm4, %v392_v57, 0.0  ;;  %vm9511_vm2 = vmmov 0  }
 0x1a4   :  { %v391_v58 = vsel %vm383_vm3, %v365_v52, %v387_v54  ;;  %v390_v59 = vmul.f32 0.01, %v380_v55  ;;  %v375_v60 = vadd.f32 %v8052_v47, %v374_v56  ;;  %vm386_vm5 = vcmp.gt.f32.partialorder %v380_v55, 0.0 }
 0x1a5   :  { %v398_v61 = vsel %vm397_vm4, %v391_v58, 0.0 }
 0x1a6   :  { %vm385_vm6 = vcmp.gt.f32.partialorder %v375_v60, 0.0  ;;  %v389_v62 = vmul.f32 0.01, %v375_v60  ;;  %v400_v0 = vadd.f32 %v399_v63, %v398_v61  ;;  %v394_v1 = vsel %vm386_vm5, %v380_v55, %v390_v59  ;;  %v514_v59 = vld [vmem:[#allocation10 + $0x190] sm:$0xff]  ;;  %v515_v61 = vld [vmem:[#allocation10 + $0x198] sm:$0xff] }
 0x1a7   :  { %v403_v5 = vsel %vm397_vm4, %v394_v1, 0.0  ;;  %vm7904_vm5 = vcmask 517120  }
 0x1a8   :  { %v393_v2 = vsel %vm385_vm6, %v375_v60, %v389_v62  ;;  %v518_v60 = vld [vmem:[#allocation10 + $0x1b0] sm:$0xff]  ;;  %v519_v62 = vld [vmem:[#allocation10 + $0x1b8] sm:$0xff] }
 0x1a9   :  { %v401_v3 = vsel %vm397_vm4, %v393_v2, 0.0 }
 0x1aa   :  { %v402_v4 = vadd.f32 %v401_v3, %v400_v0  ;;  %v8083_v3 = vcombine.high %v515_v61, %v519_v62 }
 0x1ac   :  { %v404_v6 = vadd.f32 %v403_v5, %v402_v4  ;;  %v506_v4 = vld [vmem:[#allocation10 + $0x150] sm:$0xff] }
 0x1ad   :  { %v510_v5 = vld [vmem:[#allocation10 + $0x170] sm:$0xff] }
 0x1ae   :  { %v405_v7 = vrot.slane %v404_v6, 4  ;;  %v8072_v38 = vcombine.low %v506_v4, %v510_v5 }
 0x1b0   :  { %v406_v8 = vadd.f32 %v405_v7, %v404_v6  ;;  %v507_v6 = vld [vmem:[#allocation10 + $0x158] sm:$0xff] }
 0x1b1   :  { %v511_v7 = vld [vmem:[#allocation10 + $0x178] sm:$0xff] }
 0x1b2   :  { %v407_v9 = vrot.slane %v406_v8, 2  ;;  %v8074_v39 = vcombine.low %v507_v6, %v511_v7 }
 0x1b4   :  { %v408_v10 = vadd.f32 %v407_v9, %v406_v8  ;;  %v8080_v8 = vcombine.low %v514_v59, %v518_v60  ;;  %v8082_v9 = vcombine.low %v515_v61, %v519_v62  ;;  %v481_v61 = vld [vmem:[#allocation10 + $0x90] sm:$0xff] }
 0x1b5   :  { %v485_v62 = vld [vmem:[#allocation10 + $0xb0] sm:$0xff] }
 0x1b6   :  { %v409_v11 = vrot.slane %v408_v10, 1 }
 0x1b8   :  { %v410_v12 = vadd.f32 %v409_v11, %v408_v10  ;;  %v8073_v10 = vcombine.high %v506_v4, %v510_v5  ;;  %v8075_v11 = vcombine.high %v507_v6, %v511_v7  ;;  %v8117_v5 = vcombine.high %v481_v61, %v485_v62  ;;  %v473_v7 = vld [vmem:[#allocation10 + $0x50] sm:$0xff] }
 0x1ba   :  { %v412_v13 = vmul.f32 0.03125, %v410_v12  ;;  %v498_v12 = vld [vmem:[#allocation10 + $0x110] sm:$0xff] }
 0x1bc   :  { %v413_v15 = vsub.f32 %v391_v58, %v412_v13  ;;  %v414_v16 = vsub.f32 %v392_v57, %v412_v13  ;;  %v415_v17 = vsub.f32 %v393_v2, %v412_v13  ;;  %v416_v18 = vsub.f32 %v394_v1, %v412_v13  ;;  %v502_v13 = vld [vmem:[#allocation10 + $0x130] sm:$0xff] }
 0x1bd   :  { %v8081_v2 = vcombine.high %v514_v59, %v518_v60  ;;  %v8065_v40 = vcombine.high %v498_v12, %v502_v13 }
 0x1be   :  { %v417_v19 = vmul.f32 %v413_v15, %v413_v15  ;;  %v418_v20 = vmul.f32 %v414_v16, %v414_v16  ;;  %v419_v21 = vmul.f32 %v415_v17, %v415_v17  ;;  %v443_v22 = vmul.f32 %v8058_v14, %v415_v17  ;;  %v492_v17 = vld [vmem:[#allocation10 + $0xe8] sm:$0xff] }
 0x1bf   :  { %v444_v23 = vmul.f32 %v8058_v14, %v416_v18  ;;  %v420_v24 = vmul.f32 %v416_v18, %v416_v18  ;;  %v441_v47 = vmul.f32 %v8058_v14, %v413_v15  ;;  %v442_v48 = vmul.f32 %v8058_v14, %v414_v16  ;;  %v499_v14 = vld [vmem:[#allocation10 + $0x118] sm:$0xff]  ;;  %v488_v16 = vld [vmem:[#allocation10 + $0xc8] sm:$0xff] }
 0x1c0   :  { %v421_v25 = vsel %vm397_vm4, %v417_v19, 0.0  ;;  %v422_v26 = vsel %vm397_vm4, %v418_v20, 0.0  ;;  %v424_v28 = vsel %vm397_vm4, %v419_v21, 0.0  ;;  %v503_v15 = vld [vmem:[#allocation10 + $0x138] sm:$0xff]  ;;  %v8064_v18 = vcombine.low %v498_v12, %v502_v13 }
 0x1c1   :  { %v423_v27 = vadd.f32 %v422_v26, %v421_v25  ;;  %v426_v30 = vsel %vm397_vm4, %v420_v24, 0.0  ;;  %v8066_v19 = vcombine.low %v499_v14, %v503_v15  ;;  %v8123_v21 = vcombine.high %v488_v16, %v492_v17  ;;  %v480_v24 = vld [vmem:[#allocation10 + $0x88] sm:$0xff] }
 0x1c2   :  { %v484_v25 = vld [vmem:[#allocation10 + $0xa8] sm:$0xff] }
 0x1c3   :  { %v425_v29 = vadd.f32 %v424_v28, %v423_v27  ;;  %v8122_v27 = vcombine.low %v488_v16, %v492_v17  ;;  %v1209_v17 = vld [vmem:[#allocation10 + $0x2c0] sm:$0xff] }
 0x1c5   :  { %v427_v31 = vadd.f32 %v426_v30, %v425_v29  ;;  %v8115_v29 = vcombine.high %v480_v24, %v484_v25  ;;  %v471_v30 = vld [vmem:[#allocation10 + $0x40] sm:$0xff] }
 0x1c7   :  { %v428_v32 = vrot.slane %v427_v31, 4 }
 0x1c9   :  { %v429_v33 = vadd.f32 %v428_v32, %v427_v31  ;;  %v475_v31 = vld [vmem:[#allocation10 + $0x60] sm:$0xff]  ;;  %v472_v32 = vld [vmem:[#allocation10 + $0x48] sm:$0xff] }
 0x1cb   :  { %v430_v34 = vrot.slane %v429_v33, 2 }
 0x1cd   :  { %v431_v35 = vadd.f32 %v430_v34, %v429_v33  ;;  %v476_v33 = vld [vmem:[#allocation10 + $0x68] sm:$0xff] }
 0x1cf   :  { %v432_v36 = vrot.slane %v431_v35, 1 }
 0x1d1   :  { %v433_v37 = vadd.f32 %v432_v36, %v431_v35  ;;  %v8114_v35 = vcombine.low %v480_v24, %v484_v25  ;;  %v8105_v36 = vcombine.high %v471_v30, %v475_v31  ;;  %v1201_v25 = vld [vmem:[#allocation10 + $0x280] sm:$0xff] }
 0x1d3   :  { %v434_v42 = vmul.f32 0.03125, %v433_v37  ;;  %v8107_v37 = vcombine.high %v472_v32, %v476_v33 }
 0x1d5   :  { %v445_v46 = vadd.f32 1e-05, %v434_v42  ;;  %v463_v42 = vld [vmem:[#allocation10] sm:$0xff] }
 0x1d7   :  { %9084 = vrsqrt.f32 %v445_v46  ;;  %v467_v46 = vld [vmem:[#allocation10 + $0x20] sm:$0xff] }
 0x1e4   :  { %v9085_v49 = vpop.eup %9084 }
 0x1e5   :  { %v447_v51 = vmul.f32 %v9085_v49, %v441_v47  ;;  %v448_v52 = vmul.f32 %v9085_v49, %v442_v48  ;;  %v449_v53 = vmul.f32 %v9085_v49, %v443_v22  ;;  %v450_v54 = vmul.f32 %v9085_v49, %v444_v23  ;;  %v479_v22 = vld [vmem:[#allocation10 + $0x80] sm:$0xff]  ;;  %v464_v47 = vld [vmem:[#allocation10 + $0x8] sm:$0xff] }
 0x1e6   :  { %v483_v23 = vld [vmem:[#allocation10 + $0xa0] sm:$0xff]  ;;  %v468_v48 = vld [vmem:[#allocation10 + $0x28] sm:$0xff]  ;;  %v8104_v49 = vcombine.low %v471_v30, %v475_v31 }
 0x1e7   :  { %v457_v55 = vadd.f32 %v8059_v50, %v447_v51  ;;  %v458_v56 = vadd.f32 %v8059_v50, %v448_v52  ;;  %v459_v57 = vadd.f32 %v8059_v50, %v449_v53  ;;  %v460_v58 = vadd.f32 %v8059_v50, %v450_v54  ;;  %v489_v53 = vld [vmem:[#allocation10 + $0xd0] sm:$0xff] }
 0x1e8   :  { %v8113_v28 = vcombine.high %v479_v22, %v483_v23  ;;  %v8112_v34 = vcombine.low %v479_v22, %v483_v23  ;;  %v8106_v50 = vcombine.low %v472_v32, %v476_v33  ;;  %v8097_v51 = vcombine.high %v463_v42, %v467_v46  ;;  %v493_v54 = vld [vmem:[#allocation10 + $0xf0] sm:$0xff]  ;;  %v1193_v33 = vld [vmem:[#allocation10 + $0x240] sm:$0xff] }
 0x1e9   :  { %v9711_v63 = vpack.c.bf16 %v458_v56, %v457_v55  ;;  %v9713_v0 = vpack.c.bf16 %v460_v58, %v459_v57  ;;  %v8099_v52 = vcombine.high %v464_v47, %v468_v48  ;;  %v490_v55 = vld [vmem:[#allocation10 + $0xd8] sm:$0xff]  ;;  %v8096_v57 = vcombine.low %v463_v42, %v467_v46 }
 0x1ea   :  { %v494_v56 = vld [vmem:[#allocation10 + $0xf8] sm:$0xff]  ;;  %v8098_v58 = vcombine.low %v464_v47, %v468_v48  ;;  %v8125_v59 = vcombine.high %v489_v53, %v493_v54  ;;  %v1185_v48 = vld [vmem:[#allocation10 + $0x200] sm:$0xff] }
 0x1eb   :  { %v529_v1 = vrot.slane %v9711_v63, 1  ;;  %v8127_v60 = vcombine.high %v490_v55, %v494_v56  ;;  %v8126_v4 = vcombine.low %v490_v55, %v494_v56  ;;  %v1211_v56 = vld [vmem:[#allocation10 + $0x2d0] sm:$0xff] }
 0x1ed   :  { %8092 = vmatmul.mubr.msk.bf16.vlgmr.msra.gmra.mxu1 %vm397_vm4, %v529_v1  ;;  %8093 = vmatmul.mubr.msk.bf16.vlgmr.msra.gmra.mxu0 %vm397_vm4, %v529_v1 }
 0x1ee   :  { %784 = vmatpush1.bf16.msra.mxu1 %v8088_v41  ;;  %825 = vmatpush1.bf16.msra.mxu0 %v8090_v45  ;;  %v8067_v41 = vcombine.high %v499_v14, %v503_v15  ;;  %v491_v45 = vld [vmem:[#allocation10 + $0xe0] sm:$0xff]  ;;  %v465_v15 = vld [vmem:[#allocation10 + $0x10] sm:$0xff] }
 0x1ef   :  { %785 = vmatprep.subr.bf16.mxu1 %v8081_v2  ;;  %826 = vmatprep.subr.bf16.mxu0 %v8083_v3  ;;  %v8121_v20 = vcombine.high %v487_v43, %v491_v45  ;;  %v8120_v26 = vcombine.low %v487_v43, %v491_v45  ;;  %v486_v2 = vld [vmem:[#allocation10 + $0xb8] sm:$0xff]  ;;  %v8124_v3 = vcombine.low %v489_v53, %v493_v54 }
 0x1f0   :  { %807 = vmatprep.mubr.bf16.mxu1 %v9509_v44  ;;  %848 = vmatprep.mubr.bf16.mxu0 %v9509_v44 }
 0x1f2   :  { %786 = vmatpush1.bf16.msra.mxu1 %v8080_v8  ;;  %827 = vmatpush1.bf16.msra.mxu0 %v8082_v9  ;;  %v477_v8 = vld [vmem:[#allocation10 + $0x70] sm:$0xff]  ;;  %v474_v9 = vld [vmem:[#allocation10 + $0x58] sm:$0xff] }
 0x1f3   :  { %787 = vmatprep.subr.bf16.mxu1 %v8073_v10  ;;  %828 = vmatprep.subr.bf16.mxu0 %v8075_v11  ;;  %v478_v10 = vld [vmem:[#allocation10 + $0x78] sm:$0xff]  ;;  %v8116_v11 = vcombine.low %v481_v61, %v485_v62  ;;  %v8109_v13 = vcombine.high %v473_v7, %v477_v8 }
 0x1f4   :  { %v8111_v14 = vcombine.high %v474_v9, %v478_v10  ;;  %v8110_v43 = vcombine.low %v474_v9, %v478_v10 }
 0x1f6   :  { %788 = vmatpush1.bf16.msra.mxu1 %v8072_v38  ;;  %829 = vmatpush1.bf16.msra.mxu0 %v8074_v39  ;;  %v469_v38 = vld [vmem:[#allocation10 + $0x30] sm:$0xff]  ;;  %v466_v39 = vld [vmem:[#allocation10 + $0x18] sm:$0xff] }
 0x1f7   :  { %789 = vmatprep.subr.bf16.mxu1 %v8065_v40  ;;  %830 = vmatprep.subr.bf16.mxu0 %v8067_v41  ;;  %v470_v40 = vld [vmem:[#allocation10 + $0x38] sm:$0xff]  ;;  %v8108_v41 = vcombine.low %v473_v7, %v477_v8  ;;  %v8101_v45 = vcombine.high %v465_v15, %v469_v38  ;;  %v1217_v8 = vrot.slane %v9711_v63, 2 }
 0x1f8   :  { %v8103_v16 = vcombine.high %v466_v39, %v470_v40  ;;  %v8102_v22 = vcombine.low %v466_v39, %v470_v40 }
 0x1fa   :  { %790 = vmatpush1.bf16.msra.mxu1 %v8064_v18  ;;  %831 = vmatpush1.bf16.msra.mxu0 %v8066_v19  ;;  %v1213_v18 = vld [vmem:[#allocation10 + $0x2e0] sm:$0xff]  ;;  %v1210_v19 = vld [vmem:[#allocation10 + $0x2c8] sm:$0xff] }
 0x1fb   :  { %1028 = vmatprep.subr.bf16.mxu1 %v8121_v20  ;;  %1069 = vmatprep.subr.bf16.mxu0 %v8123_v21  ;;  %v1214_v20 = vld [vmem:[#allocation10 + $0x2e8] sm:$0xff]  ;;  %v8100_v21 = vcombine.low %v465_v15, %v469_v38  ;;  %v8157_v23 = vcombine.high %v1209_v17, %v1213_v18 }
 0x1fc   :  { %v8159_v24 = vcombine.high %v1210_v19, %v1214_v20  ;;  %v8158_v30 = vcombine.low %v1210_v19, %v1214_v20 }
 0x1fd   :  { %8094 = vmatmul.mubr.msk.bf16.vlgmr.msra.gmra.mxu1 %vm397_vm4, %v529_v1  ;;  %8095 = vmatmul.mubr.msk.bf16.vlgmr.msra.gmra.mxu0 %vm397_vm4, %v529_v1  ;;  %v482_v1 = vld [vmem:[#allocation10 + $0x98] sm:$0xff] }
 0x1fe   :  { %1029 = vmatpush1.bf16.msra.mxu1 %v8120_v26  ;;  %1070 = vmatpush1.bf16.msra.mxu0 %v8122_v27  ;;  %v8119_v6 = vcombine.high %v482_v1, %v486_v2  ;;  %v8118_v12 = vcombine.low %v482_v1, %v486_v2  ;;  %v1205_v26 = vld [vmem:[#allocation10 + $0x2a0] sm:$0xff]  ;;  %v1202_v27 = vld [vmem:[#allocation10 + $0x288] sm:$0xff]  ;;  %v1203_v2 = vld [vmem:[#allocation10 + $0x290] sm:$0xff] }
 0x1ff   :  { %1030 = vmatprep.subr.bf16.mxu1 %v8113_v28  ;;  %1071 = vmatprep.subr.bf16.mxu0 %v8115_v29  ;;  %v1206_v28 = vld [vmem:[#allocation10 + $0x2a8] sm:$0xff]  ;;  %v8156_v29 = vcombine.low %v1209_v17, %v1213_v18  ;;  %v8149_v31 = vcombine.high %v1201_v25, %v1205_v26 }
 0x200   :  { %1052 = vmatprep.mubr.bf16.mxu1 %v9509_v44  ;;  %1093 = vmatprep.mubr.bf16.mxu0 %v9509_v44  ;;  %v8151_v32 = vcombine.high %v1202_v27, %v1206_v28  ;;  %v8150_v42 = vcombine.low %v1202_v27, %v1206_v28 }
 0x202   :  { %1031 = vmatpush1.bf16.msra.mxu1 %v8112_v34  ;;  %1072 = vmatpush1.bf16.msra.mxu0 %v8114_v35  ;;  %v1197_v34 = vld [vmem:[#allocation10 + $0x260] sm:$0xff]  ;;  %v1194_v35 = vld [vmem:[#allocation10 + $0x248] sm:$0xff] }
 0x203   :  { %1032 = vmatprep.subr.bf16.mxu1 %v8105_v36  ;;  %1073 = vmatprep.subr.bf16.mxu0 %v8107_v37  ;;  %v1198_v36 = vld [vmem:[#allocation10 + $0x268] sm:$0xff]  ;;  %v8148_v37 = vcombine.low %v1201_v25, %v1205_v26  ;;  %v8141_v46 = vcombine.high %v1193_v33, %v1197_v34 }
 0x204   :  { %v8143_v47 = vcombine.high %v1194_v35, %v1198_v36  ;;  %v8142_v53 = vcombine.low %v1194_v35, %v1198_v36 }
 0x206   :  { %1033 = vmatpush1.bf16.msra.mxu1 %v8104_v49  ;;  %1074 = vmatpush1.bf16.msra.mxu0 %v8106_v50  ;;  %v1189_v49 = vld [vmem:[#allocation10 + $0x220] sm:$0xff]  ;;  %v1186_v50 = vld [vmem:[#allocation10 + $0x208] sm:$0xff] }
 0x207   :  { %1034 = vmatprep.subr.bf16.mxu1 %v8097_v51  ;;  %1075 = vmatprep.subr.bf16.mxu0 %v8099_v52  ;;  %v1190_v51 = vld [vmem:[#allocation10 + $0x228] sm:$0xff]  ;;  %v8140_v52 = vcombine.low %v1193_v33, %v1197_v34  ;;  %v8133_v54 = vcombine.high %v1185_v48, %v1189_v49 }
 0x208   :  { %v8135_v55 = vcombine.high %v1186_v50, %v1190_v51  ;;  %v8134_v61 = vcombine.low %v1186_v50, %v1190_v51 }
 0x20a   :  { %1035 = vmatpush1.bf16.msra.mxu1 %v8096_v57  ;;  %1076 = vmatpush1.bf16.msra.mxu0 %v8098_v58  ;;  %v1215_v57 = vld [vmem:[#allocation10 + $0x2f0] sm:$0xff]  ;;  %v1212_v58 = vld [vmem:[#allocation10 + $0x2d8] sm:$0xff] }
 0x20b   :  { %1110 = vmatprep.subr.bf16.mxu1 %v8125_v59  ;;  %1151 = vmatprep.subr.bf16.mxu0 %v8127_v60  ;;  %v1216_v59 = vld [vmem:[#allocation10 + $0x2f8] sm:$0xff]  ;;  %v8132_v60 = vcombine.low %v1185_v48, %v1189_v49  ;;  %v8161_v62 = vcombine.high %v1211_v56, %v1215_v57 }
 0x20c   :  { %v8163_v1 = vcombine.high %v1212_v58, %v1216_v59  ;;  %v8162_v7 = vcombine.low %v1212_v58, %v1216_v59 }
 0x20d   :  { %8128 = vmatmul.mubr.msk.bf16.vlgmr.msra.gmra.mxu1 %vm397_vm4, %v9711_v63  ;;  %8129 = vmatmul.mubr.msk.bf16.vlgmr.msra.gmra.mxu0 %vm397_vm4, %v9711_v63 }
 0x20e   :  { %1111 = vmatpush1.bf16.msra.mxu1 %v8124_v3  ;;  %1152 = vmatpush1.bf16.msra.mxu0 %v8126_v4  ;;  %v1207_v3 = vld [vmem:[#allocation10 + $0x2b0] sm:$0xff]  ;;  %v1204_v4 = vld [vmem:[#allocation10 + $0x298] sm:$0xff] }
 0x20f   :  { %1112 = vmatprep.subr.bf16.mxu1 %v8117_v5  ;;  %1153 = vmatprep.subr.bf16.mxu0 %v8119_v6  ;;  %v1208_v5 = vld [vmem:[#allocation10 + $0x2b8] sm:$0xff]  ;;  %v8160_v6 = vcombine.low %v1211_v56, %v1215_v57  ;;  %v8153_v9 = vcombine.high %v1203_v2, %v1207_v3  ;;  %v8152_v15 = vcombine.low %v1203_v2, %v1207_v3 }
 0x210   :  { %1134 = vmatprep.mubr.bf16.mxu1 %v9509_v44  ;;  %1175 = vmatprep.mubr.bf16.mxu0 %v9509_v44  ;;  %v8155_v10 = vcombine.high %v1204_v4, %v1208_v5  ;;  %v8154_v38 = vcombine.low %v1204_v4, %v1208_v5 }
 0x212   :  { %1113 = vmatpush1.bf16.msra.mxu1 %v8116_v11  ;;  %1154 = vmatpush1.bf16.msra.mxu0 %v8118_v12  ;;  %v1195_v11 = vld [vmem:[#allocation10 + $0x250] sm:$0xff] }
 0x213   :  { %1114 = vmatprep.subr.bf16.mxu1 %v8109_v13  ;;  %1155 = vmatprep.subr.bf16.mxu0 %v8111_v14  ;;  %v1199_v12 = vld [vmem:[#allocation10 + $0x270] sm:$0xff]  ;;  %v1196_v13 = vld [vmem:[#allocation10 + $0x258] sm:$0xff] }
 0x214   :  { %v1200_v14 = vld [vmem:[#allocation10 + $0x278] sm:$0xff]  ;;  %v8145_v39 = vcombine.high %v1195_v11, %v1199_v12  ;;  %v8144_v17 = vcombine.low %v1195_v11, %v1199_v12  ;;  %v1586_v12 = vrot.slane %v9711_v63, 3 }
 0x215   :  { %v8147_v40 = vcombine.high %v1196_v13, %v1200_v14  ;;  %v8146_v18 = vcombine.low %v1196_v13, %v1200_v14 }
 0x216   :  { %1115 = vmatpush1.bf16.msra.mxu1 %v8108_v41  ;;  %1156 = vmatpush1.bf16.msra.mxu0 %v8110_v43  ;;  %v1187_v41 = vld [vmem:[#allocation10 + $0x210] sm:$0xff] }
 0x217   :  { %1116 = vmatprep.subr.bf16.mxu1 %v8101_v45  ;;  %1157 = vmatprep.subr.bf16.mxu0 %v8103_v16  ;;  %v1191_v43 = vld [vmem:[#allocation10 + $0x230] sm:$0xff]  ;;  %v1188_v45 = vld [vmem:[#allocation10 + $0x218] sm:$0xff] }
 0x218   :  { %v1192_v16 = vld [vmem:[#allocation10 + $0x238] sm:$0xff]  ;;  %v8137_v19 = vcombine.high %v1187_v41, %v1191_v43  ;;  %v8136_v25 = vcombine.low %v1187_v41, %v1191_v43 }
 0x219   :  { %v8139_v20 = vcombine.high %v1188_v45, %v1192_v16  ;;  %v8138_v26 = vcombine.low %v1188_v45, %v1192_v16 }
 0x21a   :  { %1117 = vmatpush1.bf16.msra.mxu1 %v8100_v21  ;;  %1158 = vmatpush1.bf16.msra.mxu0 %v8102_v22  ;;  %v1578_v21 = vld [vmem:[#allocation10 + $0x3c0] sm:$0xff] }
 0x21b   :  { %1389 = vmatprep.subr.bf16.mxu1 %v8157_v23  ;;  %1430 = vmatprep.subr.bf16.mxu0 %v8159_v24  ;;  %v1582_v22 = vld [vmem:[#allocation10 + $0x3e0] sm:$0xff]  ;;  %v1579_v23 = vld [vmem:[#allocation10 + $0x3c8] sm:$0xff] }
 0x21c   :  { %v1583_v24 = vld [vmem:[#allocation10 + $0x3e8] sm:$0xff]  ;;  %v8193_v27 = vcombine.high %v1578_v21, %v1582_v22  ;;  %v8192_v33 = vcombine.low %v1578_v21, %v1582_v22 }
 0x21d   :  { %8130 = vmatmul.mubr.msk.bf16.vlgmr.msra.gmra.mxu1 %vm397_vm4, %v9711_v63  ;;  %8131 = vmatmul.mubr.msk.bf16.vlgmr.msra.gmra.mxu0 %vm397_vm4, %v9711_v63  ;;  %v8195_v28 = vcombine.high %v1579_v23, %v1583_v24  ;;  %v8194_v34 = vcombine.low %v1579_v23, %v1583_v24 }
 0x21e   :  { %1390 = vmatpush1.bf16.msra.mxu1 %v8156_v29  ;;  %1431 = vmatpush1.bf16.msra.mxu0 %v8158_v30  ;;  %v1570_v29 = vld [vmem:[#allocation10 + $0x380] sm:$0xff] }
 0x21f   :  { %1391 = vmatprep.subr.bf16.mxu1 %v8149_v31  ;;  %1432 = vmatprep.subr.bf16.mxu0 %v8151_v32  ;;  %v1574_v30 = vld [vmem:[#allocation10 + $0x3a0] sm:$0xff]  ;;  %v1571_v31 = vld [vmem:[#allocation10 + $0x388] sm:$0xff] }
 0x220   :  { %1413 = vmatprep.mubr.bf16.mxu1 %v9509_v44  ;;  %1454 = vmatprep.mubr.bf16.mxu0 %v9509_v44  ;;  %v1575_v32 = vld [vmem:[#allocation10 + $0x3a8] sm:$0xff]  ;;  %v8185_v35 = vcombine.high %v1570_v29, %v1574_v30  ;;  %v8184_v48 = vcombine.low %v1570_v29, %v1574_v30 }
 0x221   :  { %v8187_v36 = vcombine.high %v1571_v31, %v1575_v32  ;;  %v8186_v49 = vcombine.low %v1571_v31, %v1575_v32 }
 0x222   :  { %1392 = vmatpush1.bf16.msra.mxu1 %v8148_v37  ;;  %1433 = vmatpush1.bf16.msra.mxu0 %v8150_v42  ;;  %v1562_v37 = vld [vmem:[#allocation10 + $0x340] sm:$0xff] }
 0x223   :  { %1393 = vmatprep.subr.bf16.mxu1 %v8141_v46  ;;  %1434 = vmatprep.subr.bf16.mxu0 %v8143_v47  ;;  %v1566_v42 = vld [vmem:[#allocation10 + $0x360] sm:$0xff]  ;;  %v1563_v46 = vld [vmem:[#allocation10 + $0x348] sm:$0xff] }
 0x224   :  { %v1567_v47 = vld [vmem:[#allocation10 + $0x368] sm:$0xff]  ;;  %v8177_v50 = vcombine.high %v1562_v37, %v1566_v42  ;;  %v8176_v56 = vcombine.low %v1562_v37, %v1566_v42 }
 0x225   :  { %v8179_v51 = vcombine.high %v1563_v46, %v1567_v47  ;;  %v8178_v57 = vcombine.low %v1563_v46, %v1567_v47 }
 0x226   :  { %1394 = vmatpush1.bf16.msra.mxu1 %v8140_v52  ;;  %1435 = vmatpush1.bf16.msra.mxu0 %v8142_v53  ;;  %v1554_v52 = vld [vmem:[#allocation10 + $0x300] sm:$0xff] }
 0x227   :  { %1395 = vmatprep.subr.bf16.mxu1 %v8133_v54  ;;  %1436 = vmatprep.subr.bf16.mxu0 %v8135_v55  ;;  %v1558_v53 = vld [vmem:[#allocation10 + $0x320] sm:$0xff]  ;;  %v1555_v54 = vld [vmem:[#allocation10 + $0x308] sm:$0xff] }
 0x228   :  { %v1559_v55 = vld [vmem:[#allocation10 + $0x328] sm:$0xff]  ;;  %v8169_v58 = vcombine.high %v1554_v52, %v1558_v53  ;;  %v8168_v2 = vcombine.low %v1554_v52, %v1558_v53 }
 0x229   :  { %v8171_v59 = vcombine.high %v1555_v54, %v1559_v55  ;;  %v8170_v3 = vcombine.low %v1555_v54, %v1559_v55 }
 0x22a   :  { %1396 = vmatpush1.bf16.msra.mxu1 %v8132_v60  ;;  %1437 = vmatpush1.bf16.msra.mxu0 %v8134_v61  ;;  %v1580_v60 = vld [vmem:[#allocation10 + $0x3d0] sm:$0xff] }
 0x22b   :  { %1471 = vmatprep.subr.bf16.mxu1 %v8161_v62  ;;  %1512 = vmatprep.subr.bf16.mxu0 %v8163_v1  ;;  %v1584_v61 = vld [vmem:[#allocation10 + $0x3f0] sm:$0xff]  ;;  %v1581_v62 = vld [vmem:[#allocation10 + $0x3d8] sm:$0xff] }
 0x22c   :  { %v1585_v1 = vld [vmem:[#allocation10 + $0x3f8] sm:$0xff]  ;;  %v8197_v4 = vcombine.high %v1580_v60, %v1584_v61 }
 0x22d   :  { %8164 = vmatmul.mubr.msk.bf16.vlgmr.msra.gmra.mxu1 %vm397_vm4, %v1217_v8  ;;  %8165 = vmatmul.mubr.msk.bf16.vlgmr.msra.gmra.mxu0 %vm397_vm4, %v1217_v8  ;;  %v8199_v5 = vcombine.high %v1581_v62, %v1585_v1  ;;  %v8198_v11 = vcombine.low %v1581_v62, %v1585_v1 }
 0x22e   :  { %1472 = vmatpush1.bf16.msra.mxu1 %v8160_v6  ;;  %1513 = vmatpush1.bf16.msra.mxu0 %v8162_v7  ;;  %v1572_v6 = vld [vmem:[#allocation10 + $0x390] sm:$0xff] }
 0x22f   :  { %1473 = vmatprep.subr.bf16.mxu1 %v8153_v9  ;;  %1514 = vmatprep.subr.bf16.mxu0 %v8155_v10  ;;  %v1576_v7 = vld [vmem:[#allocation10 + $0x3b0] sm:$0xff]  ;;  %v1577_v9 = vld [vmem:[#allocation10 + $0x3b8] sm:$0xff]  ;;  %v8196_v10 = vcombine.low %v1580_v60, %v1584_v61 }
 0x230   :  { %1495 = vmatprep.mubr.bf16.mxu1 %v9509_v44  ;;  %1536 = vmatprep.mubr.bf16.mxu0 %v9509_v44  ;;  %v8189_v13 = vcombine.high %v1572_v6, %v1576_v7  ;;  %v8188_v41 = vcombine.low %v1572_v6, %v1576_v7 }
 0x232   :  { %1474 = vmatpush1.bf16.msra.mxu1 %v8152_v15  ;;  %1515 = vmatpush1.bf16.msra.mxu0 %v8154_v38  ;;  %v1564_v15 = vld [vmem:[#allocation10 + $0x350] sm:$0xff] }
 0x233   :  { %1475 = vmatprep.subr.bf16.mxu1 %v8145_v39  ;;  %1516 = vmatprep.subr.bf16.mxu0 %v8147_v40  ;;  %v1568_v38 = vld [vmem:[#allocation10 + $0x370] sm:$0xff]  ;;  %v1565_v39 = vld [vmem:[#allocation10 + $0x358] sm:$0xff] }
 0x234   :  { %v1569_v40 = vld [vmem:[#allocation10 + $0x378] sm:$0xff]  ;;  %v8181_v45 = vcombine.high %v1564_v15, %v1568_v38  ;;  %v8180_v21 = vcombine.low %v1564_v15, %v1568_v38  ;;  %v1955_v38 = vrot.slane %v9711_v63, 4 }
 0x235   :  { %v8183_v16 = vcombine.high %v1565_v39, %v1569_v40  ;;  %v8182_v22 = vcombine.low %v1565_v39, %v1569_v40 }
 0x236   :  { %1476 = vmatpush1.bf16.msra.mxu1 %v8144_v17  ;;  %1517 = vmatpush1.bf16.msra.mxu0 %v8146_v18  ;;  %v1556_v17 = vld [vmem:[#allocation10 + $0x310] sm:$0xff] }
 0x237   :  { %1477 = vmatprep.subr.bf16.mxu1 %v8137_v19  ;;  %1518 = vmatprep.subr.bf16.mxu0 %v8139_v20  ;;  %v1560_v18 = vld [vmem:[#allocation10 + $0x330] sm:$0xff]  ;;  %v1557_v19 = vld [vmem:[#allocation10 + $0x318] sm:$0xff] }
 0x238   :  { %v1561_v20 = vld [vmem:[#allocation10 + $0x338] sm:$0xff]  ;;  %v8173_v23 = vcombine.high %v1556_v17, %v1560_v18  ;;  %v8172_v29 = vcombine.low %v1556_v17, %v1560_v18 }
 0x239   :  { %v8175_v24 = vcombine.high %v1557_v19, %v1561_v20  ;;  %v8174_v30 = vcombine.low %v1557_v19, %v1561_v20 }
 0x23a   :  { %1478 = vmatpush1.bf16.msra.mxu1 %v8136_v25  ;;  %1519 = vmatpush1.bf16.msra.mxu0 %v8138_v26  ;;  %v1947_v25 = vld [vmem:[#allocation10 + $0x4c0] sm:$0xff] }
 0x23b   :  { %1758 = vmatprep.subr.bf16.mxu1 %v8193_v27  ;;  %1799 = vmatprep.subr.bf16.mxu0 %v8195_v28  ;;  %v1951_v26 = vld [vmem:[#allocation10 + $0x4e0] sm:$0xff]  ;;  %v1948_v27 = vld [vmem:[#allocation10 + $0x4c8] sm:$0xff] }
 0x23c   :  { %v1952_v28 = vld [vmem:[#allocation10 + $0x4e8] sm:$0xff]  ;;  %v8229_v31 = vcombine.high %v1947_v25, %v1951_v26  ;;  %v8228_v37 = vcombine.low %v1947_v25, %v1951_v26 }
 0x23d   :  { %8166 = vmatmul.mubr.msk.bf16.vlgmr.msra.gmra.mxu1 %vm397_vm4, %v1217_v8  ;;  %8167 = vmatmul.mubr.msk.bf16.vlgmr.msra.gmra.mxu0 %vm397_vm4, %v1217_v8  ;;  %v1573_v8 = vld [vmem:[#allocation10 + $0x398] sm:$0xff]  ;;  %v8231_v32 = vcombine.high %v1948_v27, %v1952_v28  ;;  %v8230_v42 = vcombine.low %v1948_v27, %v1952_v28 }
 0x23e   :  { %1759 = vmatpush1.bf16.msra.mxu1 %v8192_v33  ;;  %1800 = vmatpush1.bf16.msra.mxu0 %v8194_v34  ;;  %v8191_v14 = vcombine.high %v1573_v8, %v1577_v9  ;;  %v8190_v43 = vcombine.low %v1573_v8, %v1577_v9  ;;  %v1939_v33 = vld [vmem:[#allocation10 + $0x480] sm:$0xff] }
 0x23f   :  { %1760 = vmatprep.subr.bf16.mxu1 %v8185_v35  ;;  %1801 = vmatprep.subr.bf16.mxu0 %v8187_v36  ;;  %v1943_v34 = vld [vmem:[#allocation10 + $0x4a0] sm:$0xff]  ;;  %v1940_v35 = vld [vmem:[#allocation10 + $0x488] sm:$0xff] }
 0x240   :  { %1782 = vmatprep.mubr.bf16.mxu1 %v9509_v44  ;;  %1823 = vmatprep.mubr.bf16.mxu0 %v9509_v44  ;;  %v1944_v36 = vld [vmem:[#allocation10 + $0x4a8] sm:$0xff]  ;;  %v8221_v46 = vcombine.high %v1939_v33, %v1943_v34  ;;  %v8220_v52 = vcombine.low %v1939_v33, %v1943_v34 }
 0x241   :  { %v8223_v47 = vcombine.high %v1940_v35, %v1944_v36  ;;  %v8222_v53 = vcombine.low %v1940_v35, %v1944_v36 }
 0x242   :  { %1761 = vmatpush1.bf16.msra.mxu1 %v8184_v48  ;;  %1802 = vmatpush1.bf16.msra.mxu0 %v8186_v49  ;;  %v1931_v48 = vld [vmem:[#allocation10 + $0x440] sm:$0xff] }
 0x243   :  { %1762 = vmatprep.subr.bf16.mxu1 %v8177_v50  ;;  %1803 = vmatprep.subr.bf16.mxu0 %v8179_v51  ;;  %v1935_v49 = vld [vmem:[#allocation10 + $0x460] sm:$0xff]  ;;  %v1932_v50 = vld [vmem:[#allocation10 + $0x448] sm:$0xff] }
 0x244   :  { %v1936_v51 = vld [vmem:[#allocation10 + $0x468] sm:$0xff]  ;;  %v8213_v54 = vcombine.high %v1931_v48, %v1935_v49  ;;  %v8212_v60 = vcombine.low %v1931_v48, %v1935_v49 }
 0x245   :  { %v8215_v55 = vcombine.high %v1932_v50, %v1936_v51  ;;  %v8214_v61 = vcombine.low %v1932_v50, %v1936_v51 }
 0x246   :  { %1763 = vmatpush1.bf16.msra.mxu1 %v8176_v56  ;;  %1804 = vmatpush1.bf16.msra.mxu0 %v8178_v57  ;;  %v1923_v56 = vld [vmem:[#allocation10 + $0x400] sm:$0xff] }
 0x247   :  { %1764 = vmatprep.subr.bf16.mxu1 %v8169_v58  ;;  %1805 = vmatprep.subr.bf16.mxu0 %v8171_v59  ;;  %v1927_v57 = vld [vmem:[#allocation10 + $0x420] sm:$0xff]  ;;  %v1924_v58 = vld [vmem:[#allocation10 + $0x408] sm:$0xff] }
 0x248   :  { %v1928_v59 = vld [vmem:[#allocation10 + $0x428] sm:$0xff]  ;;  %v8205_v62 = vcombine.high %v1923_v56, %v1927_v57  ;;  %v8204_v6 = vcombine.low %v1923_v56, %v1927_v57 }
 0x249   :  { %v8207_v1 = vcombine.high %v1924_v58, %v1928_v59  ;;  %v8206_v7 = vcombine.low %v1924_v58, %v1928_v59 }
 0x24a   :  { %1765 = vmatpush1.bf16.msra.mxu1 %v8168_v2  ;;  %1806 = vmatpush1.bf16.msra.mxu0 %v8170_v3  ;;  %v1949_v2 = vld [vmem:[#allocation10 + $0x4d0] sm:$0xff] }
 0x24b   :  { %1840 = vmatprep.subr.bf16.mxu1 %v8197_v4  ;;  %1881 = vmatprep.subr.bf16.mxu0 %v8199_v5  ;;  %v1953_v3 = vld [vmem:[#allocation10 + $0x4f0] sm:$0xff]  ;;  %v1950_v4 = vld [vmem:[#allocation10 + $0x4d8] sm:$0xff] }
 0x24c   :  { %v1954_v5 = vld [vmem:[#allocation10 + $0x4f8] sm:$0xff]  ;;  %v8233_v8 = vcombine.high %v1949_v2, %v1953_v3 }
 0x24d   :  { %8200 = vmatmul.mubr.msk.bf16.vlgmr.msra.gmra.mxu1 %vm397_vm4, %v1586_v12  ;;  %8201 = vmatmul.mubr.msk.bf16.vlgmr.msra.gmra.mxu0 %vm397_vm4, %v1586_v12  ;;  %v8235_v9 = vcombine.high %v1950_v4, %v1954_v5  ;;  %v8234_v15 = vcombine.low %v1950_v4, %v1954_v5 }
 0x24e   :  { %1841 = vmatpush1.bf16.msra.mxu1 %v8196_v10  ;;  %1882 = vmatpush1.bf16.msra.mxu0 %v8198_v11  ;;  %v1941_v10 = vld [vmem:[#allocation10 + $0x490] sm:$0xff] }
 0x24f   :  { %1842 = vmatprep.subr.bf16.mxu1 %v8189_v13  ;;  %1883 = vmatprep.subr.bf16.mxu0 %v8191_v14  ;;  %v1945_v11 = vld [vmem:[#allocation10 + $0x4b0] sm:$0xff]  ;;  %v1946_v13 = vld [vmem:[#allocation10 + $0x4b8] sm:$0xff]  ;;  %v8232_v14 = vcombine.low %v1949_v2, %v1953_v3 }
 0x250   :  { %1864 = vmatprep.mubr.bf16.mxu1 %v9509_v44  ;;  %1905 = vmatprep.mubr.bf16.mxu0 %v9509_v44  ;;  %v8225_v39 = vcombine.high %v1941_v10, %v1945_v11  ;;  %v8224_v17 = vcombine.low %v1941_v10, %v1945_v11 }
 0x252   :  { %1843 = vmatpush1.bf16.msra.mxu1 %v8188_v41  ;;  %1884 = vmatpush1.bf16.msra.mxu0 %v8190_v43  ;;  %v1933_v41 = vld [vmem:[#allocation10 + $0x450] sm:$0xff] }
 0x253   :  { %1844 = vmatprep.subr.bf16.mxu1 %v8181_v45  ;;  %1885 = vmatprep.subr.bf16.mxu0 %v8183_v16  ;;  %v1937_v43 = vld [vmem:[#allocation10 + $0x470] sm:$0xff]  ;;  %v1934_v45 = vld [vmem:[#allocation10 + $0x458] sm:$0xff] }
 0x254   :  { %v1938_v16 = vld [vmem:[#allocation10 + $0x478] sm:$0xff]  ;;  %v8217_v19 = vcombine.high %v1933_v41, %v1937_v43  ;;  %v8216_v25 = vcombine.low %v1933_v41, %v1937_v43  ;;  %v2324_v43 = vrot.slane %v9711_v63, 5 }
 0x255   :  { %v8219_v20 = vcombine.high %v1934_v45, %v1938_v16  ;;  %v8218_v26 = vcombine.low %v1934_v45, %v1938_v16 }
 0x256   :  { %1845 = vmatpush1.bf16.msra.mxu1 %v8180_v21  ;;  %1886 = vmatpush1.bf16.msra.mxu0 %v8182_v22  ;;  %v1925_v21 = vld [vmem:[#allocation10 + $0x410] sm:$0xff] }
 0x257   :  { %1846 = vmatprep.subr.bf16.mxu1 %v8173_v23  ;;  %1887 = vmatprep.subr.bf16.mxu0 %v8175_v24  ;;  %v1929_v22 = vld [vmem:[#allocation10 + $0x430] sm:$0xff]  ;;  %v1926_v23 = vld [vmem:[#allocation10 + $0x418] sm:$0xff] }
 0x258   :  { %v1930_v24 = vld [vmem:[#allocation10 + $0x438] sm:$0xff]  ;;  %v8209_v27 = vcombine.high %v1925_v21, %v1929_v22  ;;  %v8208_v33 = vcombine.low %v1925_v21, %v1929_v22 }
 0x259   :  { %v8211_v28 = vcombine.high %v1926_v23, %v1930_v24  ;;  %v8210_v34 = vcombine.low %v1926_v23, %v1930_v24 }
 0x25a   :  { %1847 = vmatpush1.bf16.msra.mxu1 %v8172_v29  ;;  %1888 = vmatpush1.bf16.msra.mxu0 %v8174_v30  ;;  %v2316_v29 = vld [vmem:[#allocation10 + $0x5c0] sm:$0xff] }
 0x25b   :  { %2127 = vmatprep.subr.bf16.mxu1 %v8229_v31  ;;  %2168 = vmatprep.subr.bf16.mxu0 %v8231_v32  ;;  %v2320_v30 = vld [vmem:[#allocation10 + $0x5e0] sm:$0xff]  ;;  %v2317_v31 = vld [vmem:[#allocation10 + $0x5c8] sm:$0xff] }
 0x25c   :  { %v2321_v32 = vld [vmem:[#allocation10 + $0x5e8] sm:$0xff]  ;;  %v8265_v35 = vcombine.high %v2316_v29, %v2320_v30  ;;  %v8264_v48 = vcombine.low %v2316_v29, %v2320_v30 }
 0x25d   :  { %8202 = vmatmul.mubr.msk.bf16.vlgmr.msra.gmra.mxu1 %vm397_vm4, %v1586_v12  ;;  %8203 = vmatmul.mubr.msk.bf16.vlgmr.msra.gmra.mxu0 %vm397_vm4, %v1586_v12  ;;  %v1942_v12 = vld [vmem:[#allocation10 + $0x498] sm:$0xff]  ;;  %v8267_v36 = vcombine.high %v2317_v31, %v2321_v32  ;;  %v8266_v49 = vcombine.low %v2317_v31, %v2321_v32 }
 0x25e   :  { %2128 = vmatpush1.bf16.msra.mxu1 %v8228_v37  ;;  %2169 = vmatpush1.bf16.msra.mxu0 %v8230_v42  ;;  %v8227_v40 = vcombine.high %v1942_v12, %v1946_v13  ;;  %v8226_v18 = vcombine.low %v1942_v12, %v1946_v13  ;;  %v2308_v37 = vld [vmem:[#allocation10 + $0x580] sm:$0xff] }
 0x25f   :  { %2129 = vmatprep.subr.bf16.mxu1 %v8221_v46  ;;  %2170 = vmatprep.subr.bf16.mxu0 %v8223_v47  ;;  %v2312_v42 = vld [vmem:[#allocation10 + $0x5a0] sm:$0xff]  ;;  %v2309_v46 = vld [vmem:[#allocation10 + $0x588] sm:$0xff] }
 0x260   :  { %2151 = vmatprep.mubr.bf16.mxu1 %v9509_v44  ;;  %2192 = vmatprep.mubr.bf16.mxu0 %v9509_v44  ;;  %v2313_v47 = vld [vmem:[#allocation10 + $0x5a8] sm:$0xff]  ;;  %v8257_v50 = vcombine.high %v2308_v37, %v2312_v42  ;;  %v8256_v56 = vcombine.low %v2308_v37, %v2312_v42 }
 0x261   :  { %v8259_v51 = vcombine.high %v2309_v46, %v2313_v47  ;;  %v8258_v57 = vcombine.low %v2309_v46, %v2313_v47 }
 0x262   :  { %2130 = vmatpush1.bf16.msra.mxu1 %v8220_v52  ;;  %2171 = vmatpush1.bf16.msra.mxu0 %v8222_v53  ;;  %v2300_v52 = vld [vmem:[#allocation10 + $0x540] sm:$0xff] }
 0x263   :  { %2131 = vmatprep.subr.bf16.mxu1 %v8213_v54  ;;  %2172 = vmatprep.subr.bf16.mxu0 %v8215_v55  ;;  %v2304_v53 = vld [vmem:[#allocation10 + $0x560] sm:$0xff]  ;;  %v2301_v54 = vld [vmem:[#allocation10 + $0x548] sm:$0xff] }
 0x264   :  { %v2305_v55 = vld [vmem:[#allocation10 + $0x568] sm:$0xff]  ;;  %v8249_v58 = vcombine.high %v2300_v52, %v2304_v53  ;;  %v8248_v2 = vcombine.low %v2300_v52, %v2304_v53 }
 0x265   :  { %v8251_v59 = vcombine.high %v2301_v54, %v2305_v55  ;;  %v8250_v3 = vcombine.low %v2301_v54, %v2305_v55 }
 0x266   :  { %2132 = vmatpush1.bf16.msra.mxu1 %v8212_v60  ;;  %2173 = vmatpush1.bf16.msra.mxu0 %v8214_v61  ;;  %v2292_v60 = vld [vmem:[#allocation10 + $0x500] sm:$0xff] }
 0x267   :  { %2133 = vmatprep.subr.bf16.mxu1 %v8205_v62  ;;  %2174 = vmatprep.subr.bf16.mxu0 %v8207_v1  ;;  %v2296_v61 = vld [vmem:[#allocation10 + $0x520] sm:$0xff]  ;;  %v2293_v62 = vld [vmem:[#allocation10 + $0x508] sm:$0xff] }
 0x268   :  { %v2297_v1 = vld [vmem:[#allocation10 + $0x528] sm:$0xff]  ;;  %v8241_v4 = vcombine.high %v2292_v60, %v2296_v61  ;;  %v8240_v10 = vcombine.low %v2292_v60, %v2296_v61 }
 0x269   :  { %v8243_v5 = vcombine.high %v2293_v62, %v2297_v1  ;;  %v8242_v11 = vcombine.low %v2293_v62, %v2297_v1 }
 0x26a   :  { %2134 = vmatpush1.bf16.msra.mxu1 %v8204_v6  ;;  %2175 = vmatpush1.bf16.msra.mxu0 %v8206_v7  ;;  %v2318_v6 = vld [vmem:[#allocation10 + $0x5d0] sm:$0xff] }
 0x26b   :  { %2209 = vmatprep.subr.bf16.mxu1 %v8233_v8  ;;  %2250 = vmatprep.subr.bf16.mxu0 %v8235_v9  ;;  %v2322_v7 = vld [vmem:[#allocation10 + $0x5f0] sm:$0xff]  ;;  %v2319_v8 = vld [vmem:[#allocation10 + $0x5d8] sm:$0xff] }
 0x26c   :  { %v2323_v9 = vld [vmem:[#allocation10 + $0x5f8] sm:$0xff]  ;;  %v8269_v12 = vcombine.high %v2318_v6, %v2322_v7 }
 0x26d   :  { %8236 = vmatmul.mubr.msk.bf16.vlgmr.msra.gmra.mxu1 %vm397_vm4, %v1955_v38  ;;  %8237 = vmatmul.mubr.msk.bf16.vlgmr.msra.gmra.mxu0 %vm397_vm4, %v1955_v38  ;;  %v8271_v13 = vcombine.high %v2319_v8, %v2323_v9  ;;  %v8270_v41 = vcombine.low %v2319_v8, %v2323_v9 }
 0x26e   :  { %2210 = vmatpush1.bf16.msra.mxu1 %v8232_v14  ;;  %2251 = vmatpush1.bf16.msra.mxu0 %v8234_v15  ;;  %v2310_v14 = vld [vmem:[#allocation10 + $0x590] sm:$0xff] }
 0x26f   :  { %2211 = vmatprep.subr.bf16.mxu1 %v8225_v39  ;;  %2252 = vmatprep.subr.bf16.mxu0 %v8227_v40  ;;  %v2314_v15 = vld [vmem:[#allocation10 + $0x5b0] sm:$0xff]  ;;  %v2315_v39 = vld [vmem:[#allocation10 + $0x5b8] sm:$0xff]  ;;  %v8268_v40 = vcombine.low %v2318_v6, %v2322_v7 }
 0x270   :  { %2233 = vmatprep.mubr.bf16.mxu1 %v9509_v44  ;;  %2274 = vmatprep.mubr.bf16.mxu0 %v9509_v44  ;;  %v8261_v45 = vcombine.high %v2310_v14, %v2314_v15  ;;  %v8260_v21 = vcombine.low %v2310_v14, %v2314_v15 }
 0x272   :  { %2212 = vmatpush1.bf16.msra.mxu1 %v8224_v17  ;;  %2253 = vmatpush1.bf16.msra.mxu0 %v8226_v18  ;;  %v2302_v17 = vld [vmem:[#allocation10 + $0x550] sm:$0xff] }
 0x273   :  { %2213 = vmatprep.subr.bf16.mxu1 %v8217_v19  ;;  %2254 = vmatprep.subr.bf16.mxu0 %v8219_v20  ;;  %v2306_v18 = vld [vmem:[#allocation10 + $0x570] sm:$0xff]  ;;  %v2303_v19 = vld [vmem:[#allocation10 + $0x558] sm:$0xff] }
 0x274   :  { %v2307_v20 = vld [vmem:[#allocation10 + $0x578] sm:$0xff]  ;;  %v8253_v23 = vcombine.high %v2302_v17, %v2306_v18  ;;  %v8252_v29 = vcombine.low %v2302_v17, %v2306_v18  ;;  %v9779_v18 = vrot.slane %v9711_v63, 6 }
 0x275   :  { %v8255_v24 = vcombine.high %v2303_v19, %v2307_v20  ;;  %v8254_v30 = vcombine.low %v2303_v19, %v2307_v20 }
 0x276   :  { %2214 = vmatpush1.bf16.msra.mxu1 %v8216_v25  ;;  %2255 = vmatpush1.bf16.msra.mxu0 %v8218_v26  ;;  %v2294_v25 = vld [vmem:[#allocation10 + $0x510] sm:$0xff] }
 0x277   :  { %2215 = vmatprep.subr.bf16.mxu1 %v8209_v27  ;;  %2256 = vmatprep.subr.bf16.mxu0 %v8211_v28  ;;  %v2298_v26 = vld [vmem:[#allocation10 + $0x530] sm:$0xff]  ;;  %v2295_v27 = vld [vmem:[#allocation10 + $0x518] sm:$0xff] }
 0x278   :  { %v2299_v28 = vld [vmem:[#allocation10 + $0x538] sm:$0xff]  ;;  %v8245_v31 = vcombine.high %v2294_v25, %v2298_v26  ;;  %v8244_v37 = vcombine.low %v2294_v25, %v2298_v26 }
 0x279   :  { %v8247_v32 = vcombine.high %v2295_v27, %v2299_v28  ;;  %v8246_v42 = vcombine.low %v2295_v27, %v2299_v28 }
 0x27a   :  { %2216 = vmatpush1.bf16.msra.mxu1 %v8208_v33  ;;  %2257 = vmatpush1.bf16.msra.mxu0 %v8210_v34  ;;  %v2685_v33 = vld [vmem:[#allocation10 + $0x6c0] sm:$0xff] }
 0x27b   :  { %2496 = vmatprep.subr.bf16.mxu1 %v8265_v35  ;;  %2537 = vmatprep.subr.bf16.mxu0 %v8267_v36  ;;  %v2689_v34 = vld [vmem:[#allocation10 + $0x6e0] sm:$0xff]  ;;  %v2686_v35 = vld [vmem:[#allocation10 + $0x6c8] sm:$0xff] }
 0x27c   :  { %v2690_v36 = vld [vmem:[#allocation10 + $0x6e8] sm:$0xff]  ;;  %v8301_v46 = vcombine.high %v2685_v33, %v2689_v34  ;;  %v8300_v52 = vcombine.low %v2685_v33, %v2689_v34  ;;  %v2663_v33 = vld [vmem:[#allocation10 + $0x610] sm:$0xff] }
 0x27d   :  { %8238 = vmatmul.mubr.msk.bf16.vlgmr.msra.gmra.mxu1 %vm397_vm4, %v1955_v38  ;;  %8239 = vmatmul.mubr.msk.bf16.vlgmr.msra.gmra.mxu0 %vm397_vm4, %v1955_v38  ;;  %v2311_v38 = vld [vmem:[#allocation10 + $0x598] sm:$0xff]  ;;  %v8303_v47 = vcombine.high %v2686_v35, %v2690_v36  ;;  %v8302_v53 = vcombine.low %v2686_v35, %v2690_v36  ;;  %v2667_v34 = vld [vmem:[#allocation10 + $0x630] sm:$0xff] }
 0x27e   :  { %2497 = vmatpush1.bf16.msra.mxu1 %v8264_v48  ;;  %2538 = vmatpush1.bf16.msra.mxu0 %v8266_v49  ;;  %v8263_v16 = vcombine.high %v2311_v38, %v2315_v39  ;;  %v8262_v22 = vcombine.low %v2311_v38, %v2315_v39  ;;  %v2677_v48 = vld [vmem:[#allocation10 + $0x680] sm:$0xff]  ;;  %v2664_v35 = vld [vmem:[#allocation10 + $0x618] sm:$0xff] }
 0x27f   :  { %2498 = vmatprep.subr.bf16.mxu1 %v8257_v50  ;;  %2539 = vmatprep.subr.bf16.mxu0 %v8259_v51  ;;  %v2681_v49 = vld [vmem:[#allocation10 + $0x6a0] sm:$0xff]  ;;  %v2678_v50 = vld [vmem:[#allocation10 + $0x688] sm:$0xff]  ;;  %v2668_v36 = vld [vmem:[#allocation10 + $0x638] sm:$0xff] }
 0x280   :  { %2520 = vmatprep.mubr.bf16.mxu1 %v9509_v44  ;;  %2561 = vmatprep.mubr.bf16.mxu0 %v9509_v44  ;;  %v2682_v51 = vld [vmem:[#allocation10 + $0x6a8] sm:$0xff]  ;;  %v8293_v54 = vcombine.high %v2677_v48, %v2681_v49  ;;  %v8292_v60 = vcombine.low %v2677_v48, %v2681_v49 }
 0x281   :  { %v8295_v55 = vcombine.high %v2678_v50, %v2682_v51  ;;  %v8294_v61 = vcombine.low %v2678_v50, %v2682_v51  ;;  %v8281_v50 = vcombine.high %v2663_v33, %v2667_v34  ;;  %v8283_v51 = vcombine.high %v2664_v35, %v2668_v36 }
 0x282   :  { %2499 = vmatpush1.bf16.msra.mxu1 %v8256_v56  ;;  %2540 = vmatpush1.bf16.msra.mxu0 %v8258_v57  ;;  %v2669_v56 = vld [vmem:[#allocation10 + $0x640] sm:$0xff] }
 0x283   :  { %2500 = vmatprep.subr.bf16.mxu1 %v8249_v58  ;;  %2541 = vmatprep.subr.bf16.mxu0 %v8251_v59  ;;  %v2673_v57 = vld [vmem:[#allocation10 + $0x660] sm:$0xff]  ;;  %v2670_v58 = vld [vmem:[#allocation10 + $0x648] sm:$0xff] }
 0x284   :  { %v2674_v59 = vld [vmem:[#allocation10 + $0x668] sm:$0xff]  ;;  %v8285_v62 = vcombine.high %v2669_v56, %v2673_v57  ;;  %v8284_v6 = vcombine.low %v2669_v56, %v2673_v57  ;;  %v8280_v56 = vcombine.low %v2663_v33, %v2667_v34  ;;  %v8282_v57 = vcombine.low %v2664_v35, %v2668_v36  ;;  %v3048_v36 = vld [vmem:[#allocation10 + $0x790] sm:$0xff] }
 0x285   :  { %v8287_v1 = vcombine.high %v2670_v58, %v2674_v59  ;;  %v8286_v7 = vcombine.low %v2670_v58, %v2674_v59 }
 0x286   :  { %2501 = vmatpush1.bf16.msra.mxu1 %v8248_v2  ;;  %2542 = vmatpush1.bf16.msra.mxu0 %v8250_v3  ;;  %v2661_v2 = vld [vmem:[#allocation10 + $0x600] sm:$0xff] }
 0x287   :  { %2502 = vmatprep.subr.bf16.mxu1 %v8241_v4  ;;  %2543 = vmatprep.subr.bf16.mxu0 %v8243_v5  ;;  %v2665_v3 = vld [vmem:[#allocation10 + $0x620] sm:$0xff]  ;;  %v2662_v4 = vld [vmem:[#allocation10 + $0x608] sm:$0xff] }
 0x288   :  { %v2666_v5 = vld [vmem:[#allocation10 + $0x628] sm:$0xff]  ;;  %v8277_v8 = vcombine.high %v2661_v2, %v2665_v3  ;;  %v8276_v14 = vcombine.low %v2661_v2, %v2665_v3 }
 0x289   :  { %v8279_v9 = vcombine.high %v2662_v4, %v2666_v5  ;;  %v8278_v15 = vcombine.low %v2662_v4, %v2666_v5 }
 0x28a   :  { %2503 = vmatpush1.bf16.msra.mxu1 %v8240_v10  ;;  %2544 = vmatpush1.bf16.msra.mxu0 %v8242_v11  ;;  %v2687_v10 = vld [vmem:[#allocation10 + $0x6d0] sm:$0xff] }
 0x28b   :  { %2578 = vmatprep.subr.bf16.mxu1 %v8269_v12  ;;  %2619 = vmatprep.subr.bf16.mxu0 %v8271_v13  ;;  %v2691_v11 = vld [vmem:[#allocation10 + $0x6f0] sm:$0xff]  ;;  %v2688_v12 = vld [vmem:[#allocation10 + $0x6d8] sm:$0xff] }
 0x28c   :  { %v2692_v13 = vld [vmem:[#allocation10 + $0x6f8] sm:$0xff]  ;;  %v8305_v38 = vcombine.high %v2687_v10, %v2691_v11 }
 0x28d   :  { %8272 = vmatmul.mubr.msk.bf16.vlgmr.msra.gmra.mxu1 %vm397_vm4, %v2324_v43  ;;  %8273 = vmatmul.mubr.msk.bf16.vlgmr.msra.gmra.mxu0 %vm397_vm4, %v2324_v43  ;;  %v8307_v39 = vcombine.high %v2688_v12, %v2692_v13  ;;  %v8306_v17 = vcombine.low %v2688_v12, %v2692_v13 }
 0x28e   :  { %2579 = vmatpush1.bf16.msra.mxu1 %v8268_v40  ;;  %2620 = vmatpush1.bf16.msra.mxu0 %v8270_v41  ;;  %v2679_v40 = vld [vmem:[#allocation10 + $0x690] sm:$0xff] }
 0x28f   :  { %2580 = vmatprep.subr.bf16.mxu1 %v8261_v45  ;;  %2621 = vmatprep.subr.bf16.mxu0 %v8263_v16  ;;  %v2683_v41 = vld [vmem:[#allocation10 + $0x6b0] sm:$0xff]  ;;  %v2684_v45 = vld [vmem:[#allocation10 + $0x6b8] sm:$0xff]  ;;  %v8304_v16 = vcombine.low %v2687_v10, %v2691_v11 }
 0x290   :  { %2602 = vmatprep.mubr.bf16.mxu1 %v9509_v44  ;;  %2643 = vmatprep.mubr.bf16.mxu0 %v9509_v44  ;;  %v8297_v19 = vcombine.high %v2679_v40, %v2683_v41  ;;  %v8296_v27 = vcombine.low %v2679_v40, %v2683_v41  ;;  %v3030_v40 = vld [vmem:[#allocation10 + $0x700] sm:$0xff] }
 0x291   :  { %v3034_v41 = vld [vmem:[#allocation10 + $0x720] sm:$0xff] }
 0x292   :  { %2581 = vmatpush1.bf16.msra.mxu1 %v8260_v21  ;;  %2622 = vmatpush1.bf16.msra.mxu0 %v8262_v22  ;;  %v2671_v21 = vld [vmem:[#allocation10 + $0x650] sm:$0xff] }
 0x293   :  { %2582 = vmatprep.subr.bf16.mxu1 %v8253_v23  ;;  %2623 = vmatprep.subr.bf16.mxu0 %v8255_v24  ;;  %v2675_v22 = vld [vmem:[#allocation10 + $0x670] sm:$0xff]  ;;  %v2672_v23 = vld [vmem:[#allocation10 + $0x658] sm:$0xff] }
 0x294   :  { %v2676_v24 = vld [vmem:[#allocation10 + $0x678] sm:$0xff] }
 0x296   :  { %2583 = vmatpush1.bf16.msra.mxu1 %v8252_v29  ;;  %2624 = vmatpush1.bf16.msra.mxu0 %v8254_v30 }
 0x297   :  { %2584 = vmatprep.subr.bf16.mxu1 %v8245_v31  ;;  %2625 = vmatprep.subr.bf16.mxu0 %v8247_v32  ;;  %v8289_v31 = vcombine.high %v2671_v21, %v2675_v22  ;;  %v8291_v32 = vcombine.high %v2672_v23, %v2676_v24 }
 0x29a   :  { %2585 = vmatpush1.bf16.msra.mxu1 %v8244_v37  ;;  %2626 = vmatpush1.bf16.msra.mxu0 %v8246_v42 }
 0x29b   :  { %2865 = vmatprep.subr.bf16.mxu1 %v8301_v46  ;;  %2906 = vmatprep.subr.bf16.mxu0 %v8303_v47  ;;  %v8288_v46 = vcombine.low %v2671_v21, %v2675_v22  ;;  %v8290_v47 = vcombine.low %v2672_v23, %v2676_v24  ;;  %v8313_v22 = vcombine.high %v3030_v40, %v3034_v41  ;;  %v3056_v24 = vld [vmem:[#allocation10 + $0x7d0] sm:$0xff] }
 0x29d   :  { %8274 = vmatmul.mubr.msk.bf16.vlgmr.msra.gmra.mxu1 %vm397_vm4, %v2324_v43  ;;  %8275 = vmatmul.mubr.msk.bf16.vlgmr.msra.gmra.mxu0 %vm397_vm4, %v2324_v43  ;;  %v2680_v43 = vld [vmem:[#allocation10 + $0x698] sm:$0xff] }
 0x29e   :  { %2866 = vmatpush1.bf16.msra.mxu1 %v8300_v52  ;;  %2907 = vmatpush1.bf16.msra.mxu0 %v8302_v53  ;;  %v8299_v20 = vcombine.high %v2680_v43, %v2684_v45  ;;  %v8298_v28 = vcombine.low %v2680_v43, %v2684_v45  ;;  %v3054_v52 = vld [vmem:[#allocation10 + $0x7c0] sm:$0xff]  ;;  %v3031_v43 = vld [vmem:[#allocation10 + $0x708] sm:$0xff] }
 0x29f   :  { %2867 = vmatprep.subr.bf16.mxu1 %v8293_v54  ;;  %2908 = vmatprep.subr.bf16.mxu0 %v8295_v55  ;;  %v3058_v53 = vld [vmem:[#allocation10 + $0x7e0] sm:$0xff]  ;;  %v3055_v54 = vld [vmem:[#allocation10 + $0x7c8] sm:$0xff] }
 0x2a0   :  { %2889 = vmatprep.mubr.bf16.mxu1 %v9509_v44  ;;  %2930 = vmatprep.mubr.bf16.mxu0 %v9509_v44  ;;  %v3059_v55 = vld [vmem:[#allocation10 + $0x7e8] sm:$0xff]  ;;  %v8337_v58 = vcombine.high %v3054_v52, %v3058_v53  ;;  %v8336_v2 = vcombine.low %v3054_v52, %v3058_v53  ;;  %v3040_v52 = vld [vmem:[#allocation10 + $0x750] sm:$0xff] }
 0x2a1   :  { %v8339_v59 = vcombine.high %v3055_v54, %v3059_v55  ;;  %v8338_v3 = vcombine.low %v3055_v54, %v3059_v55  ;;  %v3035_v45 = vld [vmem:[#allocation10 + $0x728] sm:$0xff]  ;;  %v3044_v53 = vld [vmem:[#allocation10 + $0x770] sm:$0xff]  ;;  %v3041_v54 = vld [vmem:[#allocation10 + $0x758] sm:$0xff] }
 0x2a2   :  { %2868 = vmatpush1.bf16.msra.mxu1 %v8292_v60  ;;  %2909 = vmatpush1.bf16.msra.mxu0 %v8294_v61  ;;  %v3046_v60 = vld [vmem:[#allocation10 + $0x780] sm:$0xff]  ;;  %v8315_v23 = vcombine.high %v3031_v43, %v3035_v45  ;;  %v8314_v33 = vcombine.low %v3031_v43, %v3035_v45  ;;  %v3045_v55 = vld [vmem:[#allocation10 + $0x778] sm:$0xff]  ;;  %v3428_v43 = vld [vmem:[#allocation10 + $0x8e8] sm:$0xff] }
 0x2a3   :  { %2869 = vmatprep.subr.bf16.mxu1 %v8285_v62  ;;  %2910 = vmatprep.subr.bf16.mxu0 %v8287_v1  ;;  %v3050_v61 = vld [vmem:[#allocation10 + $0x7a0] sm:$0xff]  ;;  %v3047_v62 = vld [vmem:[#allocation10 + $0x788] sm:$0xff] }
 0x2a4   :  { %v3051_v1 = vld [vmem:[#allocation10 + $0x7a8] sm:$0xff]  ;;  %v8329_v4 = vcombine.high %v3046_v60, %v3050_v61  ;;  %v8328_v12 = vcombine.low %v3046_v60, %v3050_v61 }
 0x2a5   :  { %v8331_v5 = vcombine.high %v3047_v62, %v3051_v1  ;;  %v8330_v13 = vcombine.low %v3047_v62, %v3051_v1  ;;  %v8325_v1 = vcombine.high %v3040_v52, %v3044_v53 }
 0x2a6   :  { %2870 = vmatpush1.bf16.msra.mxu1 %v8284_v6  ;;  %2911 = vmatpush1.bf16.msra.mxu0 %v8286_v7  ;;  %v3038_v6 = vld [vmem:[#allocation10 + $0x740] sm:$0xff] }
 0x2a7   :  { %2871 = vmatprep.subr.bf16.mxu1 %v8277_v8  ;;  %2912 = vmatprep.subr.bf16.mxu0 %v8279_v9  ;;  %v3042_v7 = vld [vmem:[#allocation10 + $0x760] sm:$0xff]  ;;  %v3039_v8 = vld [vmem:[#allocation10 + $0x748] sm:$0xff] }
 0x2a8   :  { %v3043_v9 = vld [vmem:[#allocation10 + $0x768] sm:$0xff] }
 0x2aa   :  { %2872 = vmatpush1.bf16.msra.mxu1 %v8276_v14  ;;  %2913 = vmatpush1.bf16.msra.mxu0 %v8278_v15 }
 0x2ab   :  { %2947 = vmatprep.subr.bf16.mxu1 %v8305_v38  ;;  %2988 = vmatprep.subr.bf16.mxu0 %v8307_v39  ;;  %v8321_v38 = vcombine.high %v3038_v6, %v3042_v7  ;;  %v8323_v39 = vcombine.high %v3039_v8, %v3043_v9 }
 0x2ad   :  { %8308 = vmatmul.mubr.msk.bf16.vlgmr.msra.gmra.mxu1 %vm397_vm4, %v9779_v18  ;;  %8309 = vmatmul.mubr.msk.bf16.vlgmr.msra.gmra.mxu0 %vm397_vm4, %v9779_v18  ;;  %v9785_v25 = vpop.f32.mrf.mxu1  ;;  %v9787_v26 = vpop.f32.mrf.mxu0 }
 0x2ae   :  { %2948 = vmatpush1.bf16.msra.mxu1 %v8304_v16  ;;  %2989 = vmatpush1.bf16.msra.mxu0 %v8306_v17 }
 0x2af   :  { %v9789_v29 = vpop.f32.mrf.mxu1  ;;  %v9791_v30 = vpop.f32.mrf.mxu0  ;;  %2949 = vmatprep.subr.bf16.mxu1 %v8297_v19  ;;  %2990 = vmatprep.subr.bf16.mxu0 %v8299_v20  ;;  %v8322_v19 = vcombine.low %v3039_v8, %v3043_v9  ;;  %v8324_v9 = vcombine.low %v3040_v52, %v3044_v53  ;;  %v3399_v53 = vld [vmem:[#allocation10 + $0x800] sm:$0xff] }
 0x2b0   :  { %2971 = vmatprep.mubr.bf16.mxu1 %v9509_v44  ;;  %3012 = vmatprep.mubr.bf16.mxu0 %v9509_v44 }
 0x2b1   :  { %v731_v37 = vpop.f32.mrf.mxu1  ;;  %v772_v42 = vpop.f32.mrf.mxu0 }
 0x2b2   :  { %2950 = vmatpush1.bf16.msra.mxu1 %v8296_v27  ;;  %2991 = vmatpush1.bf16.msra.mxu0 %v8298_v28  ;;  %v3060_v27 = vld [vmem:[#allocation10 + $0x7f0] sm:$0xff]  ;;  %v3057_v28 = vld [vmem:[#allocation10 + $0x7d8] sm:$0xff] }
 0x2b3   :  { %v732_v48 = vpop.f32.mrf.mxu1  ;;  %v773_v49 = vpop.f32.mrf.mxu0  ;;  %2951 = vmatprep.subr.bf16.mxu1 %v8289_v31  ;;  %2992 = vmatprep.subr.bf16.mxu0 %v8291_v32  ;;  %v3061_v31 = vld [vmem:[#allocation10 + $0x7f8] sm:$0xff]  ;;  %v8312_v32 = vcombine.low %v3030_v40, %v3034_v41  ;;  %v8341_v34 = vcombine.high %v3056_v24, %v3060_v27  ;;  %v3052_v37 = vld [vmem:[#allocation10 + $0x7b0] sm:$0xff]  ;;  %v3427_v40 = vld [vmem:[#allocation10 + $0x8e0] sm:$0xff] }
 0x2b4   :  { %v8343_v35 = vcombine.high %v3057_v28, %v3061_v31  ;;  %v3049_v42 = vld [vmem:[#allocation10 + $0x798] sm:$0xff]  ;;  %v8342_v48 = vcombine.low %v3057_v28, %v3061_v31  ;;  %v9810_v49 = vrot.slane %v9711_v63, 7  ;;  %v3424_v41 = vld [vmem:[#allocation10 + $0x8c8] sm:$0xff]  ;;  %v3407_v31 = vld [vmem:[#allocation10 + $0x840] sm:$0xff] }
 0x2b6   :  { %2952 = vmatpush1.bf16.msra.mxu1 %v8288_v46  ;;  %2993 = vmatpush1.bf16.msra.mxu0 %v8290_v47  ;;  %v3053_v46 = vld [vmem:[#allocation10 + $0x7b8] sm:$0xff]  ;;  %v8340_v47 = vcombine.low %v3056_v24, %v3060_v27  ;;  %v8374_v24 = vcombine.low %v3424_v41, %v3428_v43 }
 0x2b7   :  { %2953 = vmatprep.subr.bf16.mxu1 %v8281_v50  ;;  %2994 = vmatprep.subr.bf16.mxu0 %v8283_v51  ;;  %v8333_v50 = vcombine.high %v3048_v36, %v3052_v37  ;;  %v8335_v51 = vcombine.high %v3049_v42, %v3053_v46  ;;  %v8334_v60 = vcombine.low %v3049_v42, %v3053_v46 }
 0x2ba   :  { %2954 = vmatpush1.bf16.msra.mxu1 %v8280_v56  ;;  %2995 = vmatpush1.bf16.msra.mxu0 %v8282_v57 }
 0x2bb   :  { %3234 = vmatprep.subr.bf16.mxu1 %v8337_v58  ;;  %3275 = vmatprep.subr.bf16.mxu0 %v8339_v59  ;;  %v8332_v58 = vcombine.low %v3048_v36, %v3052_v37 }
 0x2bd   :  { %v9795_v10 = vpop.f32.mrf.mxu1  ;;  %v9797_v11 = vpop.f32.mrf.mxu0  ;;  %8310 = vmatmul.mubr.msk.bf16.vlgmr.msra.gmra.mxu1 %vm397_vm4, %v9779_v18  ;;  %8311 = vmatmul.mubr.msk.bf16.vlgmr.msra.gmra.mxu0 %vm397_vm4, %v9779_v18  ;;  %v8320_v18 = vcombine.low %v3038_v6, %v3042_v7  ;;  %v3033_v6 = vld [vmem:[#allocation10 + $0x718] sm:$0xff] }
 0x2be   :  { %3235 = vmatpush1.bf16.msra.mxu1 %v8336_v2  ;;  %3276 = vmatpush1.bf16.msra.mxu0 %v8338_v3  ;;  %v8327_v2 = vcombine.high %v3041_v54, %v3045_v55  ;;  %v3032_v3 = vld [vmem:[#allocation10 + $0x710] sm:$0xff] }
 0x2bf   :  { %v9803_v14 = vpop.f32.mrf.mxu1  ;;  %v9805_v15 = vpop.f32.mrf.mxu0  ;;  %3236 = vmatprep.subr.bf16.mxu1 %v8329_v4  ;;  %3277 = vmatprep.subr.bf16.mxu0 %v8331_v5 }
 0x2c0   :  { %3258 = vmatprep.mubr.bf16.mxu1 %v9509_v44  ;;  %3299 = vmatprep.mubr.bf16.mxu0 %v9509_v44 }
 0x2c1   :  { %v813_v16 = vpop.f32.mrf.mxu1  ;;  %v854_v17 = vpop.f32.mrf.mxu0 }
 0x2c2   :  { %3237 = vmatpush1.bf16.msra.mxu1 %v8328_v12  ;;  %3278 = vmatpush1.bf16.msra.mxu0 %v8330_v13  ;;  %v8326_v12 = vcombine.low %v3041_v54, %v3045_v55  ;;  %v3400_v55 = vld [vmem:[#allocation10 + $0x808] sm:$0xff] }
 0x2c3   :  { %v814_v20 = vpop.f32.mrf.mxu1  ;;  %v855_v21 = vpop.f32.mrf.mxu0  ;;  %3238 = vmatprep.subr.bf16.mxu1 %v8321_v38  ;;  %3279 = vmatprep.subr.bf16.mxu0 %v8323_v39  ;;  %v3423_v39 = vld [vmem:[#allocation10 + $0x8c0] sm:$0xff] }
 0x2c4   :  { %v8373_v17 = vcombine.high %v3423_v39, %v3427_v40  ;;  %v3419_v20 = vld [vmem:[#allocation10 + $0x8a0] sm:$0xff]  ;;  %v3416_v21 = vld [vmem:[#allocation10 + $0x888] sm:$0xff] }
 0x2c6   :  { %3239 = vmatpush1.bf16.msra.mxu1 %v8320_v18  ;;  %3280 = vmatpush1.bf16.msra.mxu0 %v8322_v19  ;;  %v8375_v18 = vcombine.high %v3424_v41, %v3428_v43  ;;  %v3415_v19 = vld [vmem:[#allocation10 + $0x880] sm:$0xff]  ;;  %v3409_v41 = vld [vmem:[#allocation10 + $0x850] sm:$0xff] }
 0x2c7   :  { %3240 = vmatprep.subr.bf16.mxu1 %v8313_v22  ;;  %3281 = vmatprep.subr.bf16.mxu0 %v8315_v23  ;;  %v3420_v22 = vld [vmem:[#allocation10 + $0x8a8] sm:$0xff]  ;;  %v8372_v23 = vcombine.low %v3423_v39, %v3427_v40  ;;  %v8365_v27 = vcombine.high %v3415_v19, %v3419_v20  ;;  %v8364_v37 = vcombine.low %v3415_v19, %v3419_v20  ;;  %v3413_v43 = vld [vmem:[#allocation10 + $0x870] sm:$0xff] }
 0x2c8   :  { %v8367_v28 = vcombine.high %v3416_v21, %v3420_v22 }
 0x2ca   :  { %3241 = vmatpush1.bf16.msra.mxu1 %v8312_v32  ;;  %3282 = vmatpush1.bf16.msra.mxu0 %v8314_v33  ;;  %v3411_v32 = vld [vmem:[#allocation10 + $0x860] sm:$0xff]  ;;  %v3408_v33 = vld [vmem:[#allocation10 + $0x848] sm:$0xff] }
 0x2cb   :  { %3316 = vmatprep.subr.bf16.mxu1 %v8341_v34  ;;  %3357 = vmatprep.subr.bf16.mxu0 %v8343_v35  ;;  %v3412_v34 = vld [vmem:[#allocation10 + $0x868] sm:$0xff] }
 0x2cc   :  { %v8359_v52 = vcombine.high %v3408_v33, %v3412_v34 }
 0x2cd   :  { %v1054_v56 = vpop.f32.mrf.mxu1  ;;  %v1095_v57 = vpop.f32.mrf.mxu0  ;;  %8344 = vmatmul.mubr.msk.bf16.vlgmr.msra.gmra.mxu1 %vm397_vm4, %v9810_v49  ;;  %8345 = vmatmul.mubr.msk.bf16.vlgmr.msra.gmra.mxu0 %vm397_vm4, %v9810_v49 }
 0x2ce   :  { %v9817_v63 = vadd.f32 %v1054_v56, %v9785_v25  ;;  %v9820_v59 = vadd.f32 %v1095_v57, %v9787_v26  ;;  %3317 = vmatpush1.bf16.msra.mxu1 %v8340_v47  ;;  %3358 = vmatpush1.bf16.msra.mxu0 %v8342_v48  ;;  %v3036_v25 = vld [vmem:[#allocation10 + $0x730] sm:$0xff]  ;;  %v3037_v26 = vld [vmem:[#allocation10 + $0x738] sm:$0xff]  ;;  %v8366_v47 = vcombine.low %v3416_v21, %v3420_v22 }
 0x2cf   :  { %v1056_v61 = vpop.f32.mrf.mxu1  ;;  %v1097_v62 = vpop.f32.mrf.mxu0  ;;  %3318 = vmatprep.subr.bf16.mxu1 %v8333_v50  ;;  %3359 = vmatprep.subr.bf16.mxu0 %v8335_v51  ;;  %v8316_v45 = vcombine.low %v3032_v3, %v3036_v25  ;;  %v8318_v16 = vcombine.low %v3033_v6, %v3037_v26  ;;  %v8357_v51 = vcombine.high %v3407_v31, %v3411_v32 }
 0x2d0   :  { %v9823_v4 = vadd.f32 %v1056_v61, %v9789_v29  ;;  %v9826_v5 = vadd.f32 %v1097_v62, %v9791_v30  ;;  %3340 = vmatprep.mubr.bf16.mxu1 %v9509_v44  ;;  %3381 = vmatprep.mubr.bf16.mxu0 %v9509_v44  ;;  %v8317_v29 = vcombine.high %v3032_v3, %v3036_v25  ;;  %v3426_v3 = vld [vmem:[#allocation10 + $0x8d8] sm:$0xff] }
 0x2d1   :  { %v1058_v7 = vpop.f32.mrf.mxu1  ;;  %v1099_v8 = vpop.f32.mrf.mxu0  ;;  %v8319_v30 = vcombine.high %v3033_v6, %v3037_v26  ;;  %v3430_v25 = vld [vmem:[#allocation10 + $0x8f8] sm:$0xff] }
 0x2d2   :  { %3319 = vmatpush1.bf16.msra.mxu1 %v8332_v58  ;;  %3360 = vmatpush1.bf16.msra.mxu0 %v8334_v60  ;;  %v8356_v58 = vcombine.low %v3407_v31, %v3411_v32  ;;  %v8358_v60 = vcombine.low %v3408_v33, %v3412_v34  ;;  %v8379_v8 = vcombine.high %v3426_v3, %v3430_v25  ;;  %v3401_v31 = vld [vmem:[#allocation10 + $0x810] sm:$0xff]  ;;  %v3402_v34 = vld [vmem:[#allocation10 + $0x818] sm:$0xff] }
 0x2d3   :  { %v1059_v13 = vpop.f32.mrf.mxu1  ;;  %v1100_v38 = vpop.f32.mrf.mxu0  ;;  %3320 = vmatprep.subr.bf16.mxu1 %v8325_v1  ;;  %3361 = vmatprep.subr.bf16.mxu0 %v8327_v2  ;;  %v3425_v1 = vld [vmem:[#allocation10 + $0x8d0] sm:$0xff] }
 0x2d4   :  { %v3429_v2 = vld [vmem:[#allocation10 + $0x8f0] sm:$0xff]  ;;  %v3418_v13 = vld [vmem:[#allocation10 + $0x898] sm:$0xff] }
 0x2d5   :  { %v8377_v7 = vcombine.high %v3425_v1, %v3429_v2  ;;  %v3422_v38 = vld [vmem:[#allocation10 + $0x8b8] sm:$0xff] }
 0x2d6   :  { %3321 = vmatpush1.bf16.msra.mxu1 %v8324_v9  ;;  %3362 = vmatpush1.bf16.msra.mxu0 %v8326_v12  ;;  %v3417_v9 = vld [vmem:[#allocation10 + $0x890] sm:$0xff]  ;;  %v8371_v40 = vcombine.high %v3418_v13, %v3422_v38  ;;  %v8370_v22 = vcombine.low %v3418_v13, %v3422_v38 }
 0x2d7   :  { %3322 = vmatprep.subr.bf16.mxu1 %v8317_v29  ;;  %3363 = vmatprep.subr.bf16.mxu0 %v8319_v30  ;;  %v3421_v12 = vld [vmem:[#allocation10 + $0x8b0] sm:$0xff]  ;;  %v8376_v29 = vcombine.low %v3425_v1, %v3429_v2  ;;  %v8378_v30 = vcombine.low %v3426_v3, %v3430_v25  ;;  %v3775_v3 = vld [vmem:[#allocation10 + $0x940] sm:$0xff] }
 0x2d8   :  { %v8369_v39 = vcombine.high %v3417_v9, %v3421_v12  ;;  %v8368_v19 = vcombine.low %v3417_v9, %v3421_v12  ;;  %v3779_v25 = vld [vmem:[#allocation10 + $0x960] sm:$0xff] }
 0x2da   :  { %3323 = vmatpush1.bf16.msra.mxu1 %v8316_v45  ;;  %3364 = vmatpush1.bf16.msra.mxu0 %v8318_v16  ;;  %v3410_v45 = vld [vmem:[#allocation10 + $0x858] sm:$0xff] }
 0x2db   :  { %3602 = vmatprep.subr.bf16.mxu1 %v8373_v17  ;;  %3643 = vmatprep.subr.bf16.mxu0 %v8375_v18  ;;  %v3414_v16 = vld [vmem:[#allocation10 + $0x878] sm:$0xff] }
 0x2dd   :  { %v1136_v35 = vpop.f32.mrf.mxu1  ;;  %v1177_v36 = vpop.f32.mrf.mxu0  ;;  %8346 = vmatmul.mubr.msk.bf16.vlgmr.msra.gmra.mxu1 %vm397_vm4, %v9810_v49  ;;  %8347 = vmatmul.mubr.msk.bf16.vlgmr.msra.gmra.mxu0 %vm397_vm4, %v9810_v49 }
 0x2de   :  { %v9835_v42 = vadd.f32 %v1136_v35, %v9795_v10  ;;  %v9838_v46 = vadd.f32 %v1177_v36, %v9797_v11  ;;  %3603 = vmatpush1.bf16.msra.mxu1 %v8372_v23  ;;  %3644 = vmatpush1.bf16.msra.mxu0 %v8374_v24  ;;  %v3403_v10 = vld [vmem:[#allocation10 + $0x820] sm:$0xff]  ;;  %v3404_v11 = vld [vmem:[#allocation10 + $0x828] sm:$0xff] }
 0x2df   :  { %v1138_v48 = vpop.f32.mrf.mxu1  ;;  %v1179_v50 = vpop.f32.mrf.mxu0  ;;  %3604 = vmatprep.subr.bf16.mxu1 %v8365_v27  ;;  %3645 = vmatprep.subr.bf16.mxu0 %v8367_v28  ;;  %v8348_v6 = vcombine.low %v3399_v53, %v3403_v10  ;;  %v8350_v26 = vcombine.low %v3400_v55, %v3404_v11  ;;  %v8361_v27 = vcombine.high %v3409_v41, %v3413_v43 }
 0x2e0   :  { %v9841_v54 = vadd.f32 %v1138_v48, %v9803_v14  ;;  %v9844_v49 = vadd.f32 %v1179_v50, %v9805_v15  ;;  %3626 = vmatprep.mubr.bf16.mxu1 %v9509_v44  ;;  %3667 = vmatprep.mubr.bf16.mxu0 %v9509_v44  ;;  %v8349_v14 = vcombine.high %v3399_v53, %v3403_v10  ;;  %v3792_v53 = vld [vmem:[#allocation10 + $0x9c8] sm:$0xff] }
 0x2e1   :  { %v1140_v56 = vpop.f32.mrf.mxu1  ;;  %v1181_v57 = vpop.f32.mrf.mxu0  ;;  %v8351_v15 = vcombine.high %v3400_v55, %v3404_v11  ;;  %v8363_v28 = vcombine.high %v3410_v45, %v3414_v16  ;;  %v3796_v10 = vld [vmem:[#allocation10 + $0x9e8] sm:$0xff] }
 0x2e2   :  { %3605 = vmatpush1.bf16.msra.mxu1 %v8364_v37  ;;  %3646 = vmatpush1.bf16.msra.mxu0 %v8366_v47  ;;  %v8360_v37 = vcombine.low %v3409_v41, %v3413_v43  ;;  %v8362_v47 = vcombine.low %v3410_v45, %v3414_v16  ;;  %v8411_v57 = vcombine.high %v3792_v53, %v3796_v10  ;;  %v3767_v41 = vld [vmem:[#allocation10 + $0x900] sm:$0xff]  ;;  %v3768_v16 = vld [vmem:[#allocation10 + $0x908] sm:$0xff] }
 0x2e3   :  { %v1141_v61 = vpop.f32.mrf.mxu1  ;;  %v1182_v62 = vpop.f32.mrf.mxu0  ;;  %3606 = vmatprep.subr.bf16.mxu1 %v8357_v51  ;;  %3647 = vmatprep.subr.bf16.mxu0 %v8359_v52  ;;  %v3791_v51 = vld [vmem:[#allocation10 + $0x9c0] sm:$0xff] }
 0x2e4   :  { %v3795_v52 = vld [vmem:[#allocation10 + $0x9e0] sm:$0xff]  ;;  %v3784_v61 = vld [vmem:[#allocation10 + $0x988] sm:$0xff] }
 0x2e5   :  { %v8409_v56 = vcombine.high %v3791_v51, %v3795_v52  ;;  %v3788_v62 = vld [vmem:[#allocation10 + $0x9a8] sm:$0xff] }
 0x2e6   :  { %3607 = vmatpush1.bf16.msra.mxu1 %v8356_v58  ;;  %3648 = vmatpush1.bf16.msra.mxu0 %v8358_v60  ;;  %v3783_v58 = vld [vmem:[#allocation10 + $0x980] sm:$0xff]  ;;  %v8403_v2 = vcombine.high %v3784_v61, %v3788_v62  ;;  %v8402_v38 = vcombine.low %v3784_v61, %v3788_v62 }
 0x2e7   :  { %3608 = vmatprep.subr.bf16.mxu1 %v8349_v14  ;;  %3649 = vmatprep.subr.bf16.mxu0 %v8351_v15  ;;  %v3787_v60 = vld [vmem:[#allocation10 + $0x9a0] sm:$0xff]  ;;  %v8408_v14 = vcombine.low %v3791_v51, %v3795_v52  ;;  %v8410_v15 = vcombine.low %v3792_v53, %v3796_v10  ;;  %v9885_v51 = vrot.slane %v9713_v0, 1  ;;  %v3777_v10 = vld [vmem:[#allocation10 + $0x950] sm:$0xff] }
 0x2e8   :  { %v8401_v1 = vcombine.high %v3783_v58, %v3787_v60  ;;  %v8400_v9 = vcombine.low %v3783_v58, %v3787_v60 }
 0x2ea   :  { %3609 = vmatpush1.bf16.msra.mxu1 %v8348_v6  ;;  %3650 = vmatpush1.bf16.msra.mxu0 %v8350_v26  ;;  %v3776_v6 = vld [vmem:[#allocation10 + $0x948] sm:$0xff] }
 0x2eb   :  { %3684 = vmatprep.subr.bf16.mxu1 %v8377_v7  ;;  %3725 = vmatprep.subr.bf16.mxu0 %v8379_v8  ;;  %v3780_v26 = vld [vmem:[#allocation10 + $0x968] sm:$0xff] }
 0x2ed   :  { %v1415_v17 = vpop.f32.mrf.mxu1  ;;  %v1456_v18 = vpop.f32.mrf.mxu0  ;;  %8380 = vmatmul.mubr.msk.bf16.vlgmr.msra.gmra.mxu1 %vm397_vm4, %v9713_v0  ;;  %8381 = vmatmul.mubr.msk.bf16.vlgmr.msra.gmra.mxu0 %vm397_vm4, %v9713_v0 }
 0x2ee   :  { %v9853_v20 = vadd.f32 %v1415_v17, %v9817_v63  ;;  %v9856_v21 = vadd.f32 %v1456_v18, %v9820_v59  ;;  %3685 = vmatpush1.bf16.msra.mxu1 %v8376_v29  ;;  %3726 = vmatpush1.bf16.msra.mxu0 %v8378_v30  ;;  %v3405_v63 = vld [vmem:[#allocation10 + $0x830] sm:$0xff]  ;;  %v3406_v59 = vld [vmem:[#allocation10 + $0x838] sm:$0xff] }
 0x2ef   :  { %v1417_v23 = vpop.f32.mrf.mxu1  ;;  %v1458_v24 = vpop.f32.mrf.mxu0  ;;  %3686 = vmatprep.subr.bf16.mxu1 %v8369_v39  ;;  %3727 = vmatprep.subr.bf16.mxu0 %v8371_v40  ;;  %v8352_v55 = vcombine.low %v3401_v31, %v3405_v63  ;;  %v8354_v11 = vcombine.low %v3402_v34, %v3406_v59  ;;  %v8393_v39 = vcombine.high %v3775_v3, %v3779_v25 }
 0x2f0   :  { %v9859_v32 = vadd.f32 %v1417_v23, %v9823_v4  ;;  %v9862_v33 = vadd.f32 %v1458_v24, %v9826_v5  ;;  %3708 = vmatprep.mubr.bf16.mxu1 %v9509_v44  ;;  %3749 = vmatprep.mubr.bf16.mxu0 %v9509_v44  ;;  %v8353_v4 = vcombine.high %v3401_v31, %v3405_v63  ;;  %v3794_v31 = vld [vmem:[#allocation10 + $0x9d8] sm:$0xff] }
 0x2f1   :  { %v1419_v35 = vpop.f32.mrf.mxu1  ;;  %v1460_v36 = vpop.f32.mrf.mxu0  ;;  %v8355_v5 = vcombine.high %v3402_v34, %v3406_v59  ;;  %v8395_v40 = vcombine.high %v3776_v6, %v3780_v26  ;;  %v3798_v63 = vld [vmem:[#allocation10 + $0x9f8] sm:$0xff] }
 0x2f2   :  { %3687 = vmatpush1.bf16.msra.mxu1 %v8368_v19  ;;  %3728 = vmatpush1.bf16.msra.mxu0 %v8370_v22  ;;  %v8392_v19 = vcombine.low %v3775_v3, %v3779_v25  ;;  %v8394_v22 = vcombine.low %v3776_v6, %v3780_v26  ;;  %v8415_v36 = vcombine.high %v3794_v31, %v3798_v63  ;;  %v3769_v25 = vld [vmem:[#allocation10 + $0x910] sm:$0xff] }
 0x2f3   :  { %v1420_v48 = vpop.f32.mrf.mxu1  ;;  %v1461_v50 = vpop.f32.mrf.mxu0  ;;  %3688 = vmatprep.subr.bf16.mxu1 %v8361_v27  ;;  %3729 = vmatprep.subr.bf16.mxu0 %v8363_v28  ;;  %v3793_v27 = vld [vmem:[#allocation10 + $0x9d0] sm:$0xff] }
 0x2f4   :  { %v3797_v28 = vld [vmem:[#allocation10 + $0x9f0] sm:$0xff]  ;;  %v3786_v48 = vld [vmem:[#allocation10 + $0x998] sm:$0xff] }
 0x2f5   :  { %v8413_v35 = vcombine.high %v3793_v27, %v3797_v28  ;;  %v3790_v50 = vld [vmem:[#allocation10 + $0x9b8] sm:$0xff]  ;;  %v3773_v26 = vld [vmem:[#allocation10 + $0x930] sm:$0xff] }
 0x2f6   :  { %3689 = vmatpush1.bf16.msra.mxu1 %v8360_v37  ;;  %3730 = vmatpush1.bf16.msra.mxu0 %v8362_v47  ;;  %v3785_v37 = vld [vmem:[#allocation10 + $0x990] sm:$0xff]  ;;  %v8407_v53 = vcombine.high %v3786_v48, %v3790_v50 }
 0x2f7   :  { %3690 = vmatprep.subr.bf16.mxu1 %v8353_v4  ;;  %3731 = vmatprep.subr.bf16.mxu0 %v8355_v5  ;;  %v3789_v47 = vld [vmem:[#allocation10 + $0x9b0] sm:$0xff]  ;;  %v8412_v4 = vcombine.low %v3793_v27, %v3797_v28  ;;  %v8414_v5 = vcombine.low %v3794_v31, %v3798_v63  ;;  %v4145_v63 = vld [vmem:[#allocation10 + $0xa40] sm:$0xff] }
 0x2f8   :  { %v8405_v52 = vcombine.high %v3785_v37, %v3789_v47  ;;  %v8404_v60 = vcombine.low %v3785_v37, %v3789_v47 }
 0x2fa   :  { %3691 = vmatpush1.bf16.msra.mxu1 %v8352_v55  ;;  %3732 = vmatpush1.bf16.msra.mxu0 %v8354_v11  ;;  %v3781_v55 = vld [vmem:[#allocation10 + $0x970] sm:$0xff]  ;;  %v3778_v11 = vld [vmem:[#allocation10 + $0x958] sm:$0xff] }
 0x2fb   :  { %3972 = vmatprep.subr.bf16.mxu1 %v8409_v56  ;;  %4013 = vmatprep.subr.bf16.mxu0 %v8411_v57  ;;  %v3782_v56 = vld [vmem:[#allocation10 + $0x978] sm:$0xff] }
 0x2fc   :  { %v8399_v3 = vcombine.high %v3778_v11, %v3782_v56 }
 0x2fd   :  { %v1497_v7 = vpop.f32.mrf.mxu1  ;;  %v1538_v8 = vpop.f32.mrf.mxu0  ;;  %8382 = vmatmul.mubr.msk.bf16.vlgmr.msra.gmra.mxu1 %vm397_vm4, %v9713_v0  ;;  %8383 = vmatmul.mubr.msk.bf16.vlgmr.msra.gmra.mxu0 %vm397_vm4, %v9713_v0 }
 0x2fe   :  { %v9871_v12 = vadd.f32 %v1497_v7, %v9835_v42  ;;  %v9874_v13 = vadd.f32 %v1538_v8, %v9838_v46  ;;  %3973 = vmatpush1.bf16.msra.mxu1 %v8408_v14  ;;  %4014 = vmatpush1.bf16.msra.mxu0 %v8410_v15  ;;  %v3771_v42 = vld [vmem:[#allocation10 + $0x920] sm:$0xff]  ;;  %v3772_v46 = vld [vmem:[#allocation10 + $0x928] sm:$0xff]  ;;  %v8406_v14 = vcombine.low %v3786_v48, %v3790_v50  ;;  %v3774_v7 = vld [vmem:[#allocation10 + $0x938] sm:$0xff] }
 0x2ff   :  { %v1499_v29 = vpop.f32.mrf.mxu1  ;;  %v1540_v30 = vpop.f32.mrf.mxu0  ;;  %3974 = vmatprep.subr.bf16.mxu1 %v8401_v1  ;;  %4015 = vmatprep.subr.bf16.mxu0 %v8403_v2  ;;  %v8384_v34 = vcombine.low %v3767_v41, %v3771_v42  ;;  %v8386_v59 = vcombine.low %v3768_v16, %v3772_v46  ;;  %v8397_v2 = vcombine.high %v3777_v10, %v3781_v55 }
 0x300   :  { %v9877_v43 = vadd.f32 %v1499_v29, %v9841_v54  ;;  %v9880_v45 = vadd.f32 %v1540_v30, %v9844_v49  ;;  %3996 = vmatprep.mubr.bf16.mxu1 %v9509_v44  ;;  %4037 = vmatprep.mubr.bf16.mxu0 %v9509_v44  ;;  %v8385_v54 = vcombine.high %v3767_v41, %v3771_v42  ;;  %v4165_v41 = vld [vmem:[#allocation10 + $0xae0] sm:$0xff]  ;;  %v4162_v42 = vld [vmem:[#allocation10 + $0xac8] sm:$0xff] }
 0x301   :  { %v1501_v17 = vpop.f32.mrf.mxu1  ;;  %v1542_v18 = vpop.f32.mrf.mxu0  ;;  %v8387_v49 = vcombine.high %v3768_v16, %v3772_v46  ;;  %v4166_v16 = vld [vmem:[#allocation10 + $0xae8] sm:$0xff]  ;;  %v8388_v46 = vcombine.low %v3769_v25, %v3773_v26 }
 0x302   :  { %3975 = vmatpush1.bf16.msra.mxu1 %v8400_v9  ;;  %4016 = vmatpush1.bf16.msra.mxu0 %v8402_v38  ;;  %v8396_v9 = vcombine.low %v3777_v10, %v3781_v55  ;;  %v8398_v38 = vcombine.low %v3778_v11, %v3782_v56  ;;  %v8446_v27 = vcombine.low %v4162_v42, %v4166_v16  ;;  %v4137_v55 = vld [vmem:[#allocation10 + $0xa00] sm:$0xff]  ;;  %v4138_v56 = vld [vmem:[#allocation10 + $0xa08] sm:$0xff] }
 0x303   :  { %v1502_v23 = vpop.f32.mrf.mxu1  ;;  %v1543_v24 = vpop.f32.mrf.mxu0  ;;  %3976 = vmatprep.subr.bf16.mxu1 %v8393_v39  ;;  %4017 = vmatprep.subr.bf16.mxu0 %v8395_v40  ;;  %v8389_v39 = vcombine.high %v3769_v25, %v3773_v26  ;;  %v4161_v40 = vld [vmem:[#allocation10 + $0xac0] sm:$0xff]  ;;  %v4167_v25 = vld [vmem:[#allocation10 + $0xaf0] sm:$0xff]  ;;  %v4164_v26 = vld [vmem:[#allocation10 + $0xad8] sm:$0xff] }
 0x304   :  { %v8445_v18 = vcombine.high %v4161_v40, %v4165_v41  ;;  %v4157_v23 = vld [vmem:[#allocation10 + $0xaa0] sm:$0xff]  ;;  %v4154_v24 = vld [vmem:[#allocation10 + $0xa88] sm:$0xff] }
 0x306   :  { %3977 = vmatpush1.bf16.msra.mxu1 %v8392_v19  ;;  %4018 = vmatpush1.bf16.msra.mxu0 %v8394_v22  ;;  %v8447_v19 = vcombine.high %v4162_v42, %v4166_v16  ;;  %v4153_v22 = vld [vmem:[#allocation10 + $0xa80] sm:$0xff] }
 0x307   :  { %3978 = vmatprep.subr.bf16.mxu1 %v8385_v54  ;;  %4019 = vmatprep.subr.bf16.mxu0 %v8387_v49  ;;  %v4158_v54 = vld [vmem:[#allocation10 + $0xaa8] sm:$0xff]  ;;  %v8444_v49 = vcombine.low %v4161_v40, %v4165_v41  ;;  %v8437_v28 = vcombine.high %v4153_v22, %v4157_v23  ;;  %v8436_v47 = vcombine.low %v4153_v22, %v4157_v23  ;;  %v9923_v41 = vrot.slane %v9713_v0, 2 }
 0x308   :  { %v8439_v31 = vcombine.high %v4154_v24, %v4158_v54 }
 0x30a   :  { %3979 = vmatpush1.bf16.msra.mxu1 %v8384_v34  ;;  %4020 = vmatpush1.bf16.msra.mxu0 %v8386_v59  ;;  %v4149_v34 = vld [vmem:[#allocation10 + $0xa60] sm:$0xff]  ;;  %v4146_v59 = vld [vmem:[#allocation10 + $0xa48] sm:$0xff] }
 0x30b   :  { %4054 = vmatprep.subr.bf16.mxu1 %v8413_v35  ;;  %4095 = vmatprep.subr.bf16.mxu0 %v8415_v36  ;;  %v4150_v35 = vld [vmem:[#allocation10 + $0xa68] sm:$0xff] }
 0x30c   :  { %v8431_v10 = vcombine.high %v4146_v59, %v4150_v35 }
 0x30d   :  { %v1784_v57 = vpop.f32.mrf.mxu1  ;;  %v1825_v58 = vpop.f32.mrf.mxu0  ;;  %8416 = vmatmul.mubr.msk.bf16.vlgmr.msra.gmra.mxu1 %vm397_vm4, %v9885_v51  ;;  %8417 = vmatmul.mubr.msk.bf16.vlgmr.msra.gmra.mxu0 %vm397_vm4, %v9885_v51 }
 0x30e   :  { %v9892_v61 = vadd.f32 %v1784_v57, %v9853_v20  ;;  %v9895_v62 = vadd.f32 %v1825_v58, %v9856_v21  ;;  %4055 = vmatpush1.bf16.msra.mxu1 %v8412_v4  ;;  %4096 = vmatpush1.bf16.msra.mxu0 %v8414_v5  ;;  %v3770_v20 = vld [vmem:[#allocation10 + $0x918] sm:$0xff]  ;;  %v8438_v4 = vcombine.low %v4154_v24, %v4158_v54 }
 0x30f   :  { %v1786_v15 = vpop.f32.mrf.mxu1  ;;  %v9897_v1 = vpop.f32.mrf.mxu0  ;;  %4056 = vmatprep.subr.bf16.mxu1 %v8405_v52  ;;  %4097 = vmatprep.subr.bf16.mxu0 %v8407_v53  ;;  %v8390_v17 = vcombine.low %v3770_v20, %v3774_v7  ;;  %v8429_v53 = vcombine.high %v4145_v63, %v4149_v34 }
 0x310   :  { %v9900_v6 = vadd.f32 %v1786_v15, %v9859_v32  ;;  %4078 = vmatprep.mubr.bf16.mxu1 %v9509_v44  ;;  %4119 = vmatprep.mubr.bf16.mxu0 %v9509_v44  ;;  %v8391_v32 = vcombine.high %v3770_v20, %v3774_v7  ;;  %v4168_v20 = vld [vmem:[#allocation10 + $0xaf8] sm:$0xff] }
 0x311   :  { %v1788_v21 = vpop.f32.mrf.mxu1  ;;  %v1829_v8 = vpop.f32.mrf.mxu0  ;;  %v8450_v40 = vcombine.low %v4164_v26, %v4168_v20 }
 0x312   :  { %4057 = vmatpush1.bf16.msra.mxu1 %v8404_v60  ;;  %4098 = vmatpush1.bf16.msra.mxu0 %v8406_v14  ;;  %v8428_v60 = vcombine.low %v4145_v63, %v4149_v34  ;;  %v8430_v14 = vcombine.low %v4146_v59, %v4150_v35  ;;  %v4139_v35 = vld [vmem:[#allocation10 + $0xa10] sm:$0xff] }
 0x313   :  { %v1789_v29 = vpop.f32.mrf.mxu1  ;;  %v1830_v30 = vpop.f32.mrf.mxu0  ;;  %4058 = vmatprep.subr.bf16.mxu1 %v8397_v2  ;;  %4099 = vmatprep.subr.bf16.mxu0 %v8399_v3  ;;  %v4163_v3 = vld [vmem:[#allocation10 + $0xad0] sm:$0xff] }
 0x314   :  { %v8449_v8 = vcombine.high %v4163_v3, %v4167_v25  ;;  %v4159_v29 = vld [vmem:[#allocation10 + $0xab0] sm:$0xff]  ;;  %v4156_v30 = vld [vmem:[#allocation10 + $0xa98] sm:$0xff] }
 0x316   :  { %4059 = vmatpush1.bf16.msra.mxu1 %v8396_v9  ;;  %4100 = vmatpush1.bf16.msra.mxu0 %v8398_v38  ;;  %v8451_v9 = vcombine.high %v4164_v26, %v4168_v20  ;;  %v4155_v38 = vld [vmem:[#allocation10 + $0xa90] sm:$0xff] }
 0x317   :  { %4060 = vmatprep.subr.bf16.mxu1 %v8389_v39  ;;  %4101 = vmatprep.subr.bf16.mxu0 %v8391_v32  ;;  %v4160_v39 = vld [vmem:[#allocation10 + $0xab8] sm:$0xff]  ;;  %v8448_v32 = vcombine.low %v4163_v3, %v4167_v25  ;;  %v8441_v42 = vcombine.high %v4155_v38, %v4159_v29  ;;  %v8440_v24 = vcombine.low %v4155_v38, %v4159_v29 }
 0x318   :  { %v8443_v16 = vcombine.high %v4156_v30, %v4160_v39  ;;  %v8442_v54 = vcombine.low %v4156_v30, %v4160_v39 }
 0x31a   :  { %4061 = vmatpush1.bf16.msra.mxu1 %v8388_v46  ;;  %4102 = vmatpush1.bf16.msra.mxu0 %v8390_v17  ;;  %v4147_v46 = vld [vmem:[#allocation10 + $0xa50] sm:$0xff] }
 0x31b   :  { %4341 = vmatprep.subr.bf16.mxu1 %v8445_v18  ;;  %4382 = vmatprep.subr.bf16.mxu0 %v8447_v19  ;;  %v4151_v17 = vld [vmem:[#allocation10 + $0xa70] sm:$0xff]  ;;  %v4148_v18 = vld [vmem:[#allocation10 + $0xa58] sm:$0xff] }
 0x31c   :  { %v4152_v19 = vld [vmem:[#allocation10 + $0xa78] sm:$0xff]  ;;  %v8433_v34 = vcombine.high %v4147_v46, %v4151_v17 }
 0x31d   :  { %v1866_v36 = vpop.f32.mrf.mxu1  ;;  %v1907_v37 = vpop.f32.mrf.mxu0  ;;  %8418 = vmatmul.mubr.msk.bf16.vlgmr.msra.gmra.mxu1 %vm397_vm4, %v9885_v51  ;;  %8419 = vmatmul.mubr.msk.bf16.vlgmr.msra.gmra.mxu0 %vm397_vm4, %v9885_v51  ;;  %v8435_v59 = vcombine.high %v4148_v18, %v4152_v19 }
 0x31e   :  { %v9909_v48 = vadd.f32 %v1866_v36, %v9871_v12  ;;  %v9912_v50 = vadd.f32 %v1907_v37, %v9874_v13  ;;  %4342 = vmatpush1.bf16.msra.mxu1 %v8444_v49  ;;  %4383 = vmatpush1.bf16.msra.mxu0 %v8446_v27  ;;  %v4141_v12 = vld [vmem:[#allocation10 + $0xa20] sm:$0xff]  ;;  %v4142_v13 = vld [vmem:[#allocation10 + $0xa28] sm:$0xff]  ;;  %v1917_v49 = vadd.f32 %v9897_v1, %v9862_v33  ;;  %v4143_v33 = vld [vmem:[#allocation10 + $0xa30] sm:$0xff] }
 0x31f   :  { %v1868_v5 = vpop.f32.mrf.mxu1  ;;  %v1909_v52 = vpop.f32.mrf.mxu0  ;;  %4343 = vmatprep.subr.bf16.mxu1 %v8437_v28  ;;  %4384 = vmatprep.subr.bf16.mxu0 %v8439_v31  ;;  %v8420_v7 = vcombine.low %v4137_v55, %v4141_v12  ;;  %v8422_v21 = vcombine.low %v4138_v56, %v4142_v13  ;;  %v4144_v1 = vld [vmem:[#allocation10 + $0xa38] sm:$0xff] }
 0x320   :  { %v9915_v11 = vadd.f32 %v1868_v5, %v9877_v43  ;;  %v9918_v51 = vadd.f32 %v1909_v52, %v9880_v45  ;;  %4365 = vmatprep.mubr.bf16.mxu1 %v9509_v44  ;;  %4406 = vmatprep.mubr.bf16.mxu0 %v9509_v44  ;;  %v8421_v43 = vcombine.high %v4137_v55, %v4141_v12  ;;  %v4530_v55 = vld [vmem:[#allocation10 + $0xbc0] sm:$0xff] }
 0x321   :  { %v1870_v57 = vpop.f32.mrf.mxu1  ;;  %v1911_v58 = vpop.f32.mrf.mxu0  ;;  %v8423_v45 = vcombine.high %v4138_v56, %v4142_v13  ;;  %v8434_v5 = vcombine.low %v4148_v18, %v4152_v19  ;;  %v4534_v12 = vld [vmem:[#allocation10 + $0xbe0] sm:$0xff]  ;;  %v4531_v56 = vld [vmem:[#allocation10 + $0xbc8] sm:$0xff] }
 0x322   :  { %4344 = vmatpush1.bf16.msra.mxu1 %v8436_v47  ;;  %4385 = vmatpush1.bf16.msra.mxu0 %v8438_v4  ;;  %v8432_v4 = vcombine.low %v4147_v46, %v4151_v17  ;;  %v4535_v13 = vld [vmem:[#allocation10 + $0xbe8] sm:$0xff]  ;;  %v8424_v57 = vcombine.low %v4139_v35, %v4143_v33  ;;  %v8480_v3 = vcombine.low %v4530_v55, %v4534_v12  ;;  %v4506_v18 = vld [vmem:[#allocation10 + $0xb00] sm:$0xff] }
 0x323   :  { %v1871_v15 = vpop.f32.mrf.mxu1  ;;  %v1912_v2 = vpop.f32.mrf.mxu0  ;;  %4345 = vmatprep.subr.bf16.mxu1 %v8429_v53  ;;  %4386 = vmatprep.subr.bf16.mxu0 %v8431_v10  ;;  %v8482_v25 = vcombine.low %v4531_v56, %v4535_v13 }
 0x324   :  { %v4522_v15 = vld [vmem:[#allocation10 + $0xb80] sm:$0xff] }
 0x325   :  { %v4526_v2 = vld [vmem:[#allocation10 + $0xba0] sm:$0xff] }
 0x326   :  { %4346 = vmatpush1.bf16.msra.mxu1 %v8428_v60  ;;  %4387 = vmatpush1.bf16.msra.mxu0 %v8430_v14  ;;  %v8481_v60 = vcombine.high %v4530_v55, %v4534_v12  ;;  %v8483_v14 = vcombine.high %v4531_v56, %v4535_v13  ;;  %v8473_v26 = vcombine.high %v4522_v15, %v4526_v2  ;;  %v9963_v55 = vrot.slane %v9713_v0, 3  ;;  %v4516_v13 = vld [vmem:[#allocation10 + $0xb50] sm:$0xff] }
 0x327   :  { %4347 = vmatprep.subr.bf16.mxu1 %v8421_v43  ;;  %4388 = vmatprep.subr.bf16.mxu0 %v8423_v45  ;;  %v4523_v43 = vld [vmem:[#allocation10 + $0xb88] sm:$0xff]  ;;  %v8472_v30 = vcombine.low %v4522_v15, %v4526_v2 }
 0x328   :  { %v4527_v45 = vld [vmem:[#allocation10 + $0xba8] sm:$0xff] }
 0x329   :  { %v8475_v20 = vcombine.high %v4523_v43, %v4527_v45 }
 0x32a   :  { %4348 = vmatpush1.bf16.msra.mxu1 %v8420_v7  ;;  %4389 = vmatpush1.bf16.msra.mxu0 %v8422_v21  ;;  %v4514_v7 = vld [vmem:[#allocation10 + $0xb40] sm:$0xff] }
 0x32b   :  { %4423 = vmatprep.subr.bf16.mxu1 %v8449_v8  ;;  %4464 = vmatprep.subr.bf16.mxu0 %v8451_v9  ;;  %v4518_v21 = vld [vmem:[#allocation10 + $0xb60] sm:$0xff]  ;;  %v4515_v8 = vld [vmem:[#allocation10 + $0xb48] sm:$0xff] }
 0x32c   :  { %v4519_v9 = vld [vmem:[#allocation10 + $0xb68] sm:$0xff]  ;;  %v8465_v46 = vcombine.high %v4514_v7, %v4518_v21 }
 0x32d   :  { %v2153_v22 = vpop.f32.mrf.mxu1  ;;  %v2194_v23 = vpop.f32.mrf.mxu0  ;;  %8452 = vmatmul.mubr.msk.bf16.vlgmr.msra.gmra.mxu1 %vm397_vm4, %v9923_v41  ;;  %8453 = vmatmul.mubr.msk.bf16.vlgmr.msra.gmra.mxu0 %vm397_vm4, %v9923_v41  ;;  %v8467_v17 = vcombine.high %v4515_v8, %v4519_v9 }
 0x32e   :  { %v9932_v27 = vadd.f32 %v2153_v22, %v9892_v61  ;;  %v9935_v28 = vadd.f32 %v2194_v23, %v9895_v62  ;;  %4424 = vmatpush1.bf16.msra.mxu1 %v8448_v32  ;;  %4465 = vmatpush1.bf16.msra.mxu0 %v8450_v40  ;;  %v4140_v61 = vld [vmem:[#allocation10 + $0xa18] sm:$0xff]  ;;  %v8474_v40 = vcombine.low %v4523_v43, %v4527_v45  ;;  %v4507_v22 = vld [vmem:[#allocation10 + $0xb08] sm:$0xff] }
 0x32f   :  { %v2155_v31 = vpop.f32.mrf.mxu1  ;;  %v2196_v63 = vpop.f32.mrf.mxu0  ;;  %4425 = vmatprep.subr.bf16.mxu1 %v8441_v42  ;;  %4466 = vmatprep.subr.bf16.mxu0 %v8443_v16  ;;  %v8427_v10 = vcombine.high %v4140_v61, %v4144_v1  ;;  %v8426_v58 = vcombine.low %v4140_v61, %v4144_v1 }
 0x330   :  { %v9938_v36 = vadd.f32 %v2155_v31, %v9900_v6  ;;  %v9940_v37 = vadd.f32 %v2196_v63, %v1917_v49  ;;  %4447 = vmatprep.mubr.bf16.mxu1 %v9509_v44  ;;  %4488 = vmatprep.mubr.bf16.mxu0 %v9509_v44  ;;  %v8425_v6 = vcombine.high %v4139_v35, %v4143_v33  ;;  %v4533_v35 = vld [vmem:[#allocation10 + $0xbd8] sm:$0xff] }
 0x331   :  { %v2157_v62 = vpop.f32.mrf.mxu1  ;;  %v2198_v47 = vpop.f32.mrf.mxu0  ;;  %v8466_v49 = vcombine.low %v4515_v8, %v4519_v9  ;;  %v4537_v33 = vld [vmem:[#allocation10 + $0xbf8] sm:$0xff] }
 0x332   :  { %4426 = vmatpush1.bf16.msra.mxu1 %v8440_v24  ;;  %4467 = vmatpush1.bf16.msra.mxu0 %v8442_v54  ;;  %v8464_v54 = vcombine.low %v4514_v7, %v4518_v21  ;;  %v8487_v47 = vcombine.high %v4533_v35, %v4537_v33  ;;  %v4508_v21 = vld [vmem:[#allocation10 + $0xb10] sm:$0xff] }
 0x333   :  { %v2158_v52 = vpop.f32.mrf.mxu1  ;;  %v2199_v53 = vpop.f32.mrf.mxu0  ;;  %4427 = vmatprep.subr.bf16.mxu1 %v8433_v34  ;;  %4468 = vmatprep.subr.bf16.mxu0 %v8435_v59  ;;  %v4532_v34 = vld [vmem:[#allocation10 + $0xbd0] sm:$0xff] }
 0x334   :  { %v4536_v59 = vld [vmem:[#allocation10 + $0xbf0] sm:$0xff]  ;;  %v4525_v52 = vld [vmem:[#allocation10 + $0xb98] sm:$0xff] }
 0x335   :  { %v8485_v62 = vcombine.high %v4532_v34, %v4536_v59  ;;  %v4529_v53 = vld [vmem:[#allocation10 + $0xbb8] sm:$0xff] }
 0x336   :  { %4428 = vmatpush1.bf16.msra.mxu1 %v8432_v4  ;;  %4469 = vmatpush1.bf16.msra.mxu0 %v8434_v5  ;;  %v4524_v4 = vld [vmem:[#allocation10 + $0xb90] sm:$0xff]  ;;  %v8479_v56 = vcombine.high %v4525_v52, %v4529_v53 }
 0x337   :  { %4429 = vmatprep.subr.bf16.mxu1 %v8425_v6  ;;  %4470 = vmatprep.subr.bf16.mxu0 %v8427_v10  ;;  %v4528_v5 = vld [vmem:[#allocation10 + $0xbb0] sm:$0xff]  ;;  %v8484_v6 = vcombine.low %v4532_v34, %v4536_v59  ;;  %v8486_v10 = vcombine.low %v4533_v35, %v4537_v33  ;;  %v4883_v33 = vld [vmem:[#allocation10 + $0xc40] sm:$0xff] }
 0x338   :  { %v8477_v12 = vcombine.high %v4524_v4, %v4528_v5  ;;  %v8476_v2 = vcombine.low %v4524_v4, %v4528_v5 }
 0x33a   :  { %4430 = vmatpush1.bf16.msra.mxu1 %v8424_v57  ;;  %4471 = vmatpush1.bf16.msra.mxu0 %v8426_v58  ;;  %v4520_v57 = vld [vmem:[#allocation10 + $0xb70] sm:$0xff]  ;;  %v4517_v58 = vld [vmem:[#allocation10 + $0xb58] sm:$0xff] }
 0x33b   :  { %4710 = vmatprep.subr.bf16.mxu1 %v8481_v60  ;;  %4751 = vmatprep.subr.bf16.mxu0 %v8483_v14  ;;  %v4521_v60 = vld [vmem:[#allocation10 + $0xb78] sm:$0xff] }
 0x33c   :  { %v8471_v7 = vcombine.high %v4517_v58, %v4521_v60 }
 0x33d   :  { %v2235_v38 = vpop.f32.mrf.mxu1  ;;  %v2276_v29 = vpop.f32.mrf.mxu0  ;;  %8454 = vmatmul.mubr.msk.bf16.vlgmr.msra.gmra.mxu1 %vm397_vm4, %v9923_v41  ;;  %8455 = vmatmul.mubr.msk.bf16.vlgmr.msra.gmra.mxu0 %vm397_vm4, %v9923_v41 }
 0x33e   :  { %v9949_v39 = vadd.f32 %v2235_v38, %v9909_v48  ;;  %v9952_v32 = vadd.f32 %v2276_v29, %v9912_v50  ;;  %4711 = vmatpush1.bf16.msra.mxu1 %v8480_v3  ;;  %4752 = vmatpush1.bf16.msra.mxu0 %v8482_v25  ;;  %v4510_v48 = vld [vmem:[#allocation10 + $0xb20] sm:$0xff]  ;;  %v4511_v50 = vld [vmem:[#allocation10 + $0xb28] sm:$0xff]  ;;  %v8478_v3 = vcombine.low %v4525_v52, %v4529_v53  ;;  %v4509_v38 = vld [vmem:[#allocation10 + $0xb18] sm:$0xff] }
 0x33f   :  { %v2237_v42 = vpop.f32.mrf.mxu1  ;;  %v2278_v16 = vpop.f32.mrf.mxu0  ;;  %4712 = vmatprep.subr.bf16.mxu1 %v8473_v26  ;;  %4753 = vmatprep.subr.bf16.mxu0 %v8475_v20  ;;  %v8456_v61 = vcombine.low %v4506_v18, %v4510_v48  ;;  %v8458_v1 = vcombine.low %v4507_v22, %v4511_v50  ;;  %v8469_v20 = vcombine.high %v4516_v13, %v4520_v57 }
 0x340   :  { %v9955_v19 = vadd.f32 %v2237_v42, %v9915_v11  ;;  %v9958_v41 = vadd.f32 %v2278_v16, %v9918_v51  ;;  %4734 = vmatprep.mubr.bf16.mxu1 %v9509_v44  ;;  %4775 = vmatprep.mubr.bf16.mxu0 %v9509_v44  ;;  %v8457_v11 = vcombine.high %v4506_v18, %v4510_v48  ;;  %v4903_v18 = vld [vmem:[#allocation10 + $0xce0] sm:$0xff]  ;;  %v4900_v48 = vld [vmem:[#allocation10 + $0xcc8] sm:$0xff] }
 0x341   :  { %v2239_v23 = vpop.f32.mrf.mxu1  ;;  %v2280_v24 = vpop.f32.mrf.mxu0  ;;  %v8459_v51 = vcombine.high %v4507_v22, %v4511_v50  ;;  %v8470_v42 = vcombine.low %v4517_v58, %v4521_v60  ;;  %v4904_v22 = vld [vmem:[#allocation10 + $0xce8] sm:$0xff] }
 0x342   :  { %4713 = vmatpush1.bf16.msra.mxu1 %v8472_v30  ;;  %4754 = vmatpush1.bf16.msra.mxu0 %v8474_v40  ;;  %v8468_v40 = vcombine.low %v4516_v13, %v4520_v57  ;;  %v8518_v34 = vcombine.low %v4900_v48, %v4904_v22  ;;  %v4875_v57 = vld [vmem:[#allocation10 + $0xc00] sm:$0xff]  ;;  %v4876_v60 = vld [vmem:[#allocation10 + $0xc08] sm:$0xff] }
 0x343   :  { %v2240_v31 = vpop.f32.mrf.mxu1  ;;  %v2281_v63 = vpop.f32.mrf.mxu0  ;;  %4714 = vmatprep.subr.bf16.mxu1 %v8465_v46  ;;  %4755 = vmatprep.subr.bf16.mxu0 %v8467_v17  ;;  %v4899_v17 = vld [vmem:[#allocation10 + $0xcc0] sm:$0xff] }
 0x344   :  { %v8517_v24 = vcombine.high %v4899_v17, %v4903_v18  ;;  %v4895_v31 = vld [vmem:[#allocation10 + $0xca0] sm:$0xff]  ;;  %v4892_v63 = vld [vmem:[#allocation10 + $0xc88] sm:$0xff] }
 0x346   :  { %4715 = vmatpush1.bf16.msra.mxu1 %v8464_v54  ;;  %4756 = vmatpush1.bf16.msra.mxu0 %v8466_v49  ;;  %v8519_v54 = vcombine.high %v4900_v48, %v4904_v22  ;;  %v4891_v49 = vld [vmem:[#allocation10 + $0xc80] sm:$0xff]  ;;  %v4885_v22 = vld [vmem:[#allocation10 + $0xc50] sm:$0xff] }
 0x347   :  { %4716 = vmatprep.subr.bf16.mxu1 %v8457_v11  ;;  %4757 = vmatprep.subr.bf16.mxu0 %v8459_v51  ;;  %v4896_v11 = vld [vmem:[#allocation10 + $0xca8] sm:$0xff]  ;;  %v8516_v51 = vcombine.low %v4899_v17, %v4903_v18  ;;  %v8509_v59 = vcombine.high %v4891_v49, %v4895_v31  ;;  %v8508_v5 = vcombine.low %v4891_v49, %v4895_v31  ;;  %v10002_v17 = vrot.slane %v9713_v0, 4 }
 0x348   :  { %v8511_v35 = vcombine.high %v4892_v63, %v4896_v11 }
 0x34a   :  { %4717 = vmatpush1.bf16.msra.mxu1 %v8456_v61  ;;  %4758 = vmatpush1.bf16.msra.mxu0 %v8458_v1  ;;  %v4887_v61 = vld [vmem:[#allocation10 + $0xc60] sm:$0xff]  ;;  %v4884_v1 = vld [vmem:[#allocation10 + $0xc48] sm:$0xff] }
 0x34b   :  { %4792 = vmatprep.subr.bf16.mxu1 %v8485_v62  ;;  %4833 = vmatprep.subr.bf16.mxu0 %v8487_v47  ;;  %v4888_v62 = vld [vmem:[#allocation10 + $0xc68] sm:$0xff] }
 0x34c   :  { %v8503_v13 = vcombine.high %v4884_v1, %v4888_v62 }
 0x34d   :  { %v2522_v14 = vpop.f32.mrf.mxu1  ;;  %v2563_v15 = vpop.f32.mrf.mxu0  ;;  %8488 = vmatmul.mubr.msk.bf16.vlgmr.msra.gmra.mxu1 %vm397_vm4, %v9963_v55  ;;  %8489 = vmatmul.mubr.msk.bf16.vlgmr.msra.gmra.mxu0 %vm397_vm4, %v9963_v55 }
 0x34e   :  { %v9970_v43 = vadd.f32 %v2522_v14, %v9932_v27  ;;  %v9973_v45 = vadd.f32 %v2563_v15, %v9935_v28  ;;  %4793 = vmatpush1.bf16.msra.mxu1 %v8484_v6  ;;  %4834 = vmatpush1.bf16.msra.mxu0 %v8486_v10  ;;  %v4512_v27 = vld [vmem:[#allocation10 + $0xb30] sm:$0xff]  ;;  %v4513_v28 = vld [vmem:[#allocation10 + $0xb38] sm:$0xff]  ;;  %v8510_v6 = vcombine.low %v4892_v63, %v4896_v11 }
 0x34f   :  { %v2524_v25 = vpop.f32.mrf.mxu1  ;;  %v2565_v26 = vpop.f32.mrf.mxu0  ;;  %4794 = vmatprep.subr.bf16.mxu1 %v8477_v12  ;;  %4835 = vmatprep.subr.bf16.mxu0 %v8479_v56  ;;  %v8460_v50 = vcombine.low %v4508_v21, %v4512_v27  ;;  %v8462_v23 = vcombine.low %v4509_v38, %v4513_v28  ;;  %v8501_v56 = vcombine.high %v4883_v33, %v4887_v61 }
 0x350   :  { %v9976_v8 = vadd.f32 %v2524_v25, %v9938_v36  ;;  %v9979_v9 = vadd.f32 %v2565_v26, %v9940_v37  ;;  %4816 = vmatprep.mubr.bf16.mxu1 %v9509_v44  ;;  %4857 = vmatprep.mubr.bf16.mxu0 %v9509_v44  ;;  %v8461_v36 = vcombine.high %v4508_v21, %v4512_v27  ;;  %v4902_v21 = vld [vmem:[#allocation10 + $0xcd8] sm:$0xff] }
 0x351   :  { %v2526_v29 = vpop.f32.mrf.mxu1  ;;  %v2567_v30 = vpop.f32.mrf.mxu0  ;;  %v8463_v37 = vcombine.high %v4509_v38, %v4513_v28  ;;  %v4906_v27 = vld [vmem:[#allocation10 + $0xcf8] sm:$0xff] }
 0x352   :  { %4795 = vmatpush1.bf16.msra.mxu1 %v8476_v2  ;;  %4836 = vmatpush1.bf16.msra.mxu0 %v8478_v3  ;;  %v8500_v2 = vcombine.low %v4883_v33, %v4887_v61  ;;  %v8502_v3 = vcombine.low %v4884_v1, %v4888_v62  ;;  %v8523_v30 = vcombine.high %v4902_v21, %v4906_v27  ;;  %v4877_v61 = vld [vmem:[#allocation10 + $0xc10] sm:$0xff] }
 0x353   :  { %v2527_v16 = vpop.f32.mrf.mxu1  ;;  %v2568_v46 = vpop.f32.mrf.mxu0  ;;  %4796 = vmatprep.subr.bf16.mxu1 %v8469_v20  ;;  %4837 = vmatprep.subr.bf16.mxu0 %v8471_v7  ;;  %v4901_v20 = vld [vmem:[#allocation10 + $0xcd0] sm:$0xff] }
 0x354   :  { %v4905_v7 = vld [vmem:[#allocation10 + $0xcf0] sm:$0xff]  ;;  %v4894_v16 = vld [vmem:[#allocation10 + $0xc98] sm:$0xff] }
 0x355   :  { %v8521_v29 = vcombine.high %v4901_v20, %v4905_v7  ;;  %v4898_v46 = vld [vmem:[#allocation10 + $0xcb8] sm:$0xff] }
 0x356   :  { %4797 = vmatpush1.bf16.msra.mxu1 %v8468_v40  ;;  %4838 = vmatpush1.bf16.msra.mxu0 %v8470_v42  ;;  %v4893_v40 = vld [vmem:[#allocation10 + $0xc90] sm:$0xff]  ;;  %v8515_v48 = vcombine.high %v4894_v16, %v4898_v46 }
 0x357   :  { %4798 = vmatprep.subr.bf16.mxu1 %v8461_v36  ;;  %4839 = vmatprep.subr.bf16.mxu0 %v8463_v37  ;;  %v4897_v42 = vld [vmem:[#allocation10 + $0xcb0] sm:$0xff]  ;;  %v8520_v36 = vcombine.low %v4901_v20, %v4905_v7  ;;  %v8522_v37 = vcombine.low %v4902_v21, %v4906_v27  ;;  %v5252_v27 = vld [vmem:[#allocation10 + $0xd40] sm:$0xff] }
 0x358   :  { %v8513_v18 = vcombine.high %v4893_v40, %v4897_v42  ;;  %v8512_v31 = vcombine.low %v4893_v40, %v4897_v42 }
 0x35a   :  { %4799 = vmatpush1.bf16.msra.mxu1 %v8460_v50  ;;  %4840 = vmatpush1.bf16.msra.mxu0 %v8462_v23  ;;  %v4889_v50 = vld [vmem:[#allocation10 + $0xc70] sm:$0xff]  ;;  %v4886_v23 = vld [vmem:[#allocation10 + $0xc58] sm:$0xff] }
 0x35b   :  { %5079 = vmatprep.subr.bf16.mxu1 %v8517_v24  ;;  %5120 = vmatprep.subr.bf16.mxu0 %v8519_v54  ;;  %v4890_v24 = vld [vmem:[#allocation10 + $0xc78] sm:$0xff] }
 0x35c   :  { %v8507_v33 = vcombine.high %v4886_v23, %v4890_v24 }
 0x35d   :  { %v2604_v47 = vpop.f32.mrf.mxu1  ;;  %v2645_v4 = vpop.f32.mrf.mxu0  ;;  %8490 = vmatmul.mubr.msk.bf16.vlgmr.msra.gmra.mxu1 %vm397_vm4, %v9963_v55  ;;  %8491 = vmatmul.mubr.msk.bf16.vlgmr.msra.gmra.mxu0 %vm397_vm4, %v9963_v55 }
 0x35e   :  { %v9988_v52 = vadd.f32 %v2604_v47, %v9949_v39  ;;  %v9991_v53 = vadd.f32 %v2645_v4, %v9952_v32  ;;  %5080 = vmatpush1.bf16.msra.mxu1 %v8516_v51  ;;  %5121 = vmatpush1.bf16.msra.mxu0 %v8518_v34  ;;  %v4879_v39 = vld [vmem:[#allocation10 + $0xc20] sm:$0xff]  ;;  %v4880_v32 = vld [vmem:[#allocation10 + $0xc28] sm:$0xff]  ;;  %v8514_v51 = vcombine.low %v4894_v16, %v4898_v46  ;;  %v4878_v47 = vld [vmem:[#allocation10 + $0xc18] sm:$0xff] }
 0x35f   :  { %v2606_v10 = vpop.f32.mrf.mxu1  ;;  %v2647_v12 = vpop.f32.mrf.mxu0  ;;  %5081 = vmatprep.subr.bf16.mxu1 %v8509_v59  ;;  %5122 = vmatprep.subr.bf16.mxu0 %v8511_v35  ;;  %v8492_v38 = vcombine.low %v4875_v57, %v4879_v39  ;;  %v8494_v28 = vcombine.low %v4876_v60, %v4880_v32  ;;  %v8505_v35 = vcombine.high %v4885_v22, %v4889_v50 }
 0x360   :  { %v9994_v58 = vadd.f32 %v2606_v10, %v9955_v19  ;;  %v9997_v55 = vadd.f32 %v2647_v12, %v9958_v41  ;;  %5103 = vmatprep.mubr.bf16.mxu1 %v9509_v44  ;;  %5144 = vmatprep.mubr.bf16.mxu0 %v9509_v44  ;;  %v8493_v19 = vcombine.high %v4875_v57, %v4879_v39  ;;  %v5272_v57 = vld [vmem:[#allocation10 + $0xde0] sm:$0xff]  ;;  %v5269_v39 = vld [vmem:[#allocation10 + $0xdc8] sm:$0xff] }
 0x361   :  { %v2608_v14 = vpop.f32.mrf.mxu1  ;;  %v2649_v15 = vpop.f32.mrf.mxu0  ;;  %v8495_v41 = vcombine.high %v4876_v60, %v4880_v32  ;;  %v8506_v10 = vcombine.low %v4886_v23, %v4890_v24  ;;  %v5273_v60 = vld [vmem:[#allocation10 + $0xde8] sm:$0xff] }
 0x362   :  { %5082 = vmatpush1.bf16.msra.mxu1 %v8508_v5  ;;  %5123 = vmatpush1.bf16.msra.mxu0 %v8510_v6  ;;  %v8504_v6 = vcombine.low %v4885_v22, %v4889_v50  ;;  %v8554_v20 = vcombine.low %v5269_v39, %v5273_v60  ;;  %v5244_v50 = vld [vmem:[#allocation10 + $0xd00] sm:$0xff]  ;;  %v5245_v24 = vld [vmem:[#allocation10 + $0xd08] sm:$0xff] }
 0x363   :  { %v2609_v25 = vpop.f32.mrf.mxu1  ;;  %v2650_v26 = vpop.f32.mrf.mxu0  ;;  %5083 = vmatprep.subr.bf16.mxu1 %v8501_v56  ;;  %5124 = vmatprep.subr.bf16.mxu0 %v8503_v13  ;;  %v5268_v13 = vld [vmem:[#allocation10 + $0xdc0] sm:$0xff] }
 0x364   :  { %v8553_v15 = vcombine.high %v5268_v13, %v5272_v57  ;;  %v5264_v25 = vld [vmem:[#allocation10 + $0xda0] sm:$0xff]  ;;  %v5261_v26 = vld [vmem:[#allocation10 + $0xd88] sm:$0xff] }
 0x366   :  { %5084 = vmatpush1.bf16.msra.mxu1 %v8500_v2  ;;  %5125 = vmatpush1.bf16.msra.mxu0 %v8502_v3  ;;  %v8555_v2 = vcombine.high %v5269_v39, %v5273_v60  ;;  %v5260_v3 = vld [vmem:[#allocation10 + $0xd80] sm:$0xff]  ;;  %v5254_v60 = vld [vmem:[#allocation10 + $0xd50] sm:$0xff] }
 0x367   :  { %5085 = vmatprep.subr.bf16.mxu1 %v8493_v19  ;;  %5126 = vmatprep.subr.bf16.mxu0 %v8495_v41  ;;  %v5265_v19 = vld [vmem:[#allocation10 + $0xda8] sm:$0xff]  ;;  %v8552_v41 = vcombine.low %v5268_v13, %v5272_v57  ;;  %v8545_v7 = vcombine.high %v5260_v3, %v5264_v25  ;;  %v8544_v42 = vcombine.low %v5260_v3, %v5264_v25  ;;  %v10041_v13 = vrot.slane %v9713_v0, 5 }
 0x368   :  { %v8547_v21 = vcombine.high %v5261_v26, %v5265_v19 }
 0x36a   :  { %5086 = vmatpush1.bf16.msra.mxu1 %v8492_v38  ;;  %5127 = vmatpush1.bf16.msra.mxu0 %v8494_v28  ;;  %v5256_v38 = vld [vmem:[#allocation10 + $0xd60] sm:$0xff]  ;;  %v5253_v28 = vld [vmem:[#allocation10 + $0xd48] sm:$0xff] }
 0x36b   :  { %5161 = vmatprep.subr.bf16.mxu1 %v8521_v29  ;;  %5202 = vmatprep.subr.bf16.mxu0 %v8523_v30  ;;  %v5257_v29 = vld [vmem:[#allocation10 + $0xd68] sm:$0xff] }
 0x36c   :  { %v8539_v22 = vcombine.high %v5253_v28, %v5257_v29 }
 0x36d   :  { %v2891_v54 = vpop.f32.mrf.mxu1  ;;  %v2932_v49 = vpop.f32.mrf.mxu0  ;;  %8524 = vmatmul.mubr.msk.bf16.vlgmr.msra.gmra.mxu1 %vm397_vm4, %v10002_v17  ;;  %8525 = vmatmul.mubr.msk.bf16.vlgmr.msra.gmra.mxu0 %vm397_vm4, %v10002_v17 }
 0x36e   :  { %v10009_v63 = vadd.f32 %v2891_v54, %v9970_v43  ;;  %v10012_v11 = vadd.f32 %v2932_v49, %v9973_v45  ;;  %5162 = vmatpush1.bf16.msra.mxu1 %v8520_v36  ;;  %5203 = vmatpush1.bf16.msra.mxu0 %v8522_v37  ;;  %v4881_v43 = vld [vmem:[#allocation10 + $0xc30] sm:$0xff]  ;;  %v4882_v45 = vld [vmem:[#allocation10 + $0xc38] sm:$0xff]  ;;  %v8546_v36 = vcombine.low %v5261_v26, %v5265_v19 }
 0x36f   :  { %v2893_v34 = vpop.f32.mrf.mxu1  ;;  %v2934_v59 = vpop.f32.mrf.mxu0  ;;  %5163 = vmatprep.subr.bf16.mxu1 %v8513_v18  ;;  %5204 = vmatprep.subr.bf16.mxu0 %v8515_v48  ;;  %v8496_v32 = vcombine.low %v4877_v61, %v4881_v43  ;;  %v8498_v14 = vcombine.low %v4878_v47, %v4882_v45  ;;  %v8537_v48 = vcombine.high %v5252_v27, %v5256_v38 }
 0x370   :  { %v10015_v1 = vadd.f32 %v2893_v34, %v9976_v8  ;;  %v10018_v62 = vadd.f32 %v2934_v59, %v9979_v9  ;;  %5185 = vmatprep.mubr.bf16.mxu1 %v9509_v44  ;;  %5226 = vmatprep.mubr.bf16.mxu0 %v9509_v44  ;;  %v8497_v8 = vcombine.high %v4877_v61, %v4881_v43  ;;  %v5271_v61 = vld [vmem:[#allocation10 + $0xdd8] sm:$0xff] }
 0x371   :  { %v2895_v4 = vpop.f32.mrf.mxu1  ;;  %v2936_v5 = vpop.f32.mrf.mxu0  ;;  %v8499_v9 = vcombine.high %v4878_v47, %v4882_v45  ;;  %v5275_v43 = vld [vmem:[#allocation10 + $0xdf8] sm:$0xff] }
 0x372   :  { %5164 = vmatpush1.bf16.msra.mxu1 %v8512_v31  ;;  %5205 = vmatpush1.bf16.msra.mxu0 %v8514_v51  ;;  %v8536_v31 = vcombine.low %v5252_v27, %v5256_v38  ;;  %v8538_v51 = vcombine.low %v5253_v28, %v5257_v29  ;;  %v8559_v5 = vcombine.high %v5271_v61, %v5275_v43  ;;  %v5246_v38 = vld [vmem:[#allocation10 + $0xd10] sm:$0xff] }
 0x373   :  { %v2896_v12 = vpop.f32.mrf.mxu1  ;;  %v2937_v56 = vpop.f32.mrf.mxu0  ;;  %5165 = vmatprep.subr.bf16.mxu1 %v8505_v35  ;;  %5206 = vmatprep.subr.bf16.mxu0 %v8507_v33  ;;  %v5270_v35 = vld [vmem:[#allocation10 + $0xdd0] sm:$0xff] }
 0x374   :  { %v5274_v33 = vld [vmem:[#allocation10 + $0xdf0] sm:$0xff]  ;;  %v5263_v12 = vld [vmem:[#allocation10 + $0xd98] sm:$0xff] }
 0x375   :  { %v8557_v4 = vcombine.high %v5270_v35, %v5274_v33  ;;  %v5267_v56 = vld [vmem:[#allocation10 + $0xdb8] sm:$0xff] }
 0x376   :  { %5166 = vmatpush1.bf16.msra.mxu1 %v8504_v6  ;;  %5207 = vmatpush1.bf16.msra.mxu0 %v8506_v10  ;;  %v5262_v6 = vld [vmem:[#allocation10 + $0xd90] sm:$0xff]  ;;  %v8551_v39 = vcombine.high %v5263_v12, %v5267_v56 }
 0x377   :  { %5167 = vmatprep.subr.bf16.mxu1 %v8497_v8  ;;  %5208 = vmatprep.subr.bf16.mxu0 %v8499_v9  ;;  %v5266_v10 = vld [vmem:[#allocation10 + $0xdb0] sm:$0xff]  ;;  %v8556_v8 = vcombine.low %v5270_v35, %v5274_v33  ;;  %v8558_v9 = vcombine.low %v5271_v61, %v5275_v43  ;;  %v5621_v43 = vld [vmem:[#allocation10 + $0xe40] sm:$0xff] }
 0x378   :  { %v8549_v57 = vcombine.high %v5262_v6, %v5266_v10  ;;  %v8548_v25 = vcombine.low %v5262_v6, %v5266_v10 }
 0x37a   :  { %5168 = vmatpush1.bf16.msra.mxu1 %v8496_v32  ;;  %5209 = vmatpush1.bf16.msra.mxu0 %v8498_v14  ;;  %v5258_v32 = vld [vmem:[#allocation10 + $0xd70] sm:$0xff]  ;;  %v5255_v14 = vld [vmem:[#allocation10 + $0xd58] sm:$0xff] }
 0x37b   :  { %5448 = vmatprep.subr.bf16.mxu1 %v8553_v15  ;;  %5489 = vmatprep.subr.bf16.mxu0 %v8555_v2  ;;  %v5259_v15 = vld [vmem:[#allocation10 + $0xd78] sm:$0xff] }
 0x37c   :  { %v8543_v27 = vcombine.high %v5255_v14, %v5259_v15 }
 0x37d   :  { %v2973_v30 = vpop.f32.mrf.mxu1  ;;  %v3014_v40 = vpop.f32.mrf.mxu0  ;;  %8526 = vmatmul.mubr.msk.bf16.vlgmr.msra.gmra.mxu1 %vm397_vm4, %v10002_v17  ;;  %8527 = vmatmul.mubr.msk.bf16.vlgmr.msra.gmra.mxu0 %vm397_vm4, %v10002_v17 }
 0x37e   :  { %v10027_v16 = vadd.f32 %v2973_v30, %v9988_v52  ;;  %v10030_v46 = vadd.f32 %v3014_v40, %v9991_v53  ;;  %5449 = vmatpush1.bf16.msra.mxu1 %v8552_v41  ;;  %5490 = vmatpush1.bf16.msra.mxu0 %v8554_v20  ;;  %v5248_v52 = vld [vmem:[#allocation10 + $0xd20] sm:$0xff]  ;;  %v5249_v53 = vld [vmem:[#allocation10 + $0xd28] sm:$0xff]  ;;  %v8550_v41 = vcombine.low %v5263_v12, %v5267_v56  ;;  %v5247_v30 = vld [vmem:[#allocation10 + $0xd18] sm:$0xff] }
 0x37f   :  { %v2975_v37 = vpop.f32.mrf.mxu1  ;;  %v3016_v18 = vpop.f32.mrf.mxu0  ;;  %5450 = vmatprep.subr.bf16.mxu1 %v8545_v7  ;;  %5491 = vmatprep.subr.bf16.mxu0 %v8547_v21  ;;  %v8528_v47 = vcombine.low %v5244_v50, %v5248_v52  ;;  %v8530_v45 = vcombine.low %v5245_v24, %v5249_v53  ;;  %v8541_v21 = vcombine.high %v5254_v60, %v5258_v32 }
 0x380   :  { %v10033_v23 = vadd.f32 %v2975_v37, %v9994_v58  ;;  %v10036_v17 = vadd.f32 %v3016_v18, %v9997_v55  ;;  %5472 = vmatprep.mubr.bf16.mxu1 %v9509_v44  ;;  %5513 = vmatprep.mubr.bf16.mxu0 %v9509_v44  ;;  %v8529_v58 = vcombine.high %v5244_v50, %v5248_v52  ;;  %v5641_v50 = vld [vmem:[#allocation10 + $0xee0] sm:$0xff]  ;;  %v5638_v52 = vld [vmem:[#allocation10 + $0xec8] sm:$0xff] }
 0x381   :  { %v2977_v54 = vpop.f32.mrf.mxu1  ;;  %v3018_v49 = vpop.f32.mrf.mxu0  ;;  %v8531_v55 = vcombine.high %v5245_v24, %v5249_v53  ;;  %v8542_v37 = vcombine.low %v5255_v14, %v5259_v15  ;;  %v5642_v24 = vld [vmem:[#allocation10 + $0xee8] sm:$0xff] }
 0x382   :  { %5451 = vmatpush1.bf16.msra.mxu1 %v8544_v42  ;;  %5492 = vmatpush1.bf16.msra.mxu0 %v8546_v36  ;;  %v8540_v36 = vcombine.low %v5254_v60, %v5258_v32  ;;  %v8590_v35 = vcombine.low %v5638_v52, %v5642_v24  ;;  %v5613_v32 = vld [vmem:[#allocation10 + $0xe00] sm:$0xff]  ;;  %v5614_v15 = vld [vmem:[#allocation10 + $0xe08] sm:$0xff] }
 0x383   :  { %v2978_v34 = vpop.f32.mrf.mxu1  ;;  %v3019_v59 = vpop.f32.mrf.mxu0  ;;  %5452 = vmatprep.subr.bf16.mxu1 %v8537_v48  ;;  %5493 = vmatprep.subr.bf16.mxu0 %v8539_v22  ;;  %v5637_v22 = vld [vmem:[#allocation10 + $0xec0] sm:$0xff] }
 0x384   :  { %v8589_v49 = vcombine.high %v5637_v22, %v5641_v50  ;;  %v5633_v34 = vld [vmem:[#allocation10 + $0xea0] sm:$0xff]  ;;  %v5630_v59 = vld [vmem:[#allocation10 + $0xe88] sm:$0xff] }
 0x386   :  { %5453 = vmatpush1.bf16.msra.mxu1 %v8536_v31  ;;  %5494 = vmatpush1.bf16.msra.mxu0 %v8538_v51  ;;  %v8591_v31 = vcombine.high %v5638_v52, %v5642_v24  ;;  %v5629_v51 = vld [vmem:[#allocation10 + $0xe80] sm:$0xff]  ;;  %v5623_v24 = vld [vmem:[#allocation10 + $0xe50] sm:$0xff] }
 0x387   :  { %5454 = vmatprep.subr.bf16.mxu1 %v8529_v58  ;;  %5495 = vmatprep.subr.bf16.mxu0 %v8531_v55  ;;  %v5634_v58 = vld [vmem:[#allocation10 + $0xea8] sm:$0xff]  ;;  %v8588_v55 = vcombine.low %v5637_v22, %v5641_v50  ;;  %v8581_v33 = vcombine.high %v5629_v51, %v5633_v34  ;;  %v8580_v10 = vcombine.low %v5629_v51, %v5633_v34  ;;  %v10080_v22 = vrot.slane %v9713_v0, 6 }
 0x388   :  { %v8583_v61 = vcombine.high %v5630_v59, %v5634_v58 }
 0x38a   :  { %5455 = vmatpush1.bf16.msra.mxu1 %v8528_v47  ;;  %5496 = vmatpush1.bf16.msra.mxu0 %v8530_v45  ;;  %v5625_v47 = vld [vmem:[#allocation10 + $0xe60] sm:$0xff]  ;;  %v5622_v45 = vld [vmem:[#allocation10 + $0xe48] sm:$0xff] }
 0x38b   :  { %5530 = vmatprep.subr.bf16.mxu1 %v8557_v4  ;;  %5571 = vmatprep.subr.bf16.mxu0 %v8559_v5  ;;  %v5626_v4 = vld [vmem:[#allocation10 + $0xe68] sm:$0xff] }
 0x38c   :  { %v8575_v60 = vcombine.high %v5622_v45, %v5626_v4 }
 0x38d   :  { %v3260_v2 = vpop.f32.mrf.mxu1  ;;  %v3301_v3 = vpop.f32.mrf.mxu0  ;;  %8560 = vmatmul.mubr.msk.bf16.vlgmr.msra.gmra.mxu1 %vm397_vm4, %v10041_v13  ;;  %8561 = vmatmul.mubr.msk.bf16.vlgmr.msra.gmra.mxu0 %vm397_vm4, %v10041_v13 }
 0x38e   :  { %v10048_v26 = vadd.f32 %v3260_v2, %v10009_v63  ;;  %v10051_v19 = vadd.f32 %v3301_v3, %v10012_v11  ;;  %5531 = vmatpush1.bf16.msra.mxu1 %v8556_v8  ;;  %5572 = vmatpush1.bf16.msra.mxu0 %v8558_v9  ;;  %v5250_v63 = vld [vmem:[#allocation10 + $0xd30] sm:$0xff]  ;;  %v5251_v11 = vld [vmem:[#allocation10 + $0xd38] sm:$0xff]  ;;  %v8582_v8 = vcombine.low %v5630_v59, %v5634_v58 }
 0x38f   :  { %v3262_v20 = vpop.f32.mrf.mxu1  ;;  %v3303_v7 = vpop.f32.mrf.mxu0  ;;  %5532 = vmatprep.subr.bf16.mxu1 %v8549_v57  ;;  %5573 = vmatprep.subr.bf16.mxu0 %v8551_v39  ;;  %v8532_v53 = vcombine.low %v5246_v38, %v5250_v63  ;;  %v8534_v54 = vcombine.low %v5247_v30, %v5251_v11  ;;  %v8573_v39 = vcombine.high %v5621_v43, %v5625_v47 }
 0x390   :  { %v10054_v28 = vadd.f32 %v3262_v20, %v10015_v1  ;;  %v10057_v29 = vadd.f32 %v3303_v7, %v10018_v62  ;;  %5554 = vmatprep.mubr.bf16.mxu1 %v9509_v44  ;;  %5595 = vmatprep.mubr.bf16.mxu0 %v9509_v44  ;;  %v8533_v1 = vcombine.high %v5246_v38, %v5250_v63  ;;  %v5640_v38 = vld [vmem:[#allocation10 + $0xed8] sm:$0xff] }
 0x391   :  { %v3264_v40 = vpop.f32.mrf.mxu1  ;;  %v3305_v42 = vpop.f32.mrf.mxu0  ;;  %v8535_v62 = vcombine.high %v5247_v30, %v5251_v11  ;;  %v5644_v63 = vld [vmem:[#allocation10 + $0xef8] sm:$0xff] }
 0x392   :  { %5533 = vmatpush1.bf16.msra.mxu1 %v8548_v25  ;;  %5574 = vmatpush1.bf16.msra.mxu0 %v8550_v41  ;;  %v8572_v25 = vcombine.low %v5621_v43, %v5625_v47  ;;  %v8574_v41 = vcombine.low %v5622_v45, %v5626_v4  ;;  %v8595_v42 = vcombine.high %v5640_v38, %v5644_v63  ;;  %v5615_v47 = vld [vmem:[#allocation10 + $0xe10] sm:$0xff] }
 0x393   :  { %v3265_v18 = vpop.f32.mrf.mxu1  ;;  %v3306_v48 = vpop.f32.mrf.mxu0  ;;  %5534 = vmatprep.subr.bf16.mxu1 %v8541_v21  ;;  %5575 = vmatprep.subr.bf16.mxu0 %v8543_v27  ;;  %v5639_v21 = vld [vmem:[#allocation10 + $0xed0] sm:$0xff] }
 0x394   :  { %v5643_v27 = vld [vmem:[#allocation10 + $0xef0] sm:$0xff]  ;;  %v5632_v18 = vld [vmem:[#allocation10 + $0xe98] sm:$0xff] }
 0x395   :  { %v8593_v40 = vcombine.high %v5639_v21, %v5643_v27  ;;  %v5636_v48 = vld [vmem:[#allocation10 + $0xeb8] sm:$0xff] }
 0x396   :  { %5535 = vmatpush1.bf16.msra.mxu1 %v8540_v36  ;;  %5576 = vmatpush1.bf16.msra.mxu0 %v8542_v37  ;;  %v5631_v36 = vld [vmem:[#allocation10 + $0xe90] sm:$0xff]  ;;  %v8587_v52 = vcombine.high %v5632_v18, %v5636_v48 }
 0x397   :  { %5536 = vmatprep.subr.bf16.mxu1 %v8533_v1  ;;  %5577 = vmatprep.subr.bf16.mxu0 %v8535_v62  ;;  %v5635_v37 = vld [vmem:[#allocation10 + $0xeb0] sm:$0xff]  ;;  %v8592_v1 = vcombine.low %v5639_v21, %v5643_v27  ;;  %v8594_v62 = vcombine.low %v5640_v38, %v5644_v63  ;;  %v5990_v63 = vld [vmem:[#allocation10 + $0xf40] sm:$0xff] }
 0x398   :  { %v8585_v50 = vcombine.high %v5631_v36, %v5635_v37  ;;  %v8584_v34 = vcombine.low %v5631_v36, %v5635_v37 }
 0x39a   :  { %5537 = vmatpush1.bf16.msra.mxu1 %v8532_v53  ;;  %5578 = vmatpush1.bf16.msra.mxu0 %v8534_v54  ;;  %v5627_v53 = vld [vmem:[#allocation10 + $0xe70] sm:$0xff]  ;;  %v5624_v54 = vld [vmem:[#allocation10 + $0xe58] sm:$0xff] }
 0x39b   :  { %5817 = vmatprep.subr.bf16.mxu1 %v8589_v49  ;;  %5858 = vmatprep.subr.bf16.mxu0 %v8591_v31  ;;  %v5628_v49 = vld [vmem:[#allocation10 + $0xe78] sm:$0xff] }
 0x39c   :  { %v8579_v43 = vcombine.high %v5624_v54, %v5628_v49 }
 0x39d   :  { %v3342_v5 = vpop.f32.mrf.mxu1  ;;  %v3383_v6 = vpop.f32.mrf.mxu0  ;;  %8562 = vmatmul.mubr.msk.bf16.vlgmr.msra.gmra.mxu1 %vm397_vm4, %v10041_v13  ;;  %8563 = vmatmul.mubr.msk.bf16.vlgmr.msra.gmra.mxu0 %vm397_vm4, %v10041_v13 }
 0x39e   :  { %v10066_v12 = vadd.f32 %v3342_v5, %v10027_v16  ;;  %v10069_v56 = vadd.f32 %v3383_v6, %v10030_v46  ;;  %5818 = vmatpush1.bf16.msra.mxu1 %v8588_v55  ;;  %5859 = vmatpush1.bf16.msra.mxu0 %v8590_v35  ;;  %v5617_v16 = vld [vmem:[#allocation10 + $0xe20] sm:$0xff]  ;;  %v5618_v46 = vld [vmem:[#allocation10 + $0xe28] sm:$0xff]  ;;  %v8586_v55 = vcombine.low %v5632_v18, %v5636_v48  ;;  %v5616_v5 = vld [vmem:[#allocation10 + $0xe18] sm:$0xff] }
 0x39f   :  { %v3344_v9 = vpop.f32.mrf.mxu1  ;;  %v3385_v57 = vpop.f32.mrf.mxu0  ;;  %5819 = vmatprep.subr.bf16.mxu1 %v8581_v33  ;;  %5860 = vmatprep.subr.bf16.mxu0 %v8583_v61  ;;  %v8564_v30 = vcombine.low %v5613_v32, %v5617_v16  ;;  %v8566_v11 = vcombine.low %v5614_v15, %v5618_v46  ;;  %v8577_v61 = vcombine.high %v5623_v24, %v5627_v53 }
 0x3a0   :  { %v10072_v14 = vadd.f32 %v3344_v9, %v10033_v23  ;;  %v10075_v13 = vadd.f32 %v3385_v57, %v10036_v17  ;;  %5841 = vmatprep.mubr.bf16.mxu1 %v9509_v44  ;;  %5882 = vmatprep.mubr.bf16.mxu0 %v9509_v44  ;;  %v8565_v23 = vcombine.high %v5613_v32, %v5617_v16  ;;  %v6010_v32 = vld [vmem:[#allocation10 + $0xfe0] sm:$0xff]  ;;  %v6007_v16 = vld [vmem:[#allocation10 + $0xfc8] sm:$0xff] }
 0x3a1   :  { %v3346_v2 = vpop.f32.mrf.mxu1  ;;  %v3387_v3 = vpop.f32.mrf.mxu0  ;;  %v8567_v17 = vcombine.high %v5614_v15, %v5618_v46  ;;  %v8578_v9 = vcombine.low %v5624_v54, %v5628_v49  ;;  %v6011_v15 = vld [vmem:[#allocation10 + $0xfe8] sm:$0xff] }
 0x3a2   :  { %5820 = vmatpush1.bf16.msra.mxu1 %v8580_v10  ;;  %5861 = vmatpush1.bf16.msra.mxu0 %v8582_v8  ;;  %v8576_v8 = vcombine.low %v5623_v24, %v5627_v53  ;;  %v8626_v21 = vcombine.low %v6007_v16, %v6011_v15  ;;  %v5982_v53 = vld [vmem:[#allocation10 + $0xf00] sm:$0xff]  ;;  %v5983_v49 = vld [vmem:[#allocation10 + $0xf08] sm:$0xff] }
 0x3a3   :  { %v3347_v20 = vpop.f32.mrf.mxu1  ;;  %v3388_v7 = vpop.f32.mrf.mxu0  ;;  %5821 = vmatprep.subr.bf16.mxu1 %v8573_v39  ;;  %5862 = vmatprep.subr.bf16.mxu0 %v8575_v60  ;;  %v6006_v60 = vld [vmem:[#allocation10 + $0xfc0] sm:$0xff] }
 0x3a4   :  { %v8625_v3 = vcombine.high %v6006_v60, %v6010_v32  ;;  %v6002_v20 = vld [vmem:[#allocation10 + $0xfa0] sm:$0xff]  ;;  %v5999_v7 = vld [vmem:[#allocation10 + $0xf88] sm:$0xff] }
 0x3a6   :  { %5822 = vmatpush1.bf16.msra.mxu1 %v8572_v25  ;;  %5863 = vmatpush1.bf16.msra.mxu0 %v8574_v41  ;;  %v8627_v25 = vcombine.high %v6007_v16, %v6011_v15  ;;  %v5998_v41 = vld [vmem:[#allocation10 + $0xf80] sm:$0xff]  ;;  %v5992_v15 = vld [vmem:[#allocation10 + $0xf50] sm:$0xff] }
 0x3a7   :  { %5823 = vmatprep.subr.bf16.mxu1 %v8565_v23  ;;  %5864 = vmatprep.subr.bf16.mxu0 %v8567_v17  ;;  %v6003_v23 = vld [vmem:[#allocation10 + $0xfa8] sm:$0xff]  ;;  %v8624_v17 = vcombine.low %v6006_v60, %v6010_v32  ;;  %v8617_v27 = vcombine.high %v5998_v41, %v6002_v20  ;;  %v8616_v37 = vcombine.low %v5998_v41, %v6002_v20  ;;  %v6014_v60 = vrot.slane %v9713_v0, 7 }
 0x3a8   :  { %v8619_v38 = vcombine.high %v5999_v7, %v6003_v23 }
 0x3aa   :  { %5824 = vmatpush1.bf16.msra.mxu1 %v8564_v30  ;;  %5865 = vmatpush1.bf16.msra.mxu0 %v8566_v11  ;;  %v5994_v30 = vld [vmem:[#allocation10 + $0xf60] sm:$0xff]  ;;  %v5991_v11 = vld [vmem:[#allocation10 + $0xf48] sm:$0xff] }
 0x3ab   :  { %5899 = vmatprep.subr.bf16.mxu1 %v8593_v40  ;;  %5940 = vmatprep.subr.bf16.mxu0 %v8595_v42  ;;  %v5995_v40 = vld [vmem:[#allocation10 + $0xf68] sm:$0xff] }
 0x3ac   :  { %v8611_v24 = vcombine.high %v5991_v11, %v5995_v40 }
 0x3ad   :  { %v3628_v31 = vpop.f32.mrf.mxu1  ;;  %v3669_v51 = vpop.f32.mrf.mxu0  ;;  %8596 = vmatmul.mubr.msk.bf16.vlgmr.msra.gmra.mxu1 %vm397_vm4, %v10080_v22  ;;  %8597 = vmatmul.mubr.msk.bf16.vlgmr.msra.gmra.mxu0 %vm397_vm4, %v10080_v22 }
 0x3ae   :  { %v10087_v59 = vadd.f32 %v3628_v31, %v10048_v26  ;;  %v10090_v58 = vadd.f32 %v3669_v51, %v10051_v19  ;;  %5900 = vmatpush1.bf16.msra.mxu1 %v8592_v1  ;;  %5941 = vmatpush1.bf16.msra.mxu0 %v8594_v62  ;;  %v5619_v26 = vld [vmem:[#allocation10 + $0xe30] sm:$0xff]  ;;  %v5620_v19 = vld [vmem:[#allocation10 + $0xe38] sm:$0xff]  ;;  %v8618_v1 = vcombine.low %v5999_v7, %v6003_v23 }
 0x3af   :  { %v3630_v35 = vpop.f32.mrf.mxu1  ;;  %v3671_v33 = vpop.f32.mrf.mxu0  ;;  %5901 = vmatprep.subr.bf16.mxu1 %v8585_v50  ;;  %5942 = vmatprep.subr.bf16.mxu0 %v8587_v52  ;;  %v8568_v46 = vcombine.low %v5615_v47, %v5619_v26  ;;  %v8570_v2 = vcombine.low %v5616_v5, %v5620_v19  ;;  %v8609_v52 = vcombine.high %v5990_v63, %v5994_v30 }
 0x3b0   :  { %v10093_v45 = vadd.f32 %v3630_v35, %v10054_v28  ;;  %v10096_v4 = vadd.f32 %v3671_v33, %v10057_v29  ;;  %5923 = vmatprep.mubr.bf16.mxu1 %v9509_v44  ;;  %5964 = vmatprep.mubr.bf16.mxu0 %v9509_v44  ;;  %v8569_v28 = vcombine.high %v5615_v47, %v5619_v26  ;;  %v6009_v47 = vld [vmem:[#allocation10 + $0xfd8] sm:$0xff] }
 0x3b1   :  { %v3632_v6 = vpop.f32.mrf.mxu1  ;;  %v3673_v10 = vpop.f32.mrf.mxu0  ;;  %v8571_v29 = vcombine.high %v5616_v5, %v5620_v19  ;;  %v6013_v26 = vld [vmem:[#allocation10 + $0xff8] sm:$0xff] }
 0x3b2   :  { %5902 = vmatpush1.bf16.msra.mxu1 %v8584_v34  ;;  %5943 = vmatpush1.bf16.msra.mxu0 %v8586_v55  ;;  %v8608_v34 = vcombine.low %v5990_v63, %v5994_v30  ;;  %v8610_v55 = vcombine.low %v5991_v11, %v5995_v40  ;;  %v8631_v10 = vcombine.high %v6009_v47, %v6013_v26  ;;  %v5984_v63 = vld [vmem:[#allocation10 + $0xf10] sm:$0xff] }
 0x3b3   :  { %v3633_v57 = vpop.f32.mrf.mxu1  ;;  %v3674_v39 = vpop.f32.mrf.mxu0  ;;  %5903 = vmatprep.subr.bf16.mxu1 %v8577_v61  ;;  %5944 = vmatprep.subr.bf16.mxu0 %v8579_v43  ;;  %v6008_v61 = vld [vmem:[#allocation10 + $0xfd0] sm:$0xff] }
 0x3b4   :  { %v6012_v43 = vld [vmem:[#allocation10 + $0xff0] sm:$0xff]  ;;  %v6001_v57 = vld [vmem:[#allocation10 + $0xf98] sm:$0xff] }
 0x3b5   :  { %v8629_v6 = vcombine.high %v6008_v61, %v6012_v43  ;;  %v6005_v39 = vld [vmem:[#allocation10 + $0xfb8] sm:$0xff]  ;;  %v5988_v40 = vld [vmem:[#allocation10 + $0xf30] sm:$0xff] }
 0x3b6   :  { %5904 = vmatpush1.bf16.msra.mxu1 %v8576_v8  ;;  %5945 = vmatpush1.bf16.msra.mxu0 %v8578_v9  ;;  %v6000_v8 = vld [vmem:[#allocation10 + $0xf90] sm:$0xff]  ;;  %v8623_v16 = vcombine.high %v6001_v57, %v6005_v39  ;;  %v8622_v0 = vcombine.low %v6001_v57, %v6005_v39 }
 0x3b7   :  { %5905 = vmatprep.subr.bf16.mxu1 %v8569_v28  ;;  %5946 = vmatprep.subr.bf16.mxu0 %v8571_v29  ;;  %v6004_v9 = vld [vmem:[#allocation10 + $0xfb0] sm:$0xff]  ;;  %v8628_v28 = vcombine.low %v6008_v61, %v6012_v43  ;;  %v8630_v29 = vcombine.low %v6009_v47, %v6013_v26 }
 0x3b8   :  { %v8621_v32 = vcombine.high %v6000_v8, %v6004_v9  ;;  %v8620_v20 = vcombine.low %v6000_v8, %v6004_v9 }
 0x3ba   :  { %5906 = vmatpush1.bf16.msra.mxu1 %v8568_v46  ;;  %5947 = vmatpush1.bf16.msra.mxu0 %v8570_v2  ;;  %v5996_v46 = vld [vmem:[#allocation10 + $0xf70] sm:$0xff]  ;;  %v5993_v2 = vld [vmem:[#allocation10 + $0xf58] sm:$0xff] }
 0x3bb   :  { %6186 = vmatprep.subr.bf16.mxu1 %v8625_v3  ;;  %6227 = vmatprep.subr.bf16.mxu0 %v8627_v25  ;;  %v5997_v3 = vld [vmem:[#allocation10 + $0xf78] sm:$0xff] }
 0x3bd   :  { %v3710_v42 = vpop.f32.mrf.mxu1  ;;  %v3751_v36 = vpop.f32.mrf.mxu0  ;;  %8598 = vmatmul.mubr.msk.bf16.vlgmr.msra.gmra.mxu1 %vm397_vm4, %v10080_v22  ;;  %8599 = vmatmul.mubr.msk.bf16.vlgmr.msra.gmra.mxu0 %vm397_vm4, %v10080_v22 }
 0x3be   :  { %v10105_v18 = vadd.f32 %v3710_v42, %v10066_v12  ;;  %v10108_v48 = vadd.f32 %v3751_v36, %v10069_v56  ;;  %6187 = vmatpush1.bf16.msra.mxu1 %v8624_v17  ;;  %6228 = vmatpush1.bf16.msra.mxu0 %v8626_v21  ;;  %v5986_v12 = vld [vmem:[#allocation10 + $0xf20] sm:$0xff]  ;;  %v5987_v56 = vld [vmem:[#allocation10 + $0xf28] sm:$0xff]  ;;  %v5985_v42 = vld [vmem:[#allocation10 + $0xf18] sm:$0xff] }
 0x3bf   :  { %v3712_v62 = vpop.f32.mrf.mxu1  ;;  %v3753_v50 = vpop.f32.mrf.mxu0  ;;  %6188 = vmatprep.subr.bf16.mxu1 %v8617_v27  ;;  %6229 = vmatprep.subr.bf16.mxu0 %v8619_v38  ;;  %v8600_v5 = vcombine.low %v5982_v53, %v5986_v12  ;;  %v8602_v19 = vcombine.low %v5983_v49, %v5987_v56  ;;  %v8613_v27 = vcombine.high %v5992_v15, %v5996_v46  ;;  %v5989_v36 = vld [vmem:[#allocation10 + $0xf38] sm:$0xff] }
 0x3c0   :  { %v10111_v54 = vadd.f32 %v3712_v62, %v10072_v14  ;;  %v10114_v22 = vadd.f32 %v3753_v50, %v10075_v13  ;;  %6210 = vmatprep.mubr.bf16.mxu1 %v9509_v44  ;;  %6251 = vmatprep.mubr.bf16.mxu0 %v9509_v44  ;;  %v8601_v14 = vcombine.high %v5982_v53, %v5986_v12 }
 0x3c1   :  { %v3714_v31 = vpop.f32.mrf.mxu1  ;;  %v3755_v51 = vpop.f32.mrf.mxu0  ;;  %v8603_v13 = vcombine.high %v5983_v49, %v5987_v56  ;;  %v8615_v38 = vcombine.high %v5993_v2, %v5997_v3 }
 0x3c2   :  { %6189 = vmatpush1.bf16.msra.mxu1 %v8616_v37  ;;  %6230 = vmatpush1.bf16.msra.mxu0 %v8618_v1  ;;  %v8612_v37 = vcombine.low %v5992_v15, %v5996_v46  ;;  %v8614_v1 = vcombine.low %v5993_v2, %v5997_v3 }
 0x3c3   :  { %v3715_v35 = vpop.f32.mrf.mxu1  ;;  %v3756_v33 = vpop.f32.mrf.mxu0  ;;  %6190 = vmatprep.subr.bf16.mxu1 %v8609_v52  ;;  %6231 = vmatprep.subr.bf16.mxu0 %v8611_v24  ;;  %v8607_v52 = vcombine.high %v5985_v42, %v5989_v36  ;;  %v8606_v24 = vcombine.low %v5985_v42, %v5989_v36  ;;  %v8884_v42 = vld [vmem:[#allocation16 + $0x64] ss:$8 sps:$4 sm:$0xff]  }
 0x3c4   :  { %v8887_v36 = vld [vmem:[#allocation16 + $0x164] ss:$8 sps:$4 sm:$0xff]  }
 0x3c6   :  { %6191 = vmatpush1.bf16.msra.mxu1 %v8608_v34  ;;  %6232 = vmatpush1.bf16.msra.mxu0 %v8610_v55 }
 0x3c7   :  { %6192 = vmatprep.subr.bf16.mxu1 %v8601_v14  ;;  %6233 = vmatprep.subr.bf16.mxu0 %v8603_v13 }
 0x3ca   :  { %6193 = vmatpush1.bf16.msra.mxu1 %v8600_v5  ;;  %6234 = vmatpush1.bf16.msra.mxu0 %v8602_v19 }
 0x3cb   :  { %6268 = vmatprep.subr.bf16.mxu1 %v8629_v6  ;;  %6309 = vmatprep.subr.bf16.mxu0 %v8631_v10 }
 0x3cd   :  { %v3998_v25 = vpop.f32.mrf.mxu1  ;;  %v4039_v41 = vpop.f32.mrf.mxu0  ;;  %8632 = vmatmul.mubr.msk.bf16.vlgmr.msra.gmra.mxu1 %vm397_vm4, %v6014_v60  ;;  %8633 = vmatmul.mubr.msk.bf16.vlgmr.msra.gmra.mxu0 %vm397_vm4, %v6014_v60 }
 0x3ce   :  { %v4128_v7 = vadd.f32 %v3998_v25, %v10087_v59  ;;  %v4130_v23 = vadd.f32 %v4039_v41, %v10090_v58  ;;  %6269 = vmatpush1.bf16.msra.mxu1 %v8628_v28  ;;  %6310 = vmatpush1.bf16.msra.mxu0 %v8630_v29 }
 0x3cf   :  { %v4000_v17 = vpop.f32.mrf.mxu1  ;;  %v4041_v21 = vpop.f32.mrf.mxu0  ;;  %6270 = vmatprep.subr.bf16.mxu1 %v8621_v32  ;;  %6311 = vmatprep.subr.bf16.mxu0 %v8623_v16 }
 0x3d0   :  { %v4129_v30 = vadd.f32 %v4000_v17, %v10093_v45  ;;  %v4131_v11 = vadd.f32 %v4041_v21, %v10096_v4  ;;  %6292 = vmatprep.mubr.bf16.mxu1 %v9509_v44  ;;  %6333 = vmatprep.mubr.bf16.mxu0 %v9509_v44  ;;  %v8605_v45 = vcombine.high %v5984_v63, %v5988_v40 }
 0x3d1   :  { %v4002_v59 = vpop.f32.mrf.mxu1  ;;  %v4043_v58 = vpop.f32.mrf.mxu0  ;;  %v8604_v4 = vcombine.low %v5984_v63, %v5988_v40  ;;  %v8876_v63 = vld [vmem:[#allocation16 + $0x70] ss:$8 sps:$4 sm:$0xff]  }
 0x3d2   :  { %6271 = vmatpush1.bf16.msra.mxu1 %v8620_v20  ;;  %6312 = vmatpush1.bf16.msra.mxu0 %v8622_v0  ;;  %v8882_v59 = vld [vmem:[#allocation16 + $0x60] ss:$8 sps:$4 sm:$0xff]  }
 0x3d3   :  { %v4003_v62 = vpop.f32.mrf.mxu1  ;;  %v4044_v50 = vpop.f32.mrf.mxu0  ;;  %6272 = vmatprep.subr.bf16.mxu1 %v8613_v27  ;;  %6313 = vmatprep.subr.bf16.mxu0 %v8615_v38  ;;  %v8878_v27 = vld [vmem:[#allocation16 + $0x74] ss:$8 sps:$4 sm:$0xff]   ;;  %v8885_v58 = vld [vmem:[#allocation16 + $0x160] ss:$8 sps:$4 sm:$0xff]  }
 0x3d4   :  { %v8881_v38 = vld [vmem:[#allocation16 + $0x174] ss:$8 sps:$4 sm:$0xff]   ;;  %v6352_v62 = vlaneseq  ;;  %v8888_v50 = vld [vmem:[#allocation16 + $0x50] ss:$8 sps:$4 sm:$0xff]  }
 0x3d6   :  { %6273 = vmatpush1.bf16.msra.mxu1 %v8612_v37  ;;  %6314 = vmatpush1.bf16.msra.mxu0 %v8614_v1  ;;  %v8890_v37 = vld [vmem:[#allocation16 + $0x54] ss:$8 sps:$4 sm:$0xff]  }
 0x3d7   :  { %6274 = vmatprep.subr.bf16.mxu1 %v8605_v45  ;;  %6315 = vmatprep.subr.bf16.mxu0 %v8607_v52  ;;  %v8893_v1 = vld [vmem:[#allocation16 + $0x154] ss:$8 sps:$4 sm:$0xff]   ;;  %v8891_v45 = vld [vmem:[#allocation16 + $0x150] ss:$8 sps:$4 sm:$0xff]  }
 0x3da   :  { %6275 = vmatpush1.bf16.msra.mxu1 %v8604_v4  ;;  %6316 = vmatpush1.bf16.msra.mxu0 %v8606_v24  ;;  %v8896_v24 = vld [vmem:[#allocation16 + $0x44] ss:$8 sps:$4 sm:$0xff]  }
 0x3db   :  { %7482 = vmatprep.subr.bf16.mxu1 %v8878_v27  ;;  %7523 = vmatprep.subr.bf16.mxu0 %v8881_v38  ;;  %v8920_v27 = vld [vmem:[#allocation16 + $0x4] ss:$8 sps:$4 sm:$0xff]  }
 0x3dc   :  { %v8923_v38 = vld [vmem:[#allocation16 + $0x104] ss:$8 sps:$4 sm:$0xff]  }
 0x3dd   :  { %v4080_v44 = vpop.f32.mrf.mxu1  ;;  %v4121_v53 = vpop.f32.mrf.mxu0  ;;  %8634 = vmatmul.mubr.msk.bf16.vlgmr.msra.gmra.mxu1 %vm397_vm4, %v6014_v60  ;;  %8635 = vmatmul.mubr.msk.bf16.vlgmr.msra.gmra.mxu0 %vm397_vm4, %v6014_v60 }
 0x3de   :  { %v4132_v12 = vadd.f32 %v4080_v44, %v10105_v18  ;;  %v4134_v49 = vadd.f32 %v4121_v53, %v10108_v48  ;;  %7483 = vmatpush1.bf16.msra.mxu1 %v8876_v63  ;;  %v8899_v44 = vld [vmem:[#allocation16 + $0x144] ss:$8 sps:$4 sm:$0xff]   ;;  %v8918_v63 = vld [vmem:[#allocation16] ss:$8 sps:$4 sm:$0xff]  }
 0x3df   :  { %v4082_v56 = vpop.f32.mrf.mxu1  ;;  %v4123_v31 = vpop.f32.mrf.mxu0  ;;  %7484 = vmatprep.subr.bf16.mxu1 %v8884_v42 }
 0x3e0   :  { %v4133_v51 = vadd.f32 %v4082_v56, %v10111_v54  ;;  %v4135_v34 = vadd.f32 %v4123_v31, %v10114_v22  ;;  %v8894_v56 = vld [vmem:[#allocation16 + $0x40] ss:$8 sps:$4 sm:$0xff]  }
 0x3e1   :  { %v4084_v55 = vpop.f32.mrf.mxu1  ;;  %v4125_v35 = vpop.f32.mrf.mxu0  ;;  %v8897_v31 = vld [vmem:[#allocation16 + $0x140] ss:$8 sps:$4 sm:$0xff]  }
 0x3e2   :  { %7485 = vmatpush1.bf16.msra.mxu1 %v8882_v59  ;;  %v8926_v59 = vld [vmem:[#allocation16 + $0xf4] ss:$8 sps:$4 sm:$0xff]  }
 0x3e3   :  { %v4085_v33 = vpop.f32.mrf.mxu1  ;;  %v4126_v14 = vpop.f32.mrf.mxu0  ;;  %7486 = vmatprep.subr.bf16.mxu1 %v8890_v37 }
 0x3e6   :  { %7487 = vmatpush1.bf16.msra.mxu1 %v8888_v50  ;;  %v8927_v50 = vld [vmem:[#allocation16 + $0x1f0] ss:$8 sps:$4 sm:$0xff]  }
 0x3e7   :  { %7488 = vmatprep.subr.bf16.mxu1 %v8896_v24 }
 0x3ea   :  { %7489 = vmatpush1.bf16.msra.mxu1 %v8894_v56 }
 0x3ed   :  { %v4367_v13 = vpop.f32.mrf.mxu1  ;;  %v4408_v61 = vpop.f32.mrf.mxu0 }
 0x3ee   :  { %v4497_v43 = vadd.f32 %v4367_v13, %v4128_v7  ;;  %v4499_v47 = vadd.f32 %v4408_v61, %v4130_v23 }
 0x3ef   :  { %v4369_v26 = vpop.f32.mrf.mxu1  ;;  %v4410_v5 = vpop.f32.mrf.mxu0 }
 0x3f0   :  { %v4498_v19 = vadd.f32 %v4369_v26, %v4129_v30  ;;  %v4500_v18 = vadd.f32 %v4410_v5, %v4131_v11  ;;  %v8879_v30 = vld [vmem:[#allocation16 + $0x170] ss:$8 sps:$4 sm:$0xff]  }
 0x3f1   :  { %v4371_v6 = vpop.f32.mrf.mxu1  ;;  %v4412_v48 = vpop.f32.mrf.mxu0  ;;  %7524 = vmatpush1.bf16.msra.mxu0 %v8879_v30  ;;  %v8921_v30 = vld [vmem:[#allocation16 + $0x100] ss:$8 sps:$4 sm:$0xff]  }
 0x3f2   :  { %7525 = vmatprep.subr.bf16.mxu0 %v8887_v36 }
 0x3f3   :  { %v4372_v10 = vpop.f32.mrf.mxu1  ;;  %v4413_v8 = vpop.f32.mrf.mxu0 }
 0x3f4   :  { %v8902_v8 = vld [vmem:[#allocation16 + $0x34] ss:$8 sps:$4 sm:$0xff]  }
 0x3f5   :  { %7526 = vmatpush1.bf16.msra.mxu0 %v8885_v58  ;;  %7490 = vmatprep.subr.bf16.mxu1 %v8902_v8  ;;  %v8929_v58 = vld [vmem:[#allocation16 + $0x1f4] ss:$8 sps:$4 sm:$0xff]  }
 0x3f6   :  { %7527 = vmatprep.subr.bf16.mxu0 %v8893_v1 }
 0x3f9   :  { %7528 = vmatpush1.bf16.msra.mxu0 %v8891_v45 }
 0x3fa   :  { %7529 = vmatprep.subr.bf16.mxu0 %v8899_v44  ;;  %v8932_v44 = vld [vmem:[#allocation16 + $0xe4] ss:$8 sps:$4 sm:$0xff]  }
 0x3fd   :  { %v4449_v9 = vpop.f32.mrf.mxu1  ;;  %v4490_v54 = vpop.f32.mrf.mxu0  ;;  %7530 = vmatpush1.bf16.msra.mxu0 %v8897_v31  ;;  %v8930_v31 = vld [vmem:[#allocation16 + $0xe0] ss:$8 sps:$4 sm:$0xff]  }
 0x3fe   :  { %v4501_v57 = vadd.f32 %v4449_v9, %v4132_v12  ;;  %v4503_v22 = vadd.f32 %v4490_v54, %v4134_v49  ;;  %v10145_v49 = vshrl.u32 %v6352_v62, 7  ;;  %v8905_v9 = vld [vmem:[#allocation16 + $0x134] ss:$8 sps:$4 sm:$0xff]   ;;  %v8924_v62 = vld [vmem:[#allocation16 + $0xf0] ss:$8 sps:$4 sm:$0xff]  }
 0x3ff   :  { %v4451_v39 = vpop.f32.mrf.mxu1  ;;  %v4492_v28 = vpop.f32.mrf.mxu0  ;;  %7531 = vmatprep.subr.bf16.mxu0 %v8905_v9 }
 0x400   :  { %v4502_v29 = vadd.f32 %v4451_v39, %v4133_v51  ;;  %v4504_v60 = vadd.f32 %v4492_v28, %v4135_v34  ;;  %v10152_v33 = vsub.s32 4, %v10145_v49  ;;  %v10155_v14 = vsub.s32 6, %v10145_v49  ;;  %v8903_v39 = vld [vmem:[#allocation16 + $0x130] ss:$8 sps:$4 sm:$0xff]  }
 0x401   :  { %v4453_v32 = vpop.f32.mrf.mxu1  ;;  %v4494_v16 = vpop.f32.mrf.mxu0  ;;  %7532 = vmatpush1.bf16.msra.mxu0 %v8903_v39 }
 0x402   :  { %v8908_v16 = vld [vmem:[#allocation16 + $0x24] ss:$8 sps:$4 sm:$0xff]  }
 0x403   :  { %v4454_v15 = vpop.f32.mrf.mxu1  ;;  %v4495_v46 = vpop.f32.mrf.mxu0 }
 0x404   :  { %v8911_v15 = vld [vmem:[#allocation16 + $0x124] ss:$8 sps:$4 sm:$0xff]  }
 0x405   :  { %7533 = vmatprep.subr.bf16.mxu0 %v8911_v15 }
 0x40d   :  { %v4736_v2 = vpop.f32.mrf.mxu1  ;;  %v4777_v3 = vpop.f32.mrf.mxu0 }
 0x40e   :  { %v10133_v25 = vadd.f32 %v4736_v2, %v4497_v43  ;;  %v10135_v41 = vadd.f32 %v4777_v3, %v4499_v47  ;;  %v10157_v43 = vld [vmem:[#allocation11] sm:$0xff] }
 0x40f   :  { %v4738_v20 = vpop.f32.mrf.mxu1  ;;  %v4779_v7 = vpop.f32.mrf.mxu0  ;;  %v6371_v47 = vrot.slane %v10157_v43, %v10152_v33  ;;  %v6379_v26 = vrot.slane %v10157_v43, %v10155_v14  ;;  %v8906_v3 = vld [vmem:[#allocation16 + $0x20] ss:$8 sps:$4 sm:$0xff]  }
 0x410   :  { %v10137_v23 = vadd.f32 %v4738_v20, %v4498_v19  ;;  %v10139_v0 = vadd.f32 %v4779_v7, %v4500_v18  ;;  %v8917_v20 = vld [vmem:[#allocation16 + $0x114] ss:$8 sps:$4 sm:$0xff]  }
 0x411   :  { %v4740_v17 = vpop.f32.mrf.mxu1  ;;  %v4781_v21 = vpop.f32.mrf.mxu0  ;;  %v10175_v7 = vld [vmem:[#allocation13] sm:$0xff] }
 0x412   :  { %v6592_v17 = vrot.slane %v10175_v7, %v10152_v33  ;;  %v6600_v21 = vrot.slane %v10175_v7, %v10155_v14 }
 0x413   :  { %v4741_v11 = vpop.f32.mrf.mxu1  ;;  %v4782_v40 = vpop.f32.mrf.mxu0 }
 0x41d   :  { %v4818_v52 = vpop.f32.mrf.mxu1  ;;  %v4859_v4 = vpop.f32.mrf.mxu0 }
 0x41e   :  { %v10141_v53 = vadd.f32 %v4818_v52, %v4501_v57  ;;  %v10143_v12 = vadd.f32 %v4859_v4, %v4503_v22  ;;  %v8900_v22 = vld [vmem:[#allocation16 + $0x30] ss:$8 sps:$4 sm:$0xff]  }
 0x41f   :  { %v4820_v51 = vpop.f32.mrf.mxu1  ;;  %v4861_v34 = vpop.f32.mrf.mxu0  ;;  %7491 = vmatpush1.bf16.msra.mxu1 %v8900_v22  ;;  %v8953_v22 = vld [vmem:[#allocation16 + $0x1b4] ss:$8 sps:$4 sm:$0xff]  }
 0x420   :  { %v10147_v55 = vadd.f32 %v4820_v51, %v4502_v29  ;;  %v10149_v35 = vadd.f32 %v4861_v34, %v4504_v60  ;;  %7492 = vmatprep.subr.bf16.mxu1 %v8908_v16  ;;  %v8933_v51 = vld [vmem:[#allocation16 + $0x1e0] ss:$8 sps:$4 sm:$0xff]   ;;  %v8938_v34 = vld [vmem:[#allocation16 + $0xd4] ss:$8 sps:$4 sm:$0xff]   ;;  %v8951_v16 = vld [vmem:[#allocation16 + $0x1b0] ss:$8 sps:$4 sm:$0xff]  }
 0x421   :  { %v4822_v13 = vpop.f32.mrf.mxu1  ;;  %v4863_v61 = vpop.f32.mrf.mxu0 }
 0x422   :  { %v8939_v13 = vld [vmem:[#allocation16 + $0x1d0] ss:$8 sps:$4 sm:$0xff]   ;;  %v8944_v61 = vld [vmem:[#allocation16 + $0xc4] ss:$8 sps:$4 sm:$0xff]  }
 0x423   :  { %v4823_v5 = vpop.f32.mrf.mxu1  ;;  %v4864_v19 = vpop.f32.mrf.mxu0  ;;  %7493 = vmatpush1.bf16.msra.mxu1 %v8906_v3  ;;  %v8959_v3 = vld [vmem:[#allocation16 + $0x1a4] ss:$8 sps:$4 sm:$0xff]  }
 0x424   :  { %v8947_v5 = vld [vmem:[#allocation16 + $0x1c4] ss:$8 sps:$4 sm:$0xff]   ;;  %v8942_v19 = vld [vmem:[#allocation16 + $0xc0] ss:$8 sps:$4 sm:$0xff]  }
 0x42d   :  { %v5105_v18 = vpop.f32.mrf.mxu1  ;;  %v5146_v6 = vpop.f32.mrf.mxu0 }
 0x42e   :  { %v10164_v48 = vadd.f32 %v5105_v18, %v10133_v25  ;;  %v10167_v10 = vadd.f32 %v5146_v6, %v10135_v41  ;;  %v8909_v25 = vld [vmem:[#allocation16 + $0x120] ss:$8 sps:$4 sm:$0xff]   ;;  %v8914_v41 = vld [vmem:[#allocation16 + $0x14] ss:$8 sps:$4 sm:$0xff]  }
 0x42f   :  { %v5107_v54 = vpop.f32.mrf.mxu1  ;;  %v5148_v57 = vpop.f32.mrf.mxu0  ;;  %7534 = vmatpush1.bf16.msra.mxu0 %v8909_v25  ;;  %7494 = vmatprep.subr.bf16.mxu1 %v8914_v41  ;;  %v8945_v18 = vld [vmem:[#allocation16 + $0x1c0] ss:$8 sps:$4 sm:$0xff]  }
 0x430   :  { %v10170_v28 = vadd.f32 %v5107_v54, %v10137_v23  ;;  %v10173_v29 = vadd.f32 %v5148_v57, %v10139_v0  ;;  %v8912_v23 = vld [vmem:[#allocation16 + $0x10] ss:$8 sps:$4 sm:$0xff]   ;;  %7535 = vmatprep.subr.bf16.mxu0 %v8917_v20  ;;  %v8950_v57 = vld [vmem:[#allocation16 + $0xb4] ss:$8 sps:$4 sm:$0xff]   ;;  %v8954_v41 = vld [vmem:[#allocation16 + $0xa0] ss:$8 sps:$4 sm:$0xff]  }
 0x431   :  { %v5109_v60 = vpop.f32.mrf.mxu1  ;;  %v5150_v32 = vpop.f32.mrf.mxu0  ;;  %v8915_v0 = vld [vmem:[#allocation16 + $0x110] ss:$8 sps:$4 sm:$0xff]   ;;  %7495 = vmatpush1.bf16.msra.mxu1 %v8912_v23  ;;  %v8957_v20 = vld [vmem:[#allocation16 + $0x1a0] ss:$8 sps:$4 sm:$0xff]   ;;  %v8962_v23 = vld [vmem:[#allocation16 + $0x94] ss:$8 sps:$4 sm:$0xff]  }
 0x432   :  { %7496 = vmatprep.subr.bf16.mxu1 %v8920_v27  ;;  %v8948_v32 = vld [vmem:[#allocation16 + $0xb0] ss:$8 sps:$4 sm:$0xff]  }
 0x433   :  { %v5110_v46 = vpop.f32.mrf.mxu1  ;;  %v5151_v2 = vpop.f32.mrf.mxu0  ;;  %7536 = vmatpush1.bf16.msra.mxu0 %v8915_v0  ;;  %v8965_v0 = vld [vmem:[#allocation16 + $0x194] ss:$8 sps:$4 sm:$0xff]   ;;  %v8963_v27 = vld [vmem:[#allocation16 + $0x190] ss:$8 sps:$4 sm:$0xff]  }
 0x434   :  { %7537 = vmatprep.subr.bf16.mxu0 %v8923_v38  ;;  %v10204_v38 = vld [vmem:[#allocation14] sm:$0xff] }
 0x435   :  { %7497 = vmatpush1.bf16.msra.mxu1 %v8918_v63  ;;  %v6665_v63 = vrot.slane %v10204_v38, %v10152_v33 }
 0x436   :  { %7498 = vmatprep.subr.bf16.mxu1 %v8926_v59  ;;  %v8966_v59 = vld [vmem:[#allocation16 + $0x80] ss:$8 sps:$4 sm:$0xff]  }
 0x437   :  { %7538 = vmatpush1.bf16.msra.mxu0 %v8921_v30  ;;  %v6673_v30 = vrot.slane %v10204_v38, %v10155_v14 }
 0x438   :  { %7539 = vmatprep.subr.bf16.mxu0 %v8929_v58  ;;  %v8969_v58 = vld [vmem:[#allocation16 + $0x180] ss:$8 sps:$4 sm:$0xff]  }
 0x439   :  { %7499 = vmatpush2.bf16.msra.mxu1 %v8924_v62 }
 0x43a   :  { %7500 = vmatprep.subr.bf16.mxu1 %v8932_v44 }
 0x43b   :  { %7540 = vmatpush2.bf16.msra.mxu0 %v8927_v50  ;;  %v8977_v50 = vld [vmem:[#allocation16 + $0x374] ss:$8 sps:$4 sm:$0xff]  }
 0x43d   :  { %v5187_v11 = vpop.f32.mrf.mxu1  ;;  %v5228_v40 = vpop.f32.mrf.mxu0  ;;  %7501 = vmatpush2.bf16.msra.mxu1 %v8930_v31 }
 0x43e   :  { %v10182_v42 = vadd.f32 %v5187_v11, %v10141_v53  ;;  %v10185_v36 = vadd.f32 %v5228_v40, %v10143_v12  ;;  %v8935_v53 = vld [vmem:[#allocation16 + $0x1e4] ss:$8 sps:$4 sm:$0xff]   ;;  %7502 = vmatprep.subr.bf16.mxu1 %v8938_v34 }
 0x43f   :  { %v5189_v37 = vpop.f32.mrf.mxu1  ;;  %v5230_v1 = vpop.f32.mrf.mxu0  ;;  %7541 = vmatprep.subr.bf16.mxu0 %v8935_v53  ;;  %v8968_v11 = vld [vmem:[#allocation16 + $0x84] ss:$8 sps:$4 sm:$0xff]  }
 0x440   :  { %v10188_v45 = vadd.f32 %v5189_v37, %v10147_v55  ;;  %v10191_v52 = vadd.f32 %v5230_v1, %v10149_v35  ;;  %7542 = vmatpush2.bf16.msra.mxu0 %v8933_v51  ;;  %v8941_v55 = vld [vmem:[#allocation16 + $0x1d4] ss:$8 sps:$4 sm:$0xff]   ;;  %v8936_v35 = vld [vmem:[#allocation16 + $0xd0] ss:$8 sps:$4 sm:$0xff]   ;;  %v8971_v40 = vld [vmem:[#allocation16 + $0x184] ss:$8 sps:$4 sm:$0xff]  }
 0x441   :  { %v5191_v4 = vpop.f32.mrf.mxu1  ;;  %v5232_v24 = vpop.f32.mrf.mxu0  ;;  %7543 = vmatprep.subr.bf16.mxu0 %v8941_v55  ;;  %7503 = vmatpush2.bf16.msra.mxu1 %v8936_v35  ;;  %v8974_v37 = vld [vmem:[#allocation16 + $0x274] ss:$8 sps:$4 sm:$0xff]  }
 0x442   :  { %7504 = vmatprep.subr.bf16.mxu1 %v8944_v61 }
 0x443   :  { %v5192_v12 = vpop.f32.mrf.mxu1  ;;  %v5233_v56 = vpop.f32.mrf.mxu0 }
 0x444   :  { %7544 = vmatpush2.bf16.msra.mxu0 %v8939_v13 }
 0x445   :  { %7545 = vmatprep.subr.bf16.mxu0 %v8947_v5  ;;  %7505 = vmatpush2.bf16.msra.mxu1 %v8942_v19 }
 0x446   :  { %7506 = vmatprep.subr.bf16.mxu1 %v8950_v57 }
 0x448   :  { %7546 = vmatpush2.bf16.msra.mxu0 %v8945_v18 }
 0x449   :  { %7547 = vmatprep.subr.bf16.mxu0 %v8953_v22  ;;  %7507 = vmatpush2.bf16.msra.mxu1 %v8948_v32 }
 0x44c   :  { %7548 = vmatpush2.bf16.msra.mxu0 %v8951_v16 }
 0x44d   :  { %v5474_v6 = vpop.f32.mrf.mxu1  ;;  %v5515_v8 = vpop.f32.mrf.mxu0  ;;  %7549 = vmatprep.subr.bf16.mxu0 %v8959_v3 }
 0x44e   :  { %v10194_v9 = vadd.f32 %v5474_v6, %v10164_v48  ;;  %v10197_v54 = vadd.f32 %v5515_v8, %v10167_v10  ;;  %v8956_v48 = vld [vmem:[#allocation16 + $0xa4] ss:$8 sps:$4 sm:$0xff]  }
 0x44f   :  { %v10199_v39 = vpop.f32.mrf.mxu1  ;;  %v5517_v60 = vpop.f32.mrf.mxu0  ;;  %7508 = vmatprep.subr.bf16.mxu1 %v8956_v48  ;;  %v10230_v48 = vsub.s32 2, %v10145_v49 }
 0x450   :  { %v10202_v15 = vadd.f32 %v5517_v60, %v10173_v29  ;;  %7509 = vmatpush2.bf16.msra.mxu1 %v8954_v41  ;;  %7550 = vmatpush2.bf16.msra.mxu0 %v8957_v20  ;;  %v8960_v29 = vld [vmem:[#allocation16 + $0x90] ss:$8 sps:$4 sm:$0xff]   ;;  %v5605_v41 = vadd.f32 %v10199_v39, %v10170_v28 }
 0x451   :  { %v5478_v46 = vpop.f32.mrf.mxu1  ;;  %v5519_v2 = vpop.f32.mrf.mxu0  ;;  %7510 = vmatprep.subr.bf16.mxu1 %v8962_v23  ;;  %7551 = vmatprep.subr.bf16.mxu0 %v8965_v0  ;;  %v6363_v0 = vrot.slane %v10157_v43, %v10230_v48 }
 0x452   :  { %v10227_v2 = vsub.s32 0, %v10145_v49 }
 0x453   :  { %v5479_v10 = vpop.f32.mrf.mxu1  ;;  %v5520_v25 = vpop.f32.mrf.mxu0 }
 0x454   :  { %7511 = vmatpush2.bf16.msra.mxu1 %v8960_v29  ;;  %7552 = vmatpush2.bf16.msra.mxu0 %v8963_v27  ;;  %v6355_v3 = vrot.slane %v10157_v43, %v10227_v2  ;;  %v10235_v10 = vsub.s32 1, %v10145_v49  ;;  %v10238_v25 = vsub.s32 3, %v10145_v49 }
 0x455   :  { %7512 = vmatprep.subr.bf16.mxu1 %v8968_v11  ;;  %7553 = vmatprep.subr.bf16.mxu0 %v8971_v40 }
 0x456   :  { %v6367_v28 = vrot.slane %v10157_v43, %v10238_v25 }
 0x458   :  { %7513 = vmatpush2.bf16.msra.mxu1 %v8966_v59  ;;  %7554 = vmatpush2.bf16.msra.mxu0 %v8969_v58 }
 0x459   :  { %7564 = vmatprep.subr.bf16.mxu1 %v8974_v37  ;;  %7605 = vmatprep.subr.bf16.mxu0 %v8977_v50 }
 0x45d   :  { %v5556_v1 = vpop.f32.mrf.mxu1  ;;  %v5597_v62 = vpop.f32.mrf.mxu0 }
 0x45e   :  { %v5608_v4 = vadd.f32 %v5556_v1, %v10182_v42  ;;  %v5610_v24 = vadd.f32 %v5597_v62, %v10185_v36  ;;  %v6359_v1 = vrot.slane %v10157_v43, %v10235_v10 }
 0x45f   :  { %v5558_v44 = vpop.f32.mrf.mxu1  ;;  %v5599_v53 = vpop.f32.mrf.mxu0 }
 0x460   :  { %v10213_v12 = vadd.f32 %v5558_v44, %v10188_v45  ;;  %v10216_v56 = vadd.f32 %v5599_v53, %v10191_v52 }
 0x461   :  { %v5560_v31 = vpop.f32.mrf.mxu1  ;;  %v5601_v51 = vpop.f32.mrf.mxu0 }
 0x463   :  { %v5561_v34 = vpop.f32.mrf.mxu1  ;;  %v5602_v55 = vpop.f32.mrf.mxu0 }
 0x46d   :  { %v5843_v35 = vpop.f32.mrf.mxu1  ;;  %v5884_v13 = vpop.f32.mrf.mxu0 }
 0x46e   :  { %v5973_v20 = vadd.f32 %v5843_v35, %v10194_v9  ;;  %v5975_v23 = vadd.f32 %v5884_v13, %v10197_v54 }
 0x46f   :  { %v5845_v61 = vpop.f32.mrf.mxu1  ;;  %v5886_v42 = vpop.f32.mrf.mxu0 }
 0x470   :  { %v5974_v11 = vadd.f32 %v5845_v61, %v5605_v41  ;;  %v5976_v40 = vadd.f32 %v5886_v42, %v10202_v15  ;;  %v10262_v41 = vsub.s32 7, %v10145_v49 }
 0x471   :  { %v5847_v5 = vpop.f32.mrf.mxu1  ;;  %v5888_v36 = vpop.f32.mrf.mxu0 }
 0x473   :  { %v5848_v19 = vpop.f32.mrf.mxu1  ;;  %v5889_v18 = vpop.f32.mrf.mxu0 }
 0x47d   :  { %v5925_v6 = vpop.f32.mrf.mxu1  ;;  %v5966_v8 = vpop.f32.mrf.mxu0 }
 0x47e   :  { %v10218_v57 = vadd.f32 %v5925_v6, %v5608_v4  ;;  %v10220_v45 = vadd.f32 %v5966_v8, %v5610_v24 }
 0x47f   :  { %v10222_v52 = vpop.f32.mrf.mxu1  ;;  %v10224_v22 = vpop.f32.mrf.mxu0 }
 0x481   :  { %v5929_v60 = vpop.f32.mrf.mxu1  ;;  %v5970_v32 = vpop.f32.mrf.mxu0 }
 0x483   :  { %v5930_v16 = vpop.f32.mrf.mxu1  ;;  %v5971_v46 = vpop.f32.mrf.mxu0 }
 0x48d   :  { %v6212_v29 = vpop.f32.mrf.mxu1  ;;  %v6253_v27 = vpop.f32.mrf.mxu0 }
 0x48e   :  { %v6342_v59 = vadd.f32 %v6212_v29, %v5973_v20  ;;  %v6344_v58 = vadd.f32 %v6253_v27, %v5975_v23 }
 0x48f   :  { %v6214_v37 = vpop.f32.mrf.mxu1  ;;  %v6255_v62 = vpop.f32.mrf.mxu0 }
 0x490   :  { %v6392_v9 = vadd.f32 %v6355_v3, %v6342_v59  ;;  %v6394_v54 = vadd.f32 %v6363_v0, %v6344_v58  ;;  %v6343_v39 = vadd.f32 %v6214_v37, %v5974_v11  ;;  %v6345_v50 = vadd.f32 %v6255_v62, %v5976_v40 }
 0x491   :  { %v6216_v4 = vpop.f32.mrf.mxu1  ;;  %v6257_v24 = vpop.f32.mrf.mxu0  ;;  %v10259_v3 = vsub.s32 5, %v10145_v49  ;;  %v6383_v62 = vrot.slane %v10157_v43, %v10262_v41 }
 0x492   :  { %vm6400_vm8 = vcmp.gt.f32.partialorder %v6392_v9, 0.0  ;;  %v6408_v44 = vmul.f32 0.01, %v6392_v9  ;;  %vm6402_vm9 = vcmp.gt.f32.partialorder %v6394_v54, 0.0  ;;  %v6410_v15 = vmul.f32 0.01, %v6394_v54 }
 0x493   :  { %v6393_v53 = vadd.f32 %v6359_v1, %v6343_v39  ;;  %v6395_v31 = vadd.f32 %v6367_v28, %v6345_v50  ;;  %v6217_v51 = vpop.f32.mrf.mxu1  ;;  %v6258_v34 = vpop.f32.mrf.mxu0  ;;  %v6375_v1 = vrot.slane %v10157_v43, %v10259_v3  ;;  %v5978_v39 = vadd.f32 %v10222_v52, %v10213_v12 }
 0x494   :  { %v6416_v55 = vsel %vm6400_vm8, %v6392_v9, %v6408_v44  ;;  %v6418_v35 = vsel %vm6402_vm9, %v6394_v54, %v6410_v15  ;;  %v5980_v50 = vadd.f32 %v10224_v22, %v10216_v56 }
 0x495   :  { %v6427_v13 = vsel %vm6426_vm7, %v6416_v55, 0.0  ;;  %v6441_v61 = vsel %vm6426_vm7, %v6418_v35, 0.0  ;;  %vm6401_vm10 = vcmp.gt.f32.partialorder %v6393_v53, 0.0  ;;  %v6409_v42 = vmul.f32 0.01, %v6393_v53 }
 0x496   :  { %v6428_v5 = vrot.slane %v6427_v13, 4  ;;  %v6442_v36 = vrot.slane %v6441_v61, 4  ;;  %vm6403_vm11 = vcmp.gt.f32.partialorder %v6395_v31, 0.0  ;;  %v6411_v19 = vmul.f32 0.01, %v6395_v31 }
 0x497   :  { %v6417_v18 = vsel %vm6401_vm10, %v6393_v53, %v6409_v42 }
 0x498   :  { %v6429_v6 = vadd.f32 %v6428_v5, %v6427_v13  ;;  %v6443_v8 = vadd.f32 %v6442_v36, %v6441_v61  ;;  %v6434_v60 = vsel %vm6426_vm7, %v6417_v18, 0.0  ;;  %v10254_v32 = vsel %vm6403_vm11, %v6395_v31, %v6411_v19 }
 0x499   :  { %v6435_v16 = vrot.slane %v6434_v60, 4  ;;  %v6448_v46 = vsel %vm6426_vm7, %v10254_v32, 0.0 }
 0x49a   :  { %v6430_v20 = vrot.slane %v6429_v6, 2  ;;  %v6444_v23 = vrot.slane %v6443_v8, 2  ;;  %v6449_v0 = vrot.slane %v6448_v46, 4 }
 0x49b   :  { %v6436_v29 = vadd.f32 %v6435_v16, %v6434_v60 }
 0x49c   :  { %v6431_v27 = vadd.f32 %v6430_v20, %v6429_v6  ;;  %v6445_v11 = vadd.f32 %v6444_v23, %v6443_v8  ;;  %v6450_v40 = vadd.f32 %v6449_v0, %v6448_v46 }
 0x49d   :  { %v6437_v59 = vrot.slane %v6436_v29, 2  ;;  %v6294_v58 = vpop.f32.mrf.mxu1  ;;  %v6335_v37 = vpop.f32.mrf.mxu0 }
 0x49e   :  { %v6432_v28 = vrot.slane %v6431_v27, 1  ;;  %v6446_v9 = vrot.slane %v6445_v11, 1  ;;  %v6451_v49 = vrot.slane %v6450_v40, 2  ;;  %v6346_v54 = vadd.f32 %v6294_v58, %v10218_v57 }
 0x49f   :  { %v6438_v4 = vadd.f32 %v6437_v59, %v6436_v29  ;;  %v6348_v24 = vadd.f32 %v6335_v37, %v10220_v45  ;;  %v6296_v44 = vpop.f32.mrf.mxu1  ;;  %v6337_v15 = vpop.f32.mrf.mxu0 }
 0x4a0   :  { %v6433_v53 = vadd.f32 %v6432_v28, %v6431_v27  ;;  %v6447_v31 = vadd.f32 %v6446_v9, %v6445_v11  ;;  %v6452_v51 = vadd.f32 %v6451_v49, %v6450_v40  ;;  %v6396_v34 = vadd.f32 %v6371_v47, %v6346_v54 }
 0x4a1   :  { %v6439_v13 = vrot.slane %v6438_v4, 1  ;;  %v6398_v12 = vadd.f32 %v6379_v26, %v6348_v24  ;;  %v6347_v57 = vadd.f32 %v6296_v44, %v5978_v39  ;;  %v6349_v52 = vadd.f32 %v6337_v15, %v5980_v50  ;;  %v6298_v56 = vpop.f32.mrf.mxu1  ;;  %v6339_v22 = vpop.f32.mrf.mxu0 }
 0x4a2   :  { %v6484_v61 = vmul.f32 0.5, %v6433_v53  ;;  %v6486_v45 = vmul.f32 0.5, %v6447_v31  ;;  %v6453_v42 = vrot.slane %v6452_v51, 1  ;;  %vm6404_vm12 = vcmp.gt.f32.partialorder %v6396_v34, 0.0 }
 0x4a3   :  { %v6440_v5 = vadd.f32 %v6439_v13, %v6438_v4  ;;  %v6412_v36 = vmul.f32 0.01, %v6396_v34  ;;  %vm6406_vm13 = vcmp.gt.f32.partialorder %v6398_v12, 0.0  ;;  %v6414_v19 = vmul.f32 0.01, %v6398_v12  ;;  %v6299_v6 = vpop.f32.mrf.mxu1  ;;  %v6340_v8 = vpop.f32.mrf.mxu0 }
 0x4a4   :  { %v10280_v47 = vsub.f32 %v6416_v55, %v6484_v61  ;;  %v10282_v60 = vsub.f32 %v6418_v35, %v6486_v45  ;;  %v6454_v43 = vadd.f32 %v6453_v42, %v6452_v51  ;;  %v6397_v0 = vadd.f32 %v6375_v1, %v6347_v57 }
 0x4a5   :  { %v6485_v26 = vmul.f32 0.5, %v6440_v5  ;;  %v10284_v16 = vsel %vm6404_vm12, %v6396_v34, %v6412_v36  ;;  %v10286_v46 = vsel %vm6406_vm13, %v6398_v12, %v6414_v19  ;;  %v6399_v29 = vadd.f32 %v6383_v62, %v6349_v52 }
 0x4a6   :  { %v6500_v20 = vmul.f32 %v10280_v47, %v10280_v47  ;;  %v6502_v23 = vmul.f32 %v10282_v60, %v10282_v60  ;;  %v6487_v55 = vmul.f32 0.5, %v6454_v43  ;;  %v6455_v35 = vsel %vm6426_vm7, %v10284_v16, 0.0 }
 0x4a7   :  { %v10292_v27 = vsub.f32 %v6417_v18, %v6485_v26  ;;  %v6469_v11 = vsel %vm6426_vm7, %v10286_v46, 0.0  ;;  %v6456_v58 = vrot.slane %v6455_v35, 4  ;;  %vm6405_vm14 = vcmp.gt.f32.partialorder %v6397_v0, 0.0 }
 0x4a8   :  { %v6508_v40 = vsel %vm6426_vm7, %v6500_v20, 0.0  ;;  %v6522_v59 = vsel %vm6426_vm7, %v6502_v23, 0.0  ;;  %v6470_v37 = vrot.slane %v6469_v11, 4  ;;  %v10303_v18 = vsub.f32 %v10254_v32, %v6487_v55 }
 0x4a9   :  { %v6509_v28 = vrot.slane %v6508_v40, 4  ;;  %v6523_v9 = vrot.slane %v6522_v59, 4  ;;  %v6501_v1 = vmul.f32 %v10292_v27, %v10292_v27  ;;  %v6457_v62 = vadd.f32 %v6456_v58, %v6455_v35 }
 0x4aa   :  { %v6471_v49 = vadd.f32 %v6470_v37, %v6469_v11  ;;  %v6413_v54 = vmul.f32 0.01, %v6397_v0  ;;  %v6503_v24 = vmul.f32 %v10303_v18, %v10303_v18  ;;  %vm6407_vm15 = vcmp.gt.f32.partialorder %v6399_v29, 0.0 }
 0x4ab   :  { %v6510_v39 = vadd.f32 %v6509_v28, %v6508_v40  ;;  %v6524_v50 = vadd.f32 %v6523_v9, %v6522_v59  ;;  %v6515_v4 = vsel %vm6426_vm7, %v6501_v1, 0.0  ;;  %v6458_v15 = vrot.slane %v6457_v62, 2 }
 0x4ac   :  { %v6516_v44 = vrot.slane %v6515_v4, 4  ;;  %v6472_v53 = vrot.slane %v6471_v49, 2  ;;  %v10308_v31 = vsel %vm6405_vm14, %v6397_v0, %v6413_v54  ;;  %v6529_v32 = vsel %vm6426_vm7, %v6503_v24, 0.0 }
 0x4ad   :  { %v6511_v51 = vrot.slane %v6510_v39, 2  ;;  %v6525_v34 = vrot.slane %v6524_v50, 2  ;;  %v6462_v13 = vsel %vm6426_vm7, %v10308_v31, 0.0  ;;  %v6530_v57 = vrot.slane %v6529_v32, 4 }
 0x4ae   :  { %v6517_v12 = vadd.f32 %v6516_v44, %v6515_v4  ;;  %v6459_v52 = vadd.f32 %v6458_v15, %v6457_v62  ;;  %v6473_v56 = vadd.f32 %v6472_v53, %v6471_v49  ;;  %v6463_v45 = vrot.slane %v6462_v13, 4 }
 0x4af   :  { %v6512_v22 = vadd.f32 %v6511_v51, %v6510_v39  ;;  %v6526_v61 = vadd.f32 %v6525_v34, %v6524_v50  ;;  %v6531_v5 = vadd.f32 %v6530_v57, %v6529_v32  ;;  %v6415_v26 = vmul.f32 0.01, %v6399_v29 }
 0x4b0   :  { %v6518_v42 = vrot.slane %v6517_v12, 2  ;;  %v6460_v36 = vrot.slane %v6459_v52, 1  ;;  %v6474_v19 = vrot.slane %v6473_v56, 1  ;;  %v6464_v43 = vadd.f32 %v6463_v45, %v6462_v13 }
 0x4b1   :  { %v6513_v6 = vrot.slane %v6512_v22, 1  ;;  %v6527_v8 = vrot.slane %v6526_v61, 1  ;;  %v6532_v23 = vrot.slane %v6531_v5, 2  ;;  %v10314_v59 = vsel %vm6407_vm15, %v6399_v29, %v6415_v26 }
 0x4b2   :  { %v6519_v20 = vadd.f32 %v6518_v42, %v6517_v12  ;;  %v6461_v0 = vadd.f32 %v6460_v36, %v6459_v52  ;;  %v6475_v55 = vadd.f32 %v6474_v19, %v6473_v56  ;;  %v6465_v40 = vrot.slane %v6464_v43, 2 }
 0x4b3   :  { %v6514_v35 = vadd.f32 %v6513_v6, %v6512_v22  ;;  %v6528_v11 = vadd.f32 %v6527_v8, %v6526_v61  ;;  %v6533_v37 = vadd.f32 %v6532_v23, %v6531_v5  ;;  %v6476_v54 = vsel %vm6426_vm7, %v10314_v59, 0.0 }
 0x4b4   :  { %v6520_v58 = vrot.slane %v6519_v20, 1  ;;  %v6488_v28 = vmul.f32 0.5, %v6461_v0  ;;  %v6490_v9 = vmul.f32 0.5, %v6475_v55  ;;  %v6466_v49 = vadd.f32 %v6465_v40, %v6464_v43 }
 0x4b5   :  { %v6564_v1 = vmul.f32 0.5, %v6514_v35  ;;  %v6566_v62 = vmul.f32 0.5, %v6528_v11  ;;  %v6534_v50 = vrot.slane %v6533_v37, 1  ;;  %v6477_v53 = vrot.slane %v6476_v54, 4 }
 0x4b6   :  { %v6521_v39 = vadd.f32 %v6520_v58, %v6519_v20  ;;  %v6496_v4 = vsub.f32 %v10284_v16, %v6488_v28  ;;  %v6498_v24 = vsub.f32 %v10286_v46, %v6490_v9  ;;  %v6467_v29 = vrot.slane %v6466_v49, 1 }
 0x4b7   :  { %v6621_v44 = vadd.f32 1e-05, %v6564_v1  ;;  %v6623_v15 = vadd.f32 1e-05, %v6566_v62  ;;  %v6535_v34 = vadd.f32 %v6534_v50, %v6533_v37  ;;  %v6478_v42 = vadd.f32 %v6477_v53, %v6476_v54 }
 0x4b8   :  { %v6565_v51 = vmul.f32 0.5, %v6521_v39  ;;  %v6504_v32 = vmul.f32 %v6496_v4, %v6496_v4  ;;  %v10323_v13 = vmul.f32 %v6592_v17, %v6496_v4  ;;  %v6506_v12 = vmul.f32 %v6498_v24, %v6498_v24 }
 0x4b9   :  { %9086 = vrsqrt.f32 %v6621_v44  ;;  %v10328_v16 = vmul.f32 %v6600_v21, %v6498_v24  ;;  %v6468_v46 = vadd.f32 %v6467_v29, %v6466_v49  ;;  %v6567_v52 = vmul.f32 0.5, %v6535_v34 }
 0x4ba   :  { %9088 = vrsqrt.f32 %v6623_v15  ;;  %v6622_v57 = vadd.f32 1e-05, %v6565_v51  ;;  %v6536_v56 = vsel %vm6426_vm7, %v6504_v32, 0.0  ;;  %v6550_v61 = vsel %vm6426_vm7, %v6506_v12, 0.0 }
 0x4bb   :  { %v6537_v22 = vrot.slane %v6536_v56, 4  ;;  %v6489_v45 = vmul.f32 0.5, %v6468_v46  ;;  %v6624_v17 = vadd.f32 1e-05, %v6567_v52  ;;  %v6551_v5 = vrot.slane %v6550_v61, 4 }
 0x4bc   :  { %9090 = vrsqrt.f32 %v6622_v57  ;;  %v6479_v21 = vrot.slane %v6478_v42, 2  ;;  %v6576_v23 = vrot.slane %v10175_v7, %v10227_v2  ;;  %v6584_v37 = vrot.slane %v10175_v7, %v10230_v48 }
 0x4bd   :  { %v6538_v36 = vadd.f32 %v6537_v22, %v6536_v56  ;;  %v10333_v19 = vsub.f32 %v10308_v31, %v6489_v45  ;;  %9092 = vrsqrt.f32 %v6624_v17  ;;  %v6552_v6 = vadd.f32 %v6551_v5, %v6550_v61 }
 0x4be   :  { %v6480_v26 = vadd.f32 %v6479_v21, %v6478_v42  ;;  %v6580_v1 = vrot.slane %v10175_v7, %v10235_v10  ;;  %v6613_v62 = vmul.f32 %v6576_v23, %v10280_v47  ;;  %v6653_v24 = vrot.slane %v10204_v38, %v10235_v10 }
 0x4bf   :  { %v6539_v8 = vrot.slane %v6538_v36, 2  ;;  %v6505_v43 = vmul.f32 %v10333_v19, %v10333_v19  ;;  %v6553_v20 = vrot.slane %v6552_v6, 2  ;;  %v6588_v44 = vrot.slane %v10175_v7, %v10238_v25 }
 0x4c0   :  { %v6481_v35 = vrot.slane %v6480_v26, 1  ;;  %v6649_v47 = vrot.slane %v10204_v38, %v10227_v2  ;;  %v6615_v34 = vmul.f32 %v6584_v37, %v10282_v60  ;;  %v6614_v46 = vmul.f32 %v6580_v1, %v10292_v27  ;;  %v8986_v1 = vld [vmem:[#allocation16 + $0x254] ss:$8 sps:$4 sm:$0xff]  }
 0x4c1   :  { %v6540_v0 = vadd.f32 %v6539_v8, %v6538_v36  ;;  %v6543_v55 = vsel %vm6426_vm7, %v6505_v43, 0.0  ;;  %v6554_v11 = vadd.f32 %v6553_v20, %v6552_v6  ;;  %v6657_v52 = vrot.slane %v10204_v38, %v10230_v48 }
 0x4c2   :  { %v6544_v40 = vrot.slane %v6543_v55, 4  ;;  %v6482_v58 = vadd.f32 %v6481_v35, %v6480_v26  ;;  %v6616_v27 = vmul.f32 %v6588_v44, %v10303_v18  ;;  %v8980_v35 = vld [vmem:[#allocation16 + $0x264] ss:$8 sps:$4 sm:$0xff]  }
 0x4c3   :  { %v6541_v31 = vrot.slane %v6540_v0, 1  ;;  %v6555_v28 = vrot.slane %v6554_v11, 1 }
 0x4c4   :  { %v6545_v9 = vadd.f32 %v6544_v40, %v6543_v55  ;;  %v6491_v54 = vmul.f32 0.5, %v6482_v58  ;;  %v8975_v58 = vld [vmem:[#allocation16 + $0x370] ss:$8 sps:$4 sm:$0xff]  }
 0x4c5   :  { %v6542_v49 = vadd.f32 %v6541_v31, %v6540_v0  ;;  %v6556_v50 = vadd.f32 %v6555_v28, %v6554_v11  ;;  %v8978_v28 = vld [vmem:[#allocation16 + $0x260] ss:$8 sps:$4 sm:$0xff]  }
 0x4c6   :  { %v9087_v39 = vpop.eup %9086  ;;  %v6546_v4 = vrot.slane %v6545_v9, 2  ;;  %v10350_v51 = vsub.f32 %v10314_v59, %v6491_v54  ;;  %v6661_v59 = vrot.slane %v10204_v38, %v10238_v25  ;;  %v8972_v25 = vld [vmem:[#allocation16 + $0x270] ss:$8 sps:$4 sm:$0xff]  }
 0x4c7   :  { %v9089_v15 = vpop.eup %9088  ;;  %v6637_v29 = vmul.f32 %v9087_v39, %v6613_v62  ;;  %v6568_v53 = vmul.f32 0.5, %v6542_v49  ;;  %v6570_v32 = vmul.f32 0.5, %v6556_v50  ;;  %v8981_v49 = vld [vmem:[#allocation16 + $0x360] ss:$8 sps:$4 sm:$0xff]   ;;  %v8984_v39 = vld [vmem:[#allocation16 + $0x250] ss:$8 sps:$4 sm:$0xff]  }
 0x4c8   :  { %v6547_v12 = vadd.f32 %v6546_v4, %v6545_v9  ;;  %v6507_v22 = vmul.f32 %v10350_v51, %v10350_v51  ;;  %v6639_v61 = vmul.f32 %v9089_v15, %v6615_v34  ;;  %v8983_v9 = vld [vmem:[#allocation16 + $0x364] ss:$8 sps:$4 sm:$0xff]   ;;  %v8989_v50 = vld [vmem:[#allocation16 + $0x354] ss:$8 sps:$4 sm:$0xff]  }
 0x4c9   :  { %v9091_v57 = vpop.eup %9090  ;;  %v6625_v56 = vadd.f32 1e-05, %v6568_v53  ;;  %v6627_v45 = vadd.f32 1e-05, %v6570_v32  ;;  %v6686_v36 = vadd.f32 %v6649_v47, %v6637_v29  ;;  %v8992_v4 = vld [vmem:[#allocation16 + $0x244] ss:$8 sps:$4 sm:$0xff]  }
 0x4ca   :  { %v6548_v42 = vrot.slane %v6547_v12, 1  ;;  %v6638_v17 = vmul.f32 %v9091_v57, %v6614_v46  ;;  %v9093_v60 = vpop.eup %9092  ;;  %v6557_v5 = vsel %vm6426_vm7, %v6507_v22, 0.0  ;;  %v6688_v23 = vadd.f32 %v6657_v52, %v6639_v61  ;;  %v8987_v53 = vld [vmem:[#allocation16 + $0x350] ss:$8 sps:$4 sm:$0xff]   ;;  %v8990_v32 = vld [vmem:[#allocation16 + $0x240] ss:$8 sps:$4 sm:$0xff]  }
 0x4cb   :  { %9094 = vrsqrt.f32 %v6625_v56  ;;  %v6558_v21 = vrot.slane %v6557_v5, 4  ;;  %v6640_v8 = vmul.f32 %v9093_v60, %v6616_v27  ;;  %v6694_v55 = vpack.c.bf16 %v6686_v36, %v6686_v36  ;;  %v8998_v57 = vld [vmem:[#allocation16 + $0x234] ss:$8 sps:$4 sm:$0xff]   ;;  %v8996_v56 = vld [vmem:[#allocation16 + $0x230] ss:$8 sps:$4 sm:$0xff]  }
 0x4cc   :  { %9096 = vrsqrt.f32 %v6627_v45  ;;  %v6549_v48 = vadd.f32 %v6548_v42, %v6547_v12  ;;  %v6687_v6 = vadd.f32 %v6653_v24, %v6638_v17  ;;  %v6696_v37 = vpack.c.bf16 %v6688_v23, %v6688_v23  ;;  %v8995_v12 = vld [vmem:[#allocation16 + $0x344] ss:$8 sps:$4 sm:$0xff]   ;;  %v9001_v61 = vld [vmem:[#allocation16 + $0x334] ss:$8 sps:$4 sm:$0xff]   ;;  %v8999_v42 = vld [vmem:[#allocation16 + $0x330] ss:$8 sps:$4 sm:$0xff]  }
 0x4cd   :  { %v6559_v26 = vadd.f32 %v6558_v21, %v6557_v5  ;;  %v6689_v0 = vadd.f32 %v6661_v59, %v6640_v8  ;;  %v6596_v46 = vrot.slane %v10175_v7, %v10259_v3  ;;  %v6669_v59 = vrot.slane %v10204_v38, %v10259_v3  ;;  %v9002_v17 = vld [vmem:[#allocation16 + $0x220] ss:$8 sps:$4 sm:$0xff]   ;;  %v9010_v5 = vld [vmem:[#allocation16 + $0x214] ss:$8 sps:$4 sm:$0xff]   ;;  %v9008_v36 = vld [vmem:[#allocation16 + $0x210] ss:$8 sps:$4 sm:$0xff]  }
 0x4ce   :  { %v6569_v43 = vmul.f32 0.5, %v6549_v48  ;;  %v6695_v20 = vpack.c.bf16 %v6687_v6, %v6687_v6  ;;  %v9005_v3 = vld [vmem:[#allocation16 + $0x320] ss:$8 sps:$4 sm:$0xff]   ;;  %v9013_v27 = vld [vmem:[#allocation16 + $0x314] ss:$8 sps:$4 sm:$0xff]   ;;  %v6677_v21 = vrot.slane %v10204_v38, %v10262_v41 }
 0x4cf   :  { %v6560_v40 = vrot.slane %v6559_v26, 2  ;;  %v6697_v31 = vpack.c.bf16 %v6689_v0, %v6689_v0  ;;  %v6618_v22 = vmul.f32 %v6596_v46, %v10333_v19  ;;  %v6604_v19 = vrot.slane %v10175_v7, %v10262_v41  ;;  %v9016_v6 = vld [vmem:[#allocation16 + $0x204] ss:$8 sps:$4 sm:$0xff]   ;;  %v9022_v23 = vld [vmem:[#allocation16 + $0x2f4] ss:$8 sps:$4 sm:$0xff]  }
 0x4d0   :  { %v6626_v11 = vadd.f32 1e-05, %v6569_v43  ;;  %7514 = vmatprep.mubr.bf16.mxu1 %v6695_v20  ;;  %v9011_v43 = vld [vmem:[#allocation16 + $0x310] ss:$8 sps:$4 sm:$0xff]   ;;  %v9019_v7 = vld [vmem:[#allocation16 + $0x304] ss:$8 sps:$4 sm:$0xff]  }
 0x4d1   :  { %7515 = vmatmul.mubr.bf16.vlgmr.msra.gmra.mxu1 %v6694_v55  ;;  %v6561_v18 = vadd.f32 %v6560_v40, %v6559_v26  ;;  %7555 = vmatprep.mubr.bf16.mxu0 %v6697_v31  ;;  %v6620_v48 = vmul.f32 %v6604_v19, %v10350_v51  ;;  %v9014_v20 = vld [vmem:[#allocation16 + $0x200] ss:$8 sps:$4 sm:$0xff]   ;;  %v9025_v51 = vld [vmem:[#allocation16 + $0x3f4] ss:$8 sps:$4 sm:$0xff]   ;;  %v9020_v38 = vld [vmem:[#allocation16 + $0x2f0] ss:$8 sps:$4 sm:$0xff]  }
 0x4d2   :  { %9098 = vrsqrt.f32 %v6626_v11  ;;  %7565 = vmatpush1.bf16.msra.mxu1 %v8972_v25  ;;  %7556 = vmatmul.mubr.bf16.vlgmr.msra.gmra.mxu0 %v6696_v37  ;;  %v9017_v0 = vld [vmem:[#allocation16 + $0x300] ss:$8 sps:$4 sm:$0xff]   ;;  %v9028_v41 = vld [vmem:[#allocation16 + $0x2e4] ss:$8 sps:$4 sm:$0xff]   ;;  %v9034_v31 = vld [vmem:[#allocation16 + $0x2d4] ss:$8 sps:$4 sm:$0xff]  }
 0x4d3   :  { %7566 = vmatprep.subr.bf16.mxu1 %v8980_v35  ;;  %v6562_v62 = vrot.slane %v6561_v18, 1  ;;  %7606 = vmatpush1.bf16.msra.mxu0 %v8975_v58  ;;  %v9023_v35 = vld [vmem:[#allocation16 + $0x3f0] ss:$8 sps:$4 sm:$0xff]   ;;  %v9031_v11 = vld [vmem:[#allocation16 + $0x3e4] ss:$8 sps:$4 sm:$0xff]  }
 0x4d4   :  { %7607 = vmatprep.subr.bf16.mxu0 %v8983_v9  ;;  %v9026_v40 = vld [vmem:[#allocation16 + $0x2e0] ss:$8 sps:$4 sm:$0xff]   ;;  %v9032_v37 = vld [vmem:[#allocation16 + $0x2d0] ss:$8 sps:$4 sm:$0xff]   ;;  %v9067_v46 = vld [vmem:[#allocation16 + $0x384] ss:$8 sps:$4 sm:$0xff]  }
 0x4d5   :  { %v6563_v54 = vadd.f32 %v6562_v62, %v6561_v18  ;;  %v9029_v58 = vld [vmem:[#allocation16 + $0x3e0] ss:$8 sps:$4 sm:$0xff]   ;;  %v9037_v18 = vld [vmem:[#allocation16 + $0x3d4] ss:$8 sps:$4 sm:$0xff]   ;;  %v9035_v9 = vld [vmem:[#allocation16 + $0x3d0] ss:$8 sps:$4 sm:$0xff]  }
 0x4d6   :  { %7567 = vmatpush1.bf16.msra.mxu1 %v8978_v28  ;;  %v9040_v28 = vld [vmem:[#allocation16 + $0x2c4] ss:$8 sps:$4 sm:$0xff]   ;;  %v9038_v62 = vld [vmem:[#allocation16 + $0x2c0] ss:$8 sps:$4 sm:$0xff]  }
 0x4d7   :  { %7568 = vmatprep.subr.bf16.mxu1 %v8986_v1  ;;  %v6571_v44 = vmul.f32 0.5, %v6563_v54  ;;  %7608 = vmatpush1.bf16.msra.mxu0 %v8981_v49  ;;  %v9043_v1 = vld [vmem:[#allocation16 + $0x3c4] ss:$8 sps:$4 sm:$0xff]   ;;  %v9046_v49 = vld [vmem:[#allocation16 + $0x2b4] ss:$8 sps:$4 sm:$0xff]  }
 0x4d8   :  { %v9095_v24 = vpop.eup %9094  ;;  %7609 = vmatprep.subr.bf16.mxu0 %v8989_v50  ;;  %v9041_v54 = vld [vmem:[#allocation16 + $0x3c0] ss:$8 sps:$4 sm:$0xff]   ;;  %v9044_v50 = vld [vmem:[#allocation16 + $0x2b0] ss:$8 sps:$4 sm:$0xff]  }
 0x4d9   :  { %v9097_v15 = vpop.eup %9096  ;;  %v6641_v29 = vmul.f32 %v9095_v24, %v10323_v13  ;;  %v6628_v34 = vadd.f32 1e-05, %v6571_v44  ;;  %v9047_v24 = vld [vmem:[#allocation16 + $0x3b0] ss:$8 sps:$4 sm:$0xff]   ;;  %v9055_v44 = vld [vmem:[#allocation16 + $0x3a4] ss:$8 sps:$4 sm:$0xff]  }
 0x4da   :  { %v6643_v47 = vmul.f32 %v9097_v15, %v10328_v16  ;;  %7569 = vmatpush1.bf16.msra.mxu1 %v8984_v39  ;;  %v8993_v16 = vld [vmem:[#allocation16 + $0x340] ss:$8 sps:$4 sm:$0xff]   ;;  %v9049_v39 = vld [vmem:[#allocation16 + $0x3b4] ss:$8 sps:$4 sm:$0xff]  }
 0x4db   :  { %7570 = vmatprep.subr.bf16.mxu1 %v8992_v4  ;;  %v10371_v52 = vadd.f32 %v6665_v63, %v6641_v29  ;;  %9100 = vrsqrt.f32 %v6628_v34  ;;  %7610 = vmatpush1.bf16.msra.mxu0 %v8987_v53  ;;  %v9004_v63 = vld [vmem:[#allocation16 + $0x224] ss:$8 sps:$4 sm:$0xff]   ;;  %v9050_v15 = vld [vmem:[#allocation16 + $0x2a0] ss:$8 sps:$4 sm:$0xff]   ;;  %v9058_v29 = vld [vmem:[#allocation16 + $0x294] ss:$8 sps:$4 sm:$0xff]  }
 0x4dc   :  { %v10376_v13 = vadd.f32 %v6673_v30, %v6643_v47  ;;  %7611 = vmatprep.subr.bf16.mxu0 %v8995_v12  ;;  %v9007_v30 = vld [vmem:[#allocation16 + $0x324] ss:$8 sps:$4 sm:$0xff]   ;;  %v9053_v53 = vld [vmem:[#allocation16 + $0x3a0] ss:$8 sps:$4 sm:$0xff]   ;;  %v9061_v47 = vld [vmem:[#allocation16 + $0x394] ss:$8 sps:$4 sm:$0xff]  }
 0x4dd   :  { %v9052_v4 = vld [vmem:[#allocation16 + $0x2a4] ss:$8 sps:$4 sm:$0xff]   ;;  %v9056_v34 = vld [vmem:[#allocation16 + $0x290] ss:$8 sps:$4 sm:$0xff]  }
 0x4de   :  { %7571 = vmatpush1.bf16.msra.mxu1 %v8990_v32  ;;  %v9064_v32 = vld [vmem:[#allocation16 + $0x284] ss:$8 sps:$4 sm:$0xff]   ;;  %v9059_v12 = vld [vmem:[#allocation16 + $0x390] ss:$8 sps:$4 sm:$0xff]  }
 0x4df   :  { %v9099_v33 = vpop.eup %9098  ;;  %7572 = vmatprep.subr.bf16.mxu1 %v8998_v57  ;;  %7612 = vmatpush1.bf16.msra.mxu0 %v8993_v16  ;;  %v9062_v57 = vld [vmem:[#allocation16 + $0x280] ss:$8 sps:$4 sm:$0xff]  }
 0x4e0   :  { %v6642_v45 = vmul.f32 %v9099_v33, %v6618_v22  ;;  %7613 = vmatprep.subr.bf16.mxu0 %v9001_v61  ;;  %v9065_v16 = vld [vmem:[#allocation16 + $0x380] ss:$8 sps:$4 sm:$0xff]   ;;  %v6700_v22 = vpack.c.bf16 %v10376_v13, %v10376_v13 }
 0x4e1   :  { %v9069_v61 = vld [vmem:[%s10465_s13 + $0x38] sm:$0xff]   ;;  %v9071_v33 = vld [vmem:[%s10465_s13 + $0x30] sm:$0xff]   ;;  %v9072_v13 = vld [vmem:[%s10465_s13 + $0x68] sm:$0xff]  }
 0x4e2   :  { %v6691_v14 = vadd.f32 %v6669_v59, %v6642_v45  ;;  %7573 = vmatpush1.bf16.msra.mxu1 %v8996_v56  ;;  %v6698_v56 = vpack.c.bf16 %v10371_v52, %v10371_v52  ;;  %v9068_v59 = vld [vmem:[%s10465_s13 + $0x78] sm:$0xff]   ;;  %v9070_v52 = vld [vmem:[%s10465_s13 + $0x70] sm:$0xff]   ;;  %v9074_v45 = vld [vmem:[%s10465_s13 + $0x60] sm:$0xff]  }
 0x4e3   :  { %7574 = vmatprep.subr.bf16.mxu1 %v9004_v63  ;;  %7614 = vmatpush1.bf16.msra.mxu0 %v8999_v42  ;;  %v9073_v63 = vld [vmem:[%s10465_s13 + $0x28] sm:$0xff]   ;;  %v9075_v42 = vld [vmem:[%s10465_s13 + $0x20] sm:$0xff]   ;;  %v9077_v19 = vld [vmem:[%s10465_s13 + $0x18] sm:$0xff]  }
 0x4e4   :  { %v6699_v60 = vpack.c.bf16 %v6691_v14, %v6691_v14  ;;  %7615 = vmatprep.subr.bf16.mxu0 %v9007_v30  ;;  %v9076_v30 = vld [vmem:[%s10465_s13 + $0x58] sm:$0xff]  }
 0x4e6   :  { %7596 = vmatprep.mubr.bf16.mxu1 %v6699_v60  ;;  %7575 = vmatpush1.bf16.msra.mxu1 %v9002_v17 }
 0x4e7   :  { %7576 = vmatprep.subr.bf16.mxu1 %v9010_v5  ;;  %7616 = vmatpush1.bf16.msra.mxu0 %v9005_v3  ;;  %v9078_v3 = vld [vmem:[%s10465_s13 + $0x50] sm:$0xff]  }
 0x4e8   :  { %v9101_v8 = vpop.eup %9100  ;;  %7617 = vmatprep.subr.bf16.mxu0 %v9013_v27 }
 0x4e9   :  { %v6644_v26 = vmul.f32 %v9101_v8, %v6620_v48 }
 0x4ea   :  { %7577 = vmatpush1.bf16.msra.mxu1 %v9008_v36 }
 0x4eb   :  { %v6693_v25 = vadd.f32 %v6677_v21, %v6644_v26  ;;  %7578 = vmatprep.subr.bf16.mxu1 %v9016_v6  ;;  %7618 = vmatpush1.bf16.msra.mxu0 %v9011_v43  ;;  %v9079_v21 = vld [vmem:[%s10465_s13 + $0x10] sm:$0xff]   ;;  %v9080_v6 = vld [vmem:[%s10465_s13 + $0x48] sm:$0xff]   ;;  %v9082_v26 = vld [vmem:[%s10465_s13 + $0x40] sm:$0xff]  }
 0x4ec   :  { %7619 = vmatprep.subr.bf16.mxu0 %v9019_v7  ;;  %v9081_v43 = vld [vmem:[%s10465_s13 + $0x8] sm:$0xff]   ;;  %v9083_v7 = vld [vmem:[%s10465_s13] sm:$0xff]   ;;  %s9512_s13 = smov [#allocation29]  }
 0x4ed   :  { %v6701_v55 = vpack.c.bf16 %v6693_v25, %v6693_v25  ;;  %s8035_s22 = sshll.u32 %s9512_s13, 4  ;;  %s8036_s22 = int_to_ptr.vmem [resolvable:$true] %s8035_s22 }
 0x4ee   :  { %7579 = vmatpush1.bf16.msra.mxu1 %v9014_v20  ;;  %v6830_v20 = vld [vmem:[#allocation17] sm:$0x3]  ;;  %s9448_s2 = scalar_lea.vmem %s8036_s22, 32  ;;  %p9453_p2 = scmp.lt.s32.totalorder %s8036_s22, %s8036_s22 }
 0x4ef   :  { %7637 = vmatprep.mubr.bf16.mxu0 %v6701_v55  ;;  %7580 = vmatprep.subr.bf16.mxu1 %v9022_v23  ;;  %v6835_v25 = vrot.slane %v6830_v20, %v10227_v2  ;;  %v6839_v23 = vrot.slane %v6830_v20, %v10235_v10  ;;  %p9449_p1 = scmp.ne.s32.totalorder %s8036_s22, %s9448_s2  ;;  %p9454_p3 = scmp.lt.s32.totalorder %s9448_s2, %s9448_s2 }
 0x4f0   :  { %7620 = vmatpush1.bf16.msra.mxu0 %v9017_v0 }
 0x4f1   :  { %7621 = vmatprep.subr.bf16.mxu0 %v9025_v51  ;;  %p9455_p4 = por %p9454_p3, %p9453_p2 }
 0x4f2   :  { %7581 = vmatpush2.bf16.msra.mxu1 %v9020_v38 }
 0x4f3   :  { %7582 = vmatprep.subr.bf16.mxu1 %v9028_v41  ;;  %p9456_p5 = pnand %p9455_p4, %p9449_p1 }
 0x4f4   :  { %7622 = vmatpush2.bf16.msra.mxu0 %v9023_v35 }
 0x4f5   :  { %7623 = vmatprep.subr.bf16.mxu0 %v9031_v11 }
 0x4f6   :  { %7583 = vmatpush2.bf16.msra.mxu1 %v9026_v40 }
 0x4f7   :  { %7584 = vmatprep.subr.bf16.mxu1 %v9034_v31 }
 0x4f8   :  { %7624 = vmatpush2.bf16.msra.mxu0 %v9029_v58 }
 0x4f9   :  { %7625 = vmatprep.subr.bf16.mxu0 %v9037_v18 }
 0x4fa   :  { %7585 = vmatpush2.bf16.msra.mxu1 %v9032_v37 }
 0x4fb   :  { %7586 = vmatprep.subr.bf16.mxu1 %v9040_v28 }
 0x4fc   :  { %7626 = vmatpush2.bf16.msra.mxu0 %v9035_v9 }
 0x4fd   :  { %7627 = vmatprep.subr.bf16.mxu0 %v9043_v1 }
 0x4fe   :  { %7587 = vmatpush2.bf16.msra.mxu1 %v9038_v62 }
 0x4ff   :  { %7588 = vmatprep.subr.bf16.mxu1 %v9046_v49 }
 0x500   :  { %7628 = vmatpush2.bf16.msra.mxu0 %v9041_v54 }
 0x501   :  { %7629 = vmatprep.subr.bf16.mxu0 %v9049_v39 }
 0x502   :  { %7589 = vmatpush2.bf16.msra.mxu1 %v9044_v50 }
 0x503   :  { %7590 = vmatprep.subr.bf16.mxu1 %v9052_v4 }
 0x504   :  { %7630 = vmatpush2.bf16.msra.mxu0 %v9047_v24 }
 0x505   :  { %7631 = vmatprep.subr.bf16.mxu0 %v9055_v44 }
 0x506   :  { %7591 = vmatpush2.bf16.msra.mxu1 %v9050_v15 }
 0x507   :  { %7592 = vmatprep.subr.bf16.mxu1 %v9058_v29 }
 0x508   :  { %7632 = vmatpush2.bf16.msra.mxu0 %v9053_v53 }
 0x509   :  { %7633 = vmatprep.subr.bf16.mxu0 %v9061_v47 }
 0x50a   :  { %7593 = vmatpush2.bf16.msra.mxu1 %v9056_v34 }
 0x50b   :  { %7594 = vmatprep.subr.bf16.mxu1 %v9064_v32 }
 0x50c   :  { %7634 = vmatpush2.bf16.msra.mxu0 %v9059_v12 }
 0x50d   :  { %7635 = vmatprep.subr.bf16.mxu0 %v9067_v46 }
 0x50e   :  { %7595 = vmatpush2.bf16.msra.mxu1 %v9062_v57 }
 0x50f   :  { %8791 = vmatprep.subr.bf16.mxu1 %v9068_v59 }
 0x510   :  { %7636 = vmatpush2.bf16.msra.mxu0 %v9065_v16 }
 0x511   :  { %7597 = vmatmul.mubr.bf16.vlgmr.msra.gmra.mxu1 %v6698_v56 }
 0x512   :  { %8792 = vmatpush3.bf16.msra.mxu1 %v9069_v61 }
 0x513   :  { %7638 = vmatmul.mubr.bf16.vlgmr.msra.gmra.mxu0 %v6700_v22  ;;  %8793 = vmatprep.subr.bf16.mxu1 %v9070_v52 }
 0x516   :  { %8794 = vmatpush3.bf16.msra.mxu1 %v9071_v33 }
 0x517   :  { %8795 = vmatprep.subr.bf16.mxu1 %v9072_v13 }
 0x51a   :  { %8796 = vmatpush3.bf16.msra.mxu1 %v9073_v63 }
 0x51b   :  { %8797 = vmatprep.subr.bf16.mxu1 %v9074_v45 }
 0x51e   :  { %8798 = vmatpush3.bf16.msra.mxu1 %v9075_v42 }
 0x51f   :  { %8799 = vmatprep.subr.bf16.mxu1 %v9076_v30 }
 0x522   :  { %8800 = vmatpush3.bf16.msra.mxu1 %v9077_v19 }
 0x523   :  { %8801 = vmatprep.subr.bf16.mxu1 %v9078_v3 }
 0x526   :  { %8802 = vmatpush3.bf16.msra.mxu1 %v9079_v21 }
 0x527   :  { %8803 = vmatprep.subr.bf16.mxu1 %v9080_v6 }
 0x52a   :  { %8804 = vmatpush3.bf16.msra.mxu1 %v9081_v43 }
 0x52b   :  { %8805 = vmatprep.subr.bf16.mxu1 %v9082_v26 }
 0x52e   :  { %8806 = vmatpush3.bf16.msra.mxu1 %v9083_v7  ;;  %v7652_v7 = vld [vmem:[#allocation19] sm:$0x3] }
 0x52f   :  { %v7694_v20 = vrot.slane %v7652_v7, %v10227_v2 }
 0x591   :  { %v7516_v14 = vpop.f32.mrf.mxu1 }
 0x592   :  { %v7557_v60 = vpop.f32.mrf.mxu0  ;;  %v7517_v0 = vadd.f32 %v7516_v14, %v6835_v25  ;;  %v7698_v25 = vrot.slane %v7652_v7, %v10235_v10 }
 0x593   :  { %v7518_v17 = vpop.f32.mrf.mxu1 }
 0x594   :  { %v7559_v27 = vpop.f32.mrf.mxu0  ;;  %v7519_v55 = vadd.f32 %v7518_v17, %v6839_v23  ;;  %v7558_v51 = vadd.f32 %v7557_v60, %v7517_v0  ;;  %v7653_v23 = vld [vmem:[#allocation20] sm:$0x3] }
 0x595   :  { %v7520_v5 = vpop.f32.mrf.mxu1 }
 0x596   :  { %v7561_v48 = vpop.f32.mrf.mxu0  ;;  %v7560_v41 = vadd.f32 %v7559_v27, %v7519_v55 }
 0x597   :  { %v7521_v36 = vpop.f32.mrf.mxu1 }
 0x598   :  { %v7562_v8 = vpop.f32.mrf.mxu0 }
 0x5d1   :  { %v7598_v38 = vpop.f32.mrf.mxu1 }
 0x5d2   :  { %v7599_v35 = vadd.f32 %v7598_v38, %v7558_v51  ;;  %v7713_v51 = vrot.slane %v7653_v23, %v10227_v2  ;;  %v7945_v2 = vld [vmem:[#allocation26 + $0x28] sm:$0xff] }
 0x5d3   :  { %v7639_v11 = vpop.f32.mrf.mxu0  ;;  %v7600_v40 = vpop.f32.mrf.mxu1 }
 0x5d4   :  { %v7640_v31 = vadd.f32 %v7639_v11, %v7599_v35  ;;  %v7601_v58 = vadd.f32 %v7600_v40, %v7560_v41  ;;  %v7717_v35 = vrot.slane %v7653_v23, %v10235_v10  ;;  %v7944_v10 = vld [vmem:[#allocation26 + $0x20] sm:$0xff] }
 0x5d5   :  { %v7641_v18 = vpop.f32.mrf.mxu0  ;;  %v7602_v37 = vpop.f32.mrf.mxu1 }
 0x5d6   :  { %vm7646_vm0 = vcmp.gt.f32.partialorder %v7640_v31, 0.0  ;;  %v7648_v28 = vmul.f32 0.01, %v7640_v31  ;;  %v7642_v9 = vadd.f32 %v7641_v18, %v7601_v58 }
 0x5d7   :  { %v7643_v1 = vpop.f32.mrf.mxu0  ;;  %v7603_v62 = vpop.f32.mrf.mxu1 }
 0x5d8   :  { %v7650_v49 = vsel %vm7646_vm0, %v7640_v31, %v7648_v28  ;;  %vm7647_vm1 = vcmp.gt.f32.partialorder %v7642_v9, 0.0  ;;  %v7649_v54 = vmul.f32 0.01, %v7642_v9  ;;  %v7947_v28 = vld [vmem:[#allocation26 + $0x38] sm:$0xff]  ;;  %v7946_v1 = vld [vmem:[#allocation26 + $0x30] sm:$0xff] }
 0x5d9   :  { %v7654_v39 = vsel %vm6426_vm7, %v7650_v49, 0.0  ;;  %v7644_v50 = vpop.f32.mrf.mxu0  ;;  %v7943_v62 = vld [vmem:[#allocation26 + $0x18] sm:$0xff] }
 0x5da   :  { %v7655_v4 = vrot.slane %v7654_v39, 4  ;;  %v7651_v24 = vsel %vm7647_vm1, %v7642_v9, %v7649_v54  ;;  %v9510_v9 = vmov 0.0   ;;  %v7941_v54 = vld [vmem:[#allocation26 + $0x8] sm:$0xff] }
 0x5db   :  { %v7661_v44 = vsel %vm6426_vm7, %v7651_v24, 0.0  ;;  %8832 = vmatprep.subr.mxu0 %v9510_v9  ;;  %8848 = vmatprep.mubr.msk.f32.mxu0 %vm9511_vm2, %v9510_v9 }
 0x5dc   :  { %v7656_v15 = vadd.f32 %v7655_v4, %v7654_v39  ;;  %v7662_v29 = vrot.slane %v7661_v44, 4  ;;  %8833 = vmatpush3.msra.mxu0 %v7947_v28  ;;  %v7940_v39 = vld [vmem:[#allocation26] sm:$0xff]  ;;  %v8764_v4 = vld [vmem:[#allocation22] ss:$0 sm:$0xff] }
 0x5dd   :  { %8834 = vmatprep.subr.mxu0 %v9510_v9 }
 0x5de   :  { %v7657_v53 = vrot.slane %v7656_v15, 2  ;;  %v7663_v47 = vadd.f32 %v7662_v29, %v7661_v44  ;;  %8835 = vmatpush3.msra.mxu0 %v7946_v1 }
 0x5df   :  { %8836 = vmatprep.subr.mxu0 %v9510_v9 }
 0x5e0   :  { %v7658_v34 = vadd.f32 %v7657_v53, %v7656_v15  ;;  %v7664_v32 = vrot.slane %v7663_v47, 2  ;;  %8837 = vmatpush3.msra.mxu0 %v7945_v2 }
 0x5e1   :  { %8838 = vmatprep.subr.mxu0 %v9510_v9 }
 0x5e2   :  { %v7659_v12 = vrot.slane %v7658_v34, 1  ;;  %v7665_v46 = vadd.f32 %v7664_v32, %v7663_v47  ;;  %8839 = vmatpush3.msra.mxu0 %v7944_v10 }
 0x5e3   :  { %8840 = vmatprep.subr.mxu0 %v9510_v9 }
 0x5e4   :  { %v7660_v57 = vadd.f32 %v7659_v12, %v7658_v34  ;;  %v7666_v16 = vrot.slane %v7665_v46, 1  ;;  %8841 = vmatpush3.msra.mxu0 %v7943_v62 }
 0x5e5   :  { %8842 = vmatprep.subr.mxu0 %v9510_v9 }
 0x5e6   :  { %v7668_v56 = vmul.f32 0.5, %v7660_v57  ;;  %v7667_v22 = vadd.f32 %v7666_v16, %v7665_v46 }
 0x5e8   :  { %v7670_v59 = vsub.f32 %v7650_v49, %v7668_v56  ;;  %v7669_v61 = vmul.f32 0.5, %v7667_v22  ;;  %v7942_v49 = vld [vmem:[#allocation26 + $0x10] sm:$0xff] }
 0x5e9   :  { %8843 = vmatpush3.msra.mxu0 %v7942_v49 }
 0x5ea   :  { %v7672_v52 = vmul.f32 %v7670_v59, %v7670_v59  ;;  %v7671_v33 = vsub.f32 %v7651_v24, %v7669_v61  ;;  %v7701_v0 = vmul.f32 %v7694_v20, %v7670_v59  ;;  %8844 = vmatprep.subr.mxu0 %v9510_v9 }
 0x5eb   :  { %8845 = vmatpush3.msra.mxu0 %v7941_v54 }
 0x5ec   :  { %v7674_v13 = vsel %vm6426_vm7, %v7672_v52, 0.0  ;;  %v7673_v63 = vmul.f32 %v7671_v33, %v7671_v33  ;;  %v7702_v41 = vmul.f32 %v7698_v25, %v7671_v33  ;;  %8846 = vmatprep.subr.mxu0 %v9510_v9 }
 0x5ed   :  { %v7675_v45 = vrot.slane %v7674_v13, 4  ;;  %8847 = vmatpush3.msra.mxu0 %v7940_v39 }
 0x5ee   :  { %v7681_v42 = vsel %vm6426_vm7, %v7673_v63, 0.0 }
 0x5ef   :  { %v7676_v14 = vadd.f32 %v7675_v45, %v7674_v13  ;;  %v7682_v30 = vrot.slane %v7681_v42, 4 }
 0x5f1   :  { %v7677_v17 = vrot.slane %v7676_v14, 2  ;;  %v7683_v60 = vadd.f32 %v7682_v30, %v7681_v42 }
 0x5f3   :  { %v7678_v19 = vadd.f32 %v7677_v17, %v7676_v14  ;;  %v7684_v5 = vrot.slane %v7683_v60, 2 }
 0x5f5   :  { %v7679_v3 = vrot.slane %v7678_v19, 1  ;;  %v7685_v27 = vadd.f32 %v7684_v5, %v7683_v60 }
 0x5f7   :  { %v7680_v36 = vadd.f32 %v7679_v3, %v7678_v19  ;;  %v7686_v48 = vrot.slane %v7685_v27, 1  ;;  %v8781_v19 = vld [vmem:[#allocation23] ss:$0 sm:$0xff] }
 0x5f9   :  { %v7688_v21 = vmul.f32 0.5, %v7680_v36  ;;  %v7687_v6 = vadd.f32 %v7686_v48, %v7685_v27  ;;  %v8782_v27 = vld [vmem:[#allocation25] ss:$0 sm:$0xff] }
 0x5fb   :  { %v7703_v8 = vadd.f32 1e-05, %v7688_v21  ;;  %v7689_v43 = vmul.f32 0.5, %v7687_v6  ;;  %v8783_v21 = vld [vmem:[#allocation28] ss:$0 sm:$0xff] }
 0x5fd   :  { %9102 = vrsqrt.f32 %v7703_v8  ;;  %v7704_v26 = vadd.f32 1e-05, %v7689_v43 }
 0x5ff   :  { %9104 = vrsqrt.f32 %v7704_v26 }
 0x60a   :  { %v9103_v55 = vpop.eup %9102 }
 0x60b   :  { %v7707_v38 = vmul.f32 %v9103_v55, %v7701_v0 }
 0x60c   :  { %v9105_v11 = vpop.eup %9104 }
 0x60d   :  { %v7708_v40 = vmul.f32 %v9105_v11, %v7702_v41  ;;  %v7720_v31 = vadd.f32 %v7713_v51, %v7707_v38 }
 0x60f   :  { %v7721_v58 = vadd.f32 %v7717_v35, %v7708_v40  ;;  %v7722_v37 = vpack.c.bf16 %v7720_v31, %v7720_v31 }
 0x611   :  { %v7723_v18 = vpack.c.bf16 %v7721_v58, %v7721_v58 }
 0x613   :  { %7891 = vmatprep.mubr.bf16.mxu1 %v7723_v18 }
 0x614   :  { %7892 = vmatmul.mubr.bf16.vlgmr.msra.gmra.mxu1 %v7722_v37 }
 0x6d4   :  { %v8807_v50 = vpop.f32.mrf.mxu1 }
 0x6d6   :  { %v8808_v24 = vpop.f32.mrf.mxu1 }
 0x6d7   :  { %v8809_v44 = vadd.f32 %v8808_v24, %v8807_v50 }
 0x6d8   :  { %v8810_v15 = vpop.f32.mrf.mxu1 }
 0x6d9   :  { %v7894_v29 = vadd.f32 %v8809_v44, %v8764_v4 }
 0x6da   :  { %v8811_v53 = vpop.f32.mrf.mxu1 }
 0x6db   :  { %vm7899_vm3 = vcmp.gt.f32.partialorder %v7894_v29, 0.0  ;;  %v7900_v47 = vmul.f32 0.01, %v7894_v29 }
 0x6dd   :  { %v7901_v34 = vsel %vm7899_vm3, %v7894_v29, %v7900_v47 }
 0x6de   :  { %v7905_v32 = vsel %vm7904_vm5, %v7901_v34, 0.0 }
 0x6df   :  { %v7906_v12 = vrot.slane %v7905_v32, 4 }
 0x6e1   :  { %v7907_v46 = vadd.f32 %v7906_v12, %v7905_v32 }
 0x6e3   :  { %v7908_v57 = vrot.slane %v7907_v46, 2 }
 0x6e5   :  { %v7909_v16 = vadd.f32 %v7908_v57, %v7907_v46 }
 0x6e7   :  { %v7910_v56 = vrot.slane %v7909_v16, 1 }
 0x6e9   :  { %v7911_v22 = vadd.f32 %v7910_v56, %v7909_v16 }
 0x6eb   :  { %v7912_v59 = vmul.f32 0.5, %v7911_v22 }
 0x6ed   :  { %v7913_v61 = vsub.f32 %v7901_v34, %v7912_v59 }
 0x6ef   :  { %v7914_v52 = vmul.f32 %v7913_v61, %v7913_v61  ;;  %v7929_v5 = vmul.f32 %v8781_v19, %v7913_v61 }
 0x6f1   :  { %v7915_v33 = vsel %vm7904_vm5, %v7914_v52, 0.0 }
 0x6f2   :  { %v7916_v13 = vrot.slane %v7915_v33, 4 }
 0x6f4   :  { %v7917_v63 = vadd.f32 %v7916_v13, %v7915_v33 }
 0x6f6   :  { %v7918_v45 = vrot.slane %v7917_v63, 2 }
 0x6f8   :  { %v7919_v42 = vadd.f32 %v7918_v45, %v7917_v63 }
 0x6fa   :  { %v7920_v14 = vrot.slane %v7919_v42, 1 }
 0x6fc   :  { %v7921_v30 = vadd.f32 %v7920_v14, %v7919_v42 }
 0x6fe   :  { %v7922_v17 = vmul.f32 0.5, %v7921_v30 }
 0x700   :  { %v7930_v60 = vadd.f32 1e-05, %v7922_v17 }
 0x702   :  { %9106 = vrsqrt.f32 %v7930_v60 }
 0x70f   :  { %v9107_v3 = vpop.eup %9106 }
 0x710   :  { %v7932_v36 = vmul.f32 %v9107_v3, %v7929_v5 }
 0x712   :  { %v7939_v48 = vadd.f32 %v8782_v27, %v7932_v36 }
 0x714   :  { %8849 = vmatmul.mubr.msk.f32.vlgmr.msra.gmra.mxu0 %vm397_vm4, %v7939_v48 }
 0x7d4   :  { %v8024_v6 = vpop.f32.mrf.mxu0 }
 0x7d5   :  { %v8025_v8 = vadd.f32 %v8783_v21, %v8024_v6 }
 0x7d6   :  { %v8850_v43 = vpop.f32.mrf.mxu0 }
 0x7d7   :  { %8028 = vst [vmem:[#allocation29] sm:$0x3] %v8025_v8 }
 0x7d8   :  { %9459 = shalt.err (!%p9456_p5)
}
 0x7d9   :  { %8038 = dma.vmem_to_hbm [thread:$0]  %s8036_s22, 32, %s10471_s19, [#allocation4]  }
 0x7da   :  { %9486 = dma.done.wait [#allocation4], 32  }
 0x7db   :  { %9487 = vsyncadd [#allocation4], 4294967264 }
 0x7dc   :  { %8042 = vsyncpa [#allocation3], 1 }
 0x7dd   :  { %8043 = vsyncpa [#allocation6], 1 }
 0x7de   :  { %8044 = vsyncpa [#allocation9], 1 }
 0x7df   :  { %8045 = vsyncpa [#allocation12], 1 }
 0x7e0   :  { %8046 = vsyncpa [#allocation15], 1 }
 0x7e1   :  { %8047 = vsyncpa [#allocation18], 1 }
 0x7e2   :  { %8048 = vsyncpa [#allocation21], 1 }
 0x7e3   :  { %8049 = vsyncpa [#allocation24], 1 }
 0x7e4   :  { %8050 = vsyncpa [#allocation27], 1 }
 0x7e5   :  { %8051 = vsyncpa [#allocation4], 1 }

</bundles_post_ra>
